<compile_context>
chip_gen: v6e
topology: v6e:2x2x1
jax: 0.10.0
libtpu: 0.0.40
codegen_flags: <defaults>
</compile_context>

<pallas_src>
import functools
import math

import jax
import jax.numpy as jnp
from jax.experimental import pallas as pl
from jax.experimental.pallas import tpu as pltpu

_TARGET_BLOCK_BYTES = 16 * 1024 * 1024   # combined per-grid-step HBM bytes
_VMEM_BUDGET_BYTES = 48 * 1024 * 1024    # double-buffered working-set target (v7x: 64 MiB/TC)
_NUM_BINS = 32                           # OHEM-threshold histogram bins (NLL space)
_STATS_W = 128                           # lane-padded stats row (bins + valid count)
_KEEP_ALL_NLL = -0.5                     # "keep every valid pixel" threshold
_NLL_IGNORE = -1.0                       # nll sentinel for ignored pixels
_UNROLL_C_LIMIT = 32                     # fully unroll the class loop up to this C
_CLASS_CHUNK = 8                         # fori_loop chunk size for larger C


def _nll_bin_edges(thresh):
    """Static, descending NLL thresholds: edge[0] = -log(thresh) (exact common
    case), the rest geometrically spaced down to ~1e-3 (prob ~0.999)."""
    t = min(max(float(thresh), 1e-6), 1.0 - 1e-6)
    t0 = -math.log(t)
    t_min = min(1e-3, t0 / 64.0)
    r = (t_min / t0) ** (1.0 / (_NUM_BINS - 1))
    return tuple(t0 * (r ** i) for i in range(_NUM_BINS))


def _choose_rows(h, bytes_per_row, batch):
    """Rows per block: ~16 MiB of per-step traffic, fits the VMEM budget,
    multiple of 8 (or full H), and >= 2 grid blocks so both v7x cores work."""
    bytes_per_row = max(1, int(bytes_per_row))
    rows = _TARGET_BLOCK_BYTES // bytes_per_row
    vmem_rows = (_VMEM_BUDGET_BYTES // 2 - (1 << 20)) // bytes_per_row
    rows = max(1, min(rows, vmem_rows))
    if rows >= h:
        rows = h
    else:
        rows = max(8, (rows // 8) * 8)
    if batch * pl.cdiv(h, rows) < 2 and h >= 16:
        rows = max(8, ((h // 2) // 8) * 8)
    return min(rows, h)


def _pixel_vmem_limit(c, rows, w, itemsize):
    logits_blk = c * rows * w * itemsize
    pix_blk = rows * w * 4
    per_step = 2 * logits_blk + 3 * pix_blk + 2 * _STATS_W * 4
    # NOTE: for extreme C*W the 8-row minimum block can exceed the 48 MiB
    # budget; we request the true footprint (fits v5e/v6e's 128 MiB VMEM, may
    # exceed v7x's 64 MiB/TC ceiling).
    return int(2 * per_step + (8 << 20))


def _reduce_vmem_limit(rows, w):
    per_step = 2 * rows * w * 4 + 8 * 4
    return int(2 * per_step + (4 << 20))


def _pixel_kernel(lm_ref, la_ref, tgt_ref, nm_ref, na_ref, st_ref, *,
                  ignore_index, num_classes, nll_edges, h_total, tile_h, ragged):
    """Per-pixel -log_softmax[target] for both heads + per-block OHEM stats.

    Refs (batch dim squeezed):
      lm_ref/la_ref: (C, TILE_H, W)   logits of main / aux head
      tgt_ref      : (TILE_H, W)      int32 targets
      nm_ref/na_ref: (TILE_H, W)      f32 NLL outputs (sentinel -1 if ignored)
      st_ref       : (2, _STATS_W)    cumulative counts at the NLL edges + n_valid
    """
    tgt = tgt_ref[...]
    valid = tgt != ignore_index
    if ragged:                                   # mask rows past the image bottom
        rows_left = h_total - pl.program_id(1) * tile_h
        rid = jax.lax.broadcasted_iota(jnp.int32, tgt.shape, 0)
        valid = jnp.logical_and(valid, rid < rows_left)
    tclamp = jnp.where(valid, tgt, 0)

    def head_nll(logits_ref):
        if num_classes <= _UNROLL_C_LIMIT:
            m = logits_ref[0].astype(jnp.float32)
            for ci in range(1, num_classes):
                m = jnp.maximum(m, logits_ref[ci].astype(jnp.float32))
            s = jnp.zeros_like(m)
            zt = jnp.zeros_like(m)
            for ci in range(num_classes):
                z = logits_ref[ci].astype(jnp.float32) - m
                s = s + jnp.exp(z)
                zt = jnp.where(tclamp == ci, z, zt)
        else:
            # Chunked class loop: bounded straight-line code / vreg pressure.
            shape = tgt.shape
            nfull = num_classes // _CLASS_CHUNK

            def max_body(j, m):
                c0 = j * _CLASS_CHUNK
                for cj in range(_CLASS_CHUNK):
                    m = jnp.maximum(m, logits_ref[c0 + cj].astype(jnp.float32))
                return m

            m = jnp.full(shape, -jnp.inf, dtype=jnp.float32)
            m = jax.lax.fori_loop(0, nfull, max_body, m)
            for ci in range(nfull * _CLASS_CHUNK, num_classes):
                m = jnp.maximum(m, logits_ref[ci].astype(jnp.float32))

            def sum_body(j, carry):
                s, zt = carry
                c0 = j * _CLASS_CHUNK
                for cj in range(_CLASS_CHUNK):
                    ci = c0 + cj
                    z = logits_ref[ci].astype(jnp.float32) - m
                    s = s + jnp.exp(z)
                    zt = jnp.where(tclamp == ci, z, zt)
                return s, zt

            s, zt = jax.lax.fori_loop(
                0, nfull, sum_body,
                (jnp.zeros(shape, jnp.float32), jnp.zeros(shape, jnp.float32)))
            for ci in range(nfull * _CLASS_CHUNK, num_classes):
                z = logits_ref[ci].astype(jnp.float32) - m
                s = s + jnp.exp(z)
                zt = jnp.where(tclamp == ci, z, zt)

        nll = jnp.log(s) - zt                     # exact -log_softmax[target]
        return jnp.where(valid, nll, jnp.float32(_NLL_IGNORE))

    nll_m = head_nll(lm_ref)
    nll_a = head_nll(la_ref)
    nm_ref[...] = nll_m
    na_ref[...] = nll_a

    # Per-block OHEM stats: counts[b] = #valid px with nll >= edge[b]
    # (== #px with target-prob <= exp(-edge[b])); entry _NUM_BINS = #valid px.
    lane = jax.lax.broadcasted_iota(jnp.int32, (1, _STATS_W), 1)
    vcnt = jnp.sum(valid.astype(jnp.float32))

    def stats_row(nll):
        row = vcnt * (lane == _NUM_BINS).astype(jnp.float32)
        for b_idx, t in enumerate(nll_edges):
            cnt = jnp.sum((nll >= t).astype(jnp.float32))
            row = row + cnt * (lane == b_idx).astype(jnp.float32)
        return row

    st_ref[0:1, :] = stats_row(nll_m)
    st_ref[1:2, :] = stats_row(nll_a)


def _reduce_kernel(thr_ref, nm_ref, na_ref, out_ref, *, h_total, tile_h, ragged):
    """Per-block partial [sum_main, cnt_main, sum_aux, cnt_aux] of kept NLL."""
    nm = nm_ref[...]
    na = na_ref[...]
    kept_m = nm >= thr_ref[0]        # sentinel -1 < any threshold => auto-excluded
    kept_a = na >= thr_ref[1]
    if ragged:
        rows_left = h_total - pl.program_id(1) * tile_h
        rid = jax.lax.broadcasted_iota(jnp.int32, nm.shape, 0)
        inb = rid < rows_left
        kept_m = jnp.logical_and(kept_m, inb)
        kept_a = jnp.logical_and(kept_a, inb)
    km = kept_m.astype(jnp.float32)
    ka = kept_a.astype(jnp.float32)
    s_m = jnp.sum(nm * km)
    c_m = jnp.sum(km)
    s_a = jnp.sum(na * ka)
    c_a = jnp.sum(ka)
    lane = jax.lax.broadcasted_iota(jnp.int32, (1, 8), 1)
    out_ref[...] = (s_m * (lane == 0).astype(jnp.float32)
                    + c_m * (lane == 1).astype(jnp.float32)
                    + s_a * (lane == 2).astype(jnp.float32)
                    + c_a * (lane == 3).astype(jnp.float32))


def _select_threshold(counts, num_valid, edges_arr, min_kept):
    """OHEM threshold (in NLL space) from the cumulative histogram counts."""
    if min_kept <= 0:
        return jnp.float32(_KEEP_ALL_NLL)    # torch: no OHEM filter when min_kept==0
    k = jnp.int32(min_kept)
    meets = counts >= k                      # first edge (largest nll) meeting min_kept
    b_star = jnp.argmax(meets)
    thr = jnp.where(jnp.any(meets), edges_arr[b_star], jnp.float32(_KEEP_ALL_NLL))
    # torch applies the filter only when num_valid >= min_kept (> 0).
    # TODO(synk): torch also prints 'Labels: {num_valid}' in that branch; a
    # host-side print has no Pallas equivalent and is omitted.
    return jnp.where(num_valid >= k, thr, jnp.float32(_KEEP_ALL_NLL))


def ohem_with_aux(pred_main, pred_aux, target, *, ignore_index=255, thresh=0.7,
                  min_kept=10000, aux_weight=0.4):
    """OhemWithAux.forward: main_loss(x_main) + aux_weight * aux_loss(x_aux)."""
    assert pred_main.shape == pred_aux.shape, "main/aux heads must share a shape"
    b, c, h, w = pred_main.shape
    target = target.astype(jnp.int32)
    itemsize = jnp.dtype(pred_main.dtype).itemsize
    nll_edges = _nll_bin_edges(thresh)

    # ---- pass 1: fused per-pixel NLL (both heads) + per-block OHEM stats ----
    tile_h = _choose_rows(h, 2 * c * w * itemsize + 3 * w * 4, b)
    nh = pl.cdiv(h, tile_h)
    ragged = (h % tile_h) != 0
    logit_spec = pl.BlockSpec((None, c, tile_h, w), lambda bi, hi: (bi, 0, hi, 0))
    pix_spec = pl.BlockSpec((None, tile_h, w), lambda bi, hi: (bi, hi, 0))
    stats_spec = pl.BlockSpec((None, None, 2, _STATS_W), lambda bi, hi: (bi, hi, 0, 0))

    nll_m, nll_a, stats = pl.pallas_call(
        functools.partial(_pixel_kernel, ignore_index=int(ignore_index),
                          num_classes=c, nll_edges=nll_edges,
                          h_total=h, tile_h=tile_h, ragged=ragged),
        grid=(b, nh),
        in_specs=[logit_spec, logit_spec, pix_spec],
        out_specs=[pix_spec, pix_spec, stats_spec],
        out_shape=[jax.ShapeDtypeStruct((b, h, w), jnp.float32),
                   jax.ShapeDtypeStruct((b, h, w), jnp.float32),
                   jax.ShapeDtypeStruct((b, nh, 2, _STATS_W), jnp.float32)],
        compiler_params=pltpu.CompilerParams(
            dimension_semantics=("parallel", "parallel"),
            vmem_limit_bytes=_pixel_vmem_limit(c, tile_h, w, itemsize)),
    )(pred_main, pred_aux, target)

    # ---- tiny glue (plain JAX): OHEM threshold from the histogram stats ----
    tot = jnp.sum(stats.astype(jnp.int32), axis=(0, 1))          # (2, _STATS_W)
    num_valid = tot[0, _NUM_BINS]
    edges_arr = jnp.asarray(nll_edges, dtype=jnp.float32)
    thr_m = _select_threshold(tot[0, :_NUM_BINS], num_valid, edges_arr, int(min_kept))
    thr_a = _select_threshold(tot[1, :_NUM_BINS], num_valid, edges_arr, int(min_kept))
    thr = jnp.stack([thr_m, thr_a]).astype(jnp.float32)

    # ---- pass 2: fused kept-NLL (sum, count) partials for both heads ----
    tile_h2 = _choose_rows(h, 2 * w * 4, b)
    nh2 = pl.cdiv(h, tile_h2)
    ragged2 = (h % tile_h2) != 0
    pix_spec2 = pl.BlockSpec((None, tile_h2, w), lambda bi, hi: (bi, hi, 0))
    part_spec = pl.BlockSpec((None, None, 1, 8), lambda bi, hi: (bi, hi, 0, 0))
    parts = pl.pallas_call(
        functools.partial(_reduce_kernel, h_total=h, tile_h=tile_h2, ragged=ragged2),
        grid=(b, nh2),
        in_specs=[pl.BlockSpec(memory_space=pltpu.MemorySpace.SMEM),
                  pix_spec2, pix_spec2],
        out_specs=part_spec,
        out_shape=jax.ShapeDtypeStruct((b, nh2, 1, 8), jnp.float32),
        compiler_params=pltpu.CompilerParams(
            dimension_semantics=("parallel", "parallel"),
            vmem_limit_bytes=_reduce_vmem_limit(tile_h2, w)),
    )(thr, nll_m, nll_a)

    tot_p = jnp.sum(parts, axis=(0, 1, 2))                        # (8,)
    # CrossEntropyLoss(ignore_index=...) mean over kept px; 0/0 -> NaN (torch).
    loss_main = tot_p[0] / tot_p[1]
    loss_aux = tot_p[2] / tot_p[3]
    return loss_main + aux_weight * loss_aux


if __name__ == "__main__":
    key = jax.random.PRNGKey(0)
    k1, k2, k3, k4 = jax.random.split(key, 4)

    B, C, H, W = 2, 8, 16, 16            # small NCHW logits, 8 classes
    x_main = jax.random.normal(k1, (B, C, H, W), jnp.float32)
    x_aux = jax.random.normal(k2, (B, C, H, W), jnp.float32)
    target = jax.random.randint(k3, (B, H, W), 0, C, jnp.int32)
    ignore_mask = jax.random.bernoulli(k4, 0.2, (B, H, W))
    target = jnp.where(ignore_mask, 255, target)   # ~20% ignored pixels

    # min_kept=64 (< num_valid) so the OHEM hard-example filtering path runs.
    loss_fn = jax.jit(functools.partial(
        ohem_with_aux, ignore_index=255, thresh=0.7, min_kept=64, aux_weight=0.4))
    loss = jax.block_until_ready(loss_fn(x_main, x_aux, target))

    # Pure-JAX reference with torch OhemCrossEntropy2dTensor semantics.
    def _ref_head(pred, tgt, ignore_index=255, thresh=0.7, min_kept=64):
        bb, cc, hh, ww = pred.shape
        lsm = jax.nn.log_softmax(pred.astype(jnp.float32), axis=1)
        valid = tgt != ignore_index
        tc = jnp.where(valid, tgt, 0).reshape(bb, 1, hh, ww)
        nll = -jnp.take_along_axis(lsm, tc, axis=1)[:, 0]
        prob = jnp.exp(-nll)
        probf = jnp.where(valid, prob, 1.0).reshape(-1)
        num_valid = jnp.sum(valid)
        kept = valid
        if min_kept > 0:
            kth = jnp.sort(probf)[min(probf.size, min_kept) - 1]
            threshold = jnp.maximum(kth, jnp.float32(thresh))
            kept = jnp.where(num_valid >= min_kept,
                             valid & (prob <= threshold), valid)
        return jnp.sum(jnp.where(kept, nll, 0.0)) / jnp.sum(kept)

    ref = _ref_head(x_main, target) + 0.4 * _ref_head(x_aux, target)
    assert bool(jnp.isfinite(loss))
    assert abs(float(loss) - float(ref)) <= 1e-2 * max(1.0, abs(float(ref)))
    print("KERNEL_OK")
</pallas_src>

<mosaic_0001>
module attributes {stable_mosaic.version = 11 : i64} {
  func.func @_pixel_kernel(%arg0: i32, %arg1: i32, %arg2: memref<1x8x16x16xf32, #tpu.memory_space<vmem>>, %arg3: memref<1x8x16x16xf32, #tpu.memory_space<vmem>>, %arg4: memref<1x16x16xi32, #tpu.memory_space<vmem>>, %arg5: memref<1x16x16xf32, #tpu.memory_space<vmem>>, %arg6: memref<1x16x16xf32, #tpu.memory_space<vmem>>, %arg7: memref<1x1x2x128xf32, #tpu.memory_space<vmem>>) attributes {dimension_semantics = [#tpu.dimension_semantics<parallel>, #tpu.dimension_semantics<parallel>], iteration_bounds = array<i64: 2, 1>, scalar_prefetch = 0 : i64, scratch_operands = 0 : i64, tpu.core_type = #tpu.core_type<tc>, window_params = [{transform_indices = @transform_0, window_bounds = array<i64: 1, 8, 16, 16>}, {transform_indices = @transform_1, window_bounds = array<i64: 1, 8, 16, 16>}, {transform_indices = @transform_2, window_bounds = array<i64: 1, 16, 16>}, {transform_indices = @transform_3, window_bounds = array<i64: 1, 16, 16>}, {transform_indices = @transform_4, window_bounds = array<i64: 1, 16, 16>}, {transform_indices = @transform_5, window_bounds = array<i64: 1, 1, 2, 128>}]} {
    %c0 = arith.constant 0 : index
    %c0_0 = arith.constant 0 : index
    %c0_1 = arith.constant 0 : index
    %0 = vector.load %arg4[%c0, %c0_0, %c0_1] : memref<1x16x16xi32, #tpu.memory_space<vmem>>, vector<1x16x16xi32>
    %1 = vector.shape_cast %0 : vector<1x16x16xi32> to vector<16x16xi32>
    %c255_i32 = arith.constant 255 : i32
    %2 = vector.broadcast %c255_i32 : i32 to vector<16x16xi32>
    %3 = arith.cmpi ne, %1, %2 : vector<16x16xi32>
    %c0_i32 = arith.constant 0 : i32
    %4 = vector.broadcast %c0_i32 : i32 to vector<16x16xi32>
    %5 = arith.select %3, %1, %4 : vector<16x16xi1>, vector<16x16xi32>
    %c0_2 = arith.constant 0 : index
    %c0_3 = arith.constant 0 : index
    %c0_4 = arith.constant 0 : index
    %c0_5 = arith.constant 0 : index
    %6 = vector.load %arg2[%c0_2, %c0_3, %c0_4, %c0_5] : memref<1x8x16x16xf32, #tpu.memory_space<vmem>>, vector<1x1x16x16xf32>
    %7 = vector.shape_cast %6 : vector<1x1x16x16xf32> to vector<16x16xf32>
    %c0_6 = arith.constant 0 : index
    %c1 = arith.constant 1 : index
    %c0_7 = arith.constant 0 : index
    %c0_8 = arith.constant 0 : index
    %8 = vector.load %arg2[%c0_6, %c1, %c0_7, %c0_8] : memref<1x8x16x16xf32, #tpu.memory_space<vmem>>, vector<1x1x16x16xf32>
    %9 = vector.shape_cast %8 : vector<1x1x16x16xf32> to vector<16x16xf32>
    %10 = arith.maximumf %7, %9 : vector<16x16xf32>
    %c0_9 = arith.constant 0 : index
    %c2 = arith.constant 2 : index
    %c0_10 = arith.constant 0 : index
    %c0_11 = arith.constant 0 : index
    %11 = vector.load %arg2[%c0_9, %c2, %c0_10, %c0_11] : memref<1x8x16x16xf32, #tpu.memory_space<vmem>>, vector<1x1x16x16xf32>
    %12 = vector.shape_cast %11 : vector<1x1x16x16xf32> to vector<16x16xf32>
    %13 = arith.maximumf %10, %12 : vector<16x16xf32>
    %c0_12 = arith.constant 0 : index
    %c3 = arith.constant 3 : index
    %c0_13 = arith.constant 0 : index
    %c0_14 = arith.constant 0 : index
    %14 = vector.load %arg2[%c0_12, %c3, %c0_13, %c0_14] : memref<1x8x16x16xf32, #tpu.memory_space<vmem>>, vector<1x1x16x16xf32>
    %15 = vector.shape_cast %14 : vector<1x1x16x16xf32> to vector<16x16xf32>
    %16 = arith.maximumf %13, %15 : vector<16x16xf32>
    %c0_15 = arith.constant 0 : index
    %c4 = arith.constant 4 : index
    %c0_16 = arith.constant 0 : index
    %c0_17 = arith.constant 0 : index
    %17 = vector.load %arg2[%c0_15, %c4, %c0_16, %c0_17] : memref<1x8x16x16xf32, #tpu.memory_space<vmem>>, vector<1x1x16x16xf32>
    %18 = vector.shape_cast %17 : vector<1x1x16x16xf32> to vector<16x16xf32>
    %19 = arith.maximumf %16, %18 : vector<16x16xf32>
    %c0_18 = arith.constant 0 : index
    %c5 = arith.constant 5 : index
    %c0_19 = arith.constant 0 : index
    %c0_20 = arith.constant 0 : index
    %20 = vector.load %arg2[%c0_18, %c5, %c0_19, %c0_20] : memref<1x8x16x16xf32, #tpu.memory_space<vmem>>, vector<1x1x16x16xf32>
    %21 = vector.shape_cast %20 : vector<1x1x16x16xf32> to vector<16x16xf32>
    %22 = arith.maximumf %19, %21 : vector<16x16xf32>
    %c0_21 = arith.constant 0 : index
    %c6 = arith.constant 6 : index
    %c0_22 = arith.constant 0 : index
    %c0_23 = arith.constant 0 : index
    %23 = vector.load %arg2[%c0_21, %c6, %c0_22, %c0_23] : memref<1x8x16x16xf32, #tpu.memory_space<vmem>>, vector<1x1x16x16xf32>
    %24 = vector.shape_cast %23 : vector<1x1x16x16xf32> to vector<16x16xf32>
    %25 = arith.maximumf %22, %24 : vector<16x16xf32>
    %c0_24 = arith.constant 0 : index
    %c7 = arith.constant 7 : index
    %c0_25 = arith.constant 0 : index
    %c0_26 = arith.constant 0 : index
    %26 = vector.load %arg2[%c0_24, %c7, %c0_25, %c0_26] : memref<1x8x16x16xf32, #tpu.memory_space<vmem>>, vector<1x1x16x16xf32>
    %27 = vector.shape_cast %26 : vector<1x1x16x16xf32> to vector<16x16xf32>
    %28 = arith.maximumf %25, %27 : vector<16x16xf32>
    %cst = arith.constant 0.000000e+00 : f32
    %29 = vector.broadcast %cst : f32 to vector<16x16xf32>
    %cst_27 = arith.constant 0.000000e+00 : f32
    %30 = vector.broadcast %cst_27 : f32 to vector<16x16xf32>
    %c0_28 = arith.constant 0 : index
    %c0_29 = arith.constant 0 : index
    %c0_30 = arith.constant 0 : index
    %c0_31 = arith.constant 0 : index
    %31 = vector.load %arg2[%c0_28, %c0_29, %c0_30, %c0_31] : memref<1x8x16x16xf32, #tpu.memory_space<vmem>>, vector<1x1x16x16xf32>
    %32 = vector.shape_cast %31 : vector<1x1x16x16xf32> to vector<16x16xf32>
    %33 = arith.subf %32, %28 : vector<16x16xf32>
    %34 = math.exp %33 : vector<16x16xf32>
    %35 = arith.addf %29, %34 : vector<16x16xf32>
    %c0_i32_32 = arith.constant 0 : i32
    %36 = vector.broadcast %c0_i32_32 : i32 to vector<16x16xi32>
    %37 = arith.cmpi eq, %5, %36 : vector<16x16xi32>
    %38 = arith.select %37, %33, %30 : vector<16x16xi1>, vector<16x16xf32>
    %c0_33 = arith.constant 0 : index
    %c1_34 = arith.constant 1 : index
    %c0_35 = arith.constant 0 : index
    %c0_36 = arith.constant 0 : index
    %39 = vector.load %arg2[%c0_33, %c1_34, %c0_35, %c0_36] : memref<1x8x16x16xf32, #tpu.memory_space<vmem>>, vector<1x1x16x16xf32>
    %40 = vector.shape_cast %39 : vector<1x1x16x16xf32> to vector<16x16xf32>
    %41 = arith.subf %40, %28 : vector<16x16xf32>
    %42 = math.exp %41 : vector<16x16xf32>
    %43 = arith.addf %35, %42 : vector<16x16xf32>
    %c1_i32 = arith.constant 1 : i32
    %44 = vector.broadcast %c1_i32 : i32 to vector<16x16xi32>
    %45 = arith.cmpi eq, %5, %44 : vector<16x16xi32>
    %46 = arith.select %45, %41, %38 : vector<16x16xi1>, vector<16x16xf32>
    %c0_37 = arith.constant 0 : index
    %c2_38 = arith.constant 2 : index
    %c0_39 = arith.constant 0 : index
    %c0_40 = arith.constant 0 : index
    %47 = vector.load %arg2[%c0_37, %c2_38, %c0_39, %c0_40] : memref<1x8x16x16xf32, #tpu.memory_space<vmem>>, vector<1x1x16x16xf32>
    %48 = vector.shape_cast %47 : vector<1x1x16x16xf32> to vector<16x16xf32>
    %49 = arith.subf %48, %28 : vector<16x16xf32>
    %50 = math.exp %49 : vector<16x16xf32>
    %51 = arith.addf %43, %50 : vector<16x16xf32>
    %c2_i32 = arith.constant 2 : i32
    %52 = vector.broadcast %c2_i32 : i32 to vector<16x16xi32>
    %53 = arith.cmpi eq, %5, %52 : vector<16x16xi32>
    %54 = arith.select %53, %49, %46 : vector<16x16xi1>, vector<16x16xf32>
    %c0_41 = arith.constant 0 : index
    %c3_42 = arith.constant 3 : index
    %c0_43 = arith.constant 0 : index
    %c0_44 = arith.constant 0 : index
    %55 = vector.load %arg2[%c0_41, %c3_42, %c0_43, %c0_44] : memref<1x8x16x16xf32, #tpu.memory_space<vmem>>, vector<1x1x16x16xf32>
    %56 = vector.shape_cast %55 : vector<1x1x16x16xf32> to vector<16x16xf32>
    %57 = arith.subf %56, %28 : vector<16x16xf32>
    %58 = math.exp %57 : vector<16x16xf32>
    %59 = arith.addf %51, %58 : vector<16x16xf32>
    %c3_i32 = arith.constant 3 : i32
    %60 = vector.broadcast %c3_i32 : i32 to vector<16x16xi32>
    %61 = arith.cmpi eq, %5, %60 : vector<16x16xi32>
    %62 = arith.select %61, %57, %54 : vector<16x16xi1>, vector<16x16xf32>
    %c0_45 = arith.constant 0 : index
    %c4_46 = arith.constant 4 : index
    %c0_47 = arith.constant 0 : index
    %c0_48 = arith.constant 0 : index
    %63 = vector.load %arg2[%c0_45, %c4_46, %c0_47, %c0_48] : memref<1x8x16x16xf32, #tpu.memory_space<vmem>>, vector<1x1x16x16xf32>
    %64 = vector.shape_cast %63 : vector<1x1x16x16xf32> to vector<16x16xf32>
    %65 = arith.subf %64, %28 : vector<16x16xf32>
    %66 = math.exp %65 : vector<16x16xf32>
    %67 = arith.addf %59, %66 : vector<16x16xf32>
    %c4_i32 = arith.constant 4 : i32
    %68 = vector.broadcast %c4_i32 : i32 to vector<16x16xi32>
    %69 = arith.cmpi eq, %5, %68 : vector<16x16xi32>
    %70 = arith.select %69, %65, %62 : vector<16x16xi1>, vector<16x16xf32>
    %c0_49 = arith.constant 0 : index
    %c5_50 = arith.constant 5 : index
    %c0_51 = arith.constant 0 : index
    %c0_52 = arith.constant 0 : index
    %71 = vector.load %arg2[%c0_49, %c5_50, %c0_51, %c0_52] : memref<1x8x16x16xf32, #tpu.memory_space<vmem>>, vector<1x1x16x16xf32>
    %72 = vector.shape_cast %71 : vector<1x1x16x16xf32> to vector<16x16xf32>
    %73 = arith.subf %72, %28 : vector<16x16xf32>
    %74 = math.exp %73 : vector<16x16xf32>
    %75 = arith.addf %67, %74 : vector<16x16xf32>
    %c5_i32 = arith.constant 5 : i32
    %76 = vector.broadcast %c5_i32 : i32 to vector<16x16xi32>
    %77 = arith.cmpi eq, %5, %76 : vector<16x16xi32>
    %78 = arith.select %77, %73, %70 : vector<16x16xi1>, vector<16x16xf32>
    %c0_53 = arith.constant 0 : index
    %c6_54 = arith.constant 6 : index
    %c0_55 = arith.constant 0 : index
    %c0_56 = arith.constant 0 : index
    %79 = vector.load %arg2[%c0_53, %c6_54, %c0_55, %c0_56] : memref<1x8x16x16xf32, #tpu.memory_space<vmem>>, vector<1x1x16x16xf32>
    %80 = vector.shape_cast %79 : vector<1x1x16x16xf32> to vector<16x16xf32>
    %81 = arith.subf %80, %28 : vector<16x16xf32>
    %82 = math.exp %81 : vector<16x16xf32>
    %83 = arith.addf %75, %82 : vector<16x16xf32>
    %c6_i32 = arith.constant 6 : i32
    %84 = vector.broadcast %c6_i32 : i32 to vector<16x16xi32>
    %85 = arith.cmpi eq, %5, %84 : vector<16x16xi32>
    %86 = arith.select %85, %81, %78 : vector<16x16xi1>, vector<16x16xf32>
    %c0_57 = arith.constant 0 : index
    %c7_58 = arith.constant 7 : index
    %c0_59 = arith.constant 0 : index
    %c0_60 = arith.constant 0 : index
    %87 = vector.load %arg2[%c0_57, %c7_58, %c0_59, %c0_60] : memref<1x8x16x16xf32, #tpu.memory_space<vmem>>, vector<1x1x16x16xf32>
    %88 = vector.shape_cast %87 : vector<1x1x16x16xf32> to vector<16x16xf32>
    %89 = arith.subf %88, %28 : vector<16x16xf32>
    %90 = math.exp %89 : vector<16x16xf32>
    %91 = arith.addf %83, %90 : vector<16x16xf32>
    %c7_i32 = arith.constant 7 : i32
    %92 = vector.broadcast %c7_i32 : i32 to vector<16x16xi32>
    %93 = arith.cmpi eq, %5, %92 : vector<16x16xi32>
    %94 = arith.select %93, %89, %86 : vector<16x16xi1>, vector<16x16xf32>
    %95 = math.log %91 : vector<16x16xf32>
    %96 = arith.subf %95, %94 : vector<16x16xf32>
    %cst_61 = arith.constant -1.000000e+00 : f32
    %97 = vector.broadcast %cst_61 : f32 to vector<16x16xf32>
    %98 = arith.select %3, %96, %97 : vector<16x16xi1>, vector<16x16xf32>
    %c0_62 = arith.constant 0 : index
    %c0_63 = arith.constant 0 : index
    %c0_64 = arith.constant 0 : index
    %c0_65 = arith.constant 0 : index
    %99 = vector.load %arg3[%c0_62, %c0_63, %c0_64, %c0_65] : memref<1x8x16x16xf32, #tpu.memory_space<vmem>>, vector<1x1x16x16xf32>
    %100 = vector.shape_cast %99 : vector<1x1x16x16xf32> to vector<16x16xf32>
    %c0_66 = arith.constant 0 : index
    %c1_67 = arith.constant 1 : index
    %c0_68 = arith.constant 0 : index
    %c0_69 = arith.constant 0 : index
    %101 = vector.load %arg3[%c0_66, %c1_67, %c0_68, %c0_69] : memref<1x8x16x16xf32, #tpu.memory_space<vmem>>, vector<1x1x16x16xf32>
    %102 = vector.shape_cast %101 : vector<1x1x16x16xf32> to vector<16x16xf32>
    %103 = arith.maximumf %100, %102 : vector<16x16xf32>
    %c0_70 = arith.constant 0 : index
    %c2_71 = arith.constant 2 : index
    %c0_72 = arith.constant 0 : index
    %c0_73 = arith.constant 0 : index
    %104 = vector.load %arg3[%c0_70, %c2_71, %c0_72, %c0_73] : memref<1x8x16x16xf32, #tpu.memory_space<vmem>>, vector<1x1x16x16xf32>
    %105 = vector.shape_cast %104 : vector<1x1x16x16xf32> to vector<16x16xf32>
    %106 = arith.maximumf %103, %105 : vector<16x16xf32>
    %c0_74 = arith.constant 0 : index
    %c3_75 = arith.constant 3 : index
    %c0_76 = arith.constant 0 : index
    %c0_77 = arith.constant 0 : index
    %107 = vector.load %arg3[%c0_74, %c3_75, %c0_76, %c0_77] : memref<1x8x16x16xf32, #tpu.memory_space<vmem>>, vector<1x1x16x16xf32>
    %108 = vector.shape_cast %107 : vector<1x1x16x16xf32> to vector<16x16xf32>
    %109 = arith.maximumf %106, %108 : vector<16x16xf32>
    %c0_78 = arith.constant 0 : index
    %c4_79 = arith.constant 4 : index
    %c0_80 = arith.constant 0 : index
    %c0_81 = arith.constant 0 : index
    %110 = vector.load %arg3[%c0_78, %c4_79, %c0_80, %c0_81] : memref<1x8x16x16xf32, #tpu.memory_space<vmem>>, vector<1x1x16x16xf32>
    %111 = vector.shape_cast %110 : vector<1x1x16x16xf32> to vector<16x16xf32>
    %112 = arith.maximumf %109, %111 : vector<16x16xf32>
    %c0_82 = arith.constant 0 : index
    %c5_83 = arith.constant 5 : index
    %c0_84 = arith.constant 0 : index
    %c0_85 = arith.constant 0 : index
    %113 = vector.load %arg3[%c0_82, %c5_83, %c0_84, %c0_85] : memref<1x8x16x16xf32, #tpu.memory_space<vmem>>, vector<1x1x16x16xf32>
    %114 = vector.shape_cast %113 : vector<1x1x16x16xf32> to vector<16x16xf32>
    %115 = arith.maximumf %112, %114 : vector<16x16xf32>
    %c0_86 = arith.constant 0 : index
    %c6_87 = arith.constant 6 : index
    %c0_88 = arith.constant 0 : index
    %c0_89 = arith.constant 0 : index
    %116 = vector.load %arg3[%c0_86, %c6_87, %c0_88, %c0_89] : memref<1x8x16x16xf32, #tpu.memory_space<vmem>>, vector<1x1x16x16xf32>
    %117 = vector.shape_cast %116 : vector<1x1x16x16xf32> to vector<16x16xf32>
    %118 = arith.maximumf %115, %117 : vector<16x16xf32>
    %c0_90 = arith.constant 0 : index
    %c7_91 = arith.constant 7 : index
    %c0_92 = arith.constant 0 : index
    %c0_93 = arith.constant 0 : index
    %119 = vector.load %arg3[%c0_90, %c7_91, %c0_92, %c0_93] : memref<1x8x16x16xf32, #tpu.memory_space<vmem>>, vector<1x1x16x16xf32>
    %120 = vector.shape_cast %119 : vector<1x1x16x16xf32> to vector<16x16xf32>
    %121 = arith.maximumf %118, %120 : vector<16x16xf32>
    %cst_94 = arith.constant 0.000000e+00 : f32
    %122 = vector.broadcast %cst_94 : f32 to vector<16x16xf32>
    %cst_95 = arith.constant 0.000000e+00 : f32
    %123 = vector.broadcast %cst_95 : f32 to vector<16x16xf32>
    %c0_96 = arith.constant 0 : index
    %c0_97 = arith.constant 0 : index
    %c0_98 = arith.constant 0 : index
    %c0_99 = arith.constant 0 : index
    %124 = vector.load %arg3[%c0_96, %c0_97, %c0_98, %c0_99] : memref<1x8x16x16xf32, #tpu.memory_space<vmem>>, vector<1x1x16x16xf32>
    %125 = vector.shape_cast %124 : vector<1x1x16x16xf32> to vector<16x16xf32>
    %126 = arith.subf %125, %121 : vector<16x16xf32>
    %127 = math.exp %126 : vector<16x16xf32>
    %128 = arith.addf %122, %127 : vector<16x16xf32>
    %c0_i32_100 = arith.constant 0 : i32
    %129 = vector.broadcast %c0_i32_100 : i32 to vector<16x16xi32>
    %130 = arith.cmpi eq, %5, %129 : vector<16x16xi32>
    %131 = arith.select %130, %126, %123 : vector<16x16xi1>, vector<16x16xf32>
    %c0_101 = arith.constant 0 : index
    %c1_102 = arith.constant 1 : index
    %c0_103 = arith.constant 0 : index
    %c0_104 = arith.constant 0 : index
    %132 = vector.load %arg3[%c0_101, %c1_102, %c0_103, %c0_104] : memref<1x8x16x16xf32, #tpu.memory_space<vmem>>, vector<1x1x16x16xf32>
    %133 = vector.shape_cast %132 : vector<1x1x16x16xf32> to vector<16x16xf32>
    %134 = arith.subf %133, %121 : vector<16x16xf32>
    %135 = math.exp %134 : vector<16x16xf32>
    %136 = arith.addf %128, %135 : vector<16x16xf32>
    %c1_i32_105 = arith.constant 1 : i32
    %137 = vector.broadcast %c1_i32_105 : i32 to vector<16x16xi32>
    %138 = arith.cmpi eq, %5, %137 : vector<16x16xi32>
    %139 = arith.select %138, %134, %131 : vector<16x16xi1>, vector<16x16xf32>
    %c0_106 = arith.constant 0 : index
    %c2_107 = arith.constant 2 : index
    %c0_108 = arith.constant 0 : index
    %c0_109 = arith.constant 0 : index
    %140 = vector.load %arg3[%c0_106, %c2_107, %c0_108, %c0_109] : memref<1x8x16x16xf32, #tpu.memory_space<vmem>>, vector<1x1x16x16xf32>
    %141 = vector.shape_cast %140 : vector<1x1x16x16xf32> to vector<16x16xf32>
    %142 = arith.subf %141, %121 : vector<16x16xf32>
    %143 = math.exp %142 : vector<16x16xf32>
    %144 = arith.addf %136, %143 : vector<16x16xf32>
    %c2_i32_110 = arith.constant 2 : i32
    %145 = vector.broadcast %c2_i32_110 : i32 to vector<16x16xi32>
    %146 = arith.cmpi eq, %5, %145 : vector<16x16xi32>
    %147 = arith.select %146, %142, %139 : vector<16x16xi1>, vector<16x16xf32>
    %c0_111 = arith.constant 0 : index
    %c3_112 = arith.constant 3 : index
    %c0_113 = arith.constant 0 : index
    %c0_114 = arith.constant 0 : index
    %148 = vector.load %arg3[%c0_111, %c3_112, %c0_113, %c0_114] : memref<1x8x16x16xf32, #tpu.memory_space<vmem>>, vector<1x1x16x16xf32>
    %149 = vector.shape_cast %148 : vector<1x1x16x16xf32> to vector<16x16xf32>
    %150 = arith.subf %149, %121 : vector<16x16xf32>
    %151 = math.exp %150 : vector<16x16xf32>
    %152 = arith.addf %144, %151 : vector<16x16xf32>
    %c3_i32_115 = arith.constant 3 : i32
    %153 = vector.broadcast %c3_i32_115 : i32 to vector<16x16xi32>
    %154 = arith.cmpi eq, %5, %153 : vector<16x16xi32>
    %155 = arith.select %154, %150, %147 : vector<16x16xi1>, vector<16x16xf32>
    %c0_116 = arith.constant 0 : index
    %c4_117 = arith.constant 4 : index
    %c0_118 = arith.constant 0 : index
    %c0_119 = arith.constant 0 : index
    %156 = vector.load %arg3[%c0_116, %c4_117, %c0_118, %c0_119] : memref<1x8x16x16xf32, #tpu.memory_space<vmem>>, vector<1x1x16x16xf32>
    %157 = vector.shape_cast %156 : vector<1x1x16x16xf32> to vector<16x16xf32>
    %158 = arith.subf %157, %121 : vector<16x16xf32>
    %159 = math.exp %158 : vector<16x16xf32>
    %160 = arith.addf %152, %159 : vector<16x16xf32>
    %c4_i32_120 = arith.constant 4 : i32
    %161 = vector.broadcast %c4_i32_120 : i32 to vector<16x16xi32>
    %162 = arith.cmpi eq, %5, %161 : vector<16x16xi32>
    %163 = arith.select %162, %158, %155 : vector<16x16xi1>, vector<16x16xf32>
    %c0_121 = arith.constant 0 : index
    %c5_122 = arith.constant 5 : index
    %c0_123 = arith.constant 0 : index
    %c0_124 = arith.constant 0 : index
    %164 = vector.load %arg3[%c0_121, %c5_122, %c0_123, %c0_124] : memref<1x8x16x16xf32, #tpu.memory_space<vmem>>, vector<1x1x16x16xf32>
    %165 = vector.shape_cast %164 : vector<1x1x16x16xf32> to vector<16x16xf32>
    %166 = arith.subf %165, %121 : vector<16x16xf32>
    %167 = math.exp %166 : vector<16x16xf32>
    %168 = arith.addf %160, %167 : vector<16x16xf32>
    %c5_i32_125 = arith.constant 5 : i32
    %169 = vector.broadcast %c5_i32_125 : i32 to vector<16x16xi32>
    %170 = arith.cmpi eq, %5, %169 : vector<16x16xi32>
    %171 = arith.select %170, %166, %163 : vector<16x16xi1>, vector<16x16xf32>
    %c0_126 = arith.constant 0 : index
    %c6_127 = arith.constant 6 : index
    %c0_128 = arith.constant 0 : index
    %c0_129 = arith.constant 0 : index
    %172 = vector.load %arg3[%c0_126, %c6_127, %c0_128, %c0_129] : memref<1x8x16x16xf32, #tpu.memory_space<vmem>>, vector<1x1x16x16xf32>
    %173 = vector.shape_cast %172 : vector<1x1x16x16xf32> to vector<16x16xf32>
    %174 = arith.subf %173, %121 : vector<16x16xf32>
    %175 = math.exp %174 : vector<16x16xf32>
    %176 = arith.addf %168, %175 : vector<16x16xf32>
    %c6_i32_130 = arith.constant 6 : i32
    %177 = vector.broadcast %c6_i32_130 : i32 to vector<16x16xi32>
    %178 = arith.cmpi eq, %5, %177 : vector<16x16xi32>
    %179 = arith.select %178, %174, %171 : vector<16x16xi1>, vector<16x16xf32>
    %c0_131 = arith.constant 0 : index
    %c7_132 = arith.constant 7 : index
    %c0_133 = arith.constant 0 : index
    %c0_134 = arith.constant 0 : index
    %180 = vector.load %arg3[%c0_131, %c7_132, %c0_133, %c0_134] : memref<1x8x16x16xf32, #tpu.memory_space<vmem>>, vector<1x1x16x16xf32>
    %181 = vector.shape_cast %180 : vector<1x1x16x16xf32> to vector<16x16xf32>
    %182 = arith.subf %181, %121 : vector<16x16xf32>
    %183 = math.exp %182 : vector<16x16xf32>
    %184 = arith.addf %176, %183 : vector<16x16xf32>
    %c7_i32_135 = arith.constant 7 : i32
    %185 = vector.broadcast %c7_i32_135 : i32 to vector<16x16xi32>
    %186 = arith.cmpi eq, %5, %185 : vector<16x16xi32>
    %187 = arith.select %186, %182, %179 : vector<16x16xi1>, vector<16x16xf32>
    %188 = math.log %184 : vector<16x16xf32>
    %189 = arith.subf %188, %187 : vector<16x16xf32>
    %cst_136 = arith.constant -1.000000e+00 : f32
    %190 = vector.broadcast %cst_136 : f32 to vector<16x16xf32>
    %191 = arith.select %3, %189, %190 : vector<16x16xi1>, vector<16x16xf32>
    %c0_137 = arith.constant 0 : index
    %c0_138 = arith.constant 0 : index
    %c0_139 = arith.constant 0 : index
    %192 = vector.load %arg5[%c0_137, %c0_138, %c0_139] : memref<1x16x16xf32, #tpu.memory_space<vmem>>, vector<1x16x16xf32>
    %193 = vector.shape_cast %192 : vector<1x16x16xf32> to vector<16x16xf32>
    %194 = vector.shape_cast %98 : vector<16x16xf32> to vector<1x16x16xf32>
    tpu.vector_store %arg5[%c0_137, %c0_138, %c0_139], %194 {strides = array<i32>} : memref<1x16x16xf32, #tpu.memory_space<vmem>>, vector<1x16x16xf32>,
    %c0_140 = arith.constant 0 : index
    %c0_141 = arith.constant 0 : index
    %c0_142 = arith.constant 0 : index
    %195 = vector.load %arg6[%c0_140, %c0_141, %c0_142] : memref<1x16x16xf32, #tpu.memory_space<vmem>>, vector<1x16x16xf32>
    %196 = vector.shape_cast %195 : vector<1x16x16xf32> to vector<16x16xf32>
    %197 = vector.shape_cast %191 : vector<16x16xf32> to vector<1x16x16xf32>
    tpu.vector_store %arg6[%c0_140, %c0_141, %c0_142], %197 {strides = array<i32>} : memref<1x16x16xf32, #tpu.memory_space<vmem>>, vector<1x16x16xf32>,
    %198 = tpu.iota {dimensions = array<i32: 1>} : vector<1x128xi32>
    %199 = arith.extui %3 : vector<16x16xi1> to vector<16x16xi32>
    %200 = arith.sitofp %199 : vector<16x16xi32> to vector<16x16xf32>
    %201 = vector.shape_cast %200 : vector<16x16xf32> to vector<1x16x16xf32>
    %cst_143 = arith.constant dense<0.000000e+00> : vector<1xf32>
    %202 = vector.multi_reduction <add>, %201, %cst_143 [1, 2] : vector<1x16x16xf32> to vector<1xf32>
    %203 = vector.shape_cast %202 : vector<1xf32> to vector<1x1x1xf32>
    %204 = vector.extract %203[0, 0, 0] : f32 from vector<1x1x1xf32>
    %c32_i32 = arith.constant 32 : i32
    %205 = vector.broadcast %c32_i32 : i32 to vector<1x128xi32>
    %206 = arith.cmpi eq, %198, %205 : vector<1x128xi32>
    %207 = arith.extui %206 : vector<1x128xi1> to vector<1x128xi32>
    %208 = arith.sitofp %207 : vector<1x128xi32> to vector<1x128xf32>
    %209 = vector.broadcast %204 : f32 to vector<1x128xf32>
    %210 = arith.mulf %209, %208 : vector<1x128xf32>
    %cst_144 = arith.constant 0.356674939 : f32
    %211 = vector.broadcast %cst_144 : f32 to vector<16x16xf32>
    %212 = arith.cmpf oge, %98, %211 : vector<16x16xf32>
    %213 = arith.extui %212 : vector<16x16xi1> to vector<16x16xi32>
    %214 = arith.sitofp %213 : vector<16x16xi32> to vector<16x16xf32>
    %215 = vector.shape_cast %214 : vector<16x16xf32> to vector<1x16x16xf32>
    %cst_145 = arith.constant dense<0.000000e+00> : vector<1xf32>
    %216 = vector.multi_reduction <add>, %215, %cst_145 [1, 2] : vector<1x16x16xf32> to vector<1xf32>
    %217 = vector.shape_cast %216 : vector<1xf32> to vector<1x1x1xf32>
    %218 = vector.extract %217[0, 0, 0] : f32 from vector<1x1x1xf32>
    %c0_i32_146 = arith.constant 0 : i32
    %219 = vector.broadcast %c0_i32_146 : i32 to vector<1x128xi32>
    %220 = arith.cmpi eq, %198, %219 : vector<1x128xi32>
    %221 = arith.extui %220 : vector<1x128xi1> to vector<1x128xi32>
    %222 = arith.sitofp %221 : vector<1x128xi32> to vector<1x128xf32>
    %223 = vector.broadcast %218 : f32 to vector<1x128xf32>
    %224 = arith.mulf %223, %222 : vector<1x128xf32>
    %225 = arith.addf %210, %224 : vector<1x128xf32>
    %cst_147 = arith.constant 2.950810e-01 : f32
    %226 = vector.broadcast %cst_147 : f32 to vector<16x16xf32>
    %227 = arith.cmpf oge, %98, %226 : vector<16x16xf32>
    %228 = arith.extui %227 : vector<16x16xi1> to vector<16x16xi32>
    %229 = arith.sitofp %228 : vector<16x16xi32> to vector<16x16xf32>
    %230 = vector.shape_cast %229 : vector<16x16xf32> to vector<1x16x16xf32>
    %cst_148 = arith.constant dense<0.000000e+00> : vector<1xf32>
    %231 = vector.multi_reduction <add>, %230, %cst_148 [1, 2] : vector<1x16x16xf32> to vector<1xf32>
    %232 = vector.shape_cast %231 : vector<1xf32> to vector<1x1x1xf32>
    %233 = vector.extract %232[0, 0, 0] : f32 from vector<1x1x1xf32>
    %c1_i32_149 = arith.constant 1 : i32
    %234 = vector.broadcast %c1_i32_149 : i32 to vector<1x128xi32>
    %235 = arith.cmpi eq, %198, %234 : vector<1x128xi32>
    %236 = arith.extui %235 : vector<1x128xi1> to vector<1x128xi32>
    %237 = arith.sitofp %236 : vector<1x128xi32> to vector<1x128xf32>
    %238 = vector.broadcast %233 : f32 to vector<1x128xf32>
    %239 = arith.mulf %238, %237 : vector<1x128xf32>
    %240 = arith.addf %225, %239 : vector<1x128xf32>
    %cst_150 = arith.constant 0.244123653 : f32
    %241 = vector.broadcast %cst_150 : f32 to vector<16x16xf32>
    %242 = arith.cmpf oge, %98, %241 : vector<16x16xf32>
    %243 = arith.extui %242 : vector<16x16xi1> to vector<16x16xi32>
    %244 = arith.sitofp %243 : vector<16x16xi32> to vector<16x16xf32>
    %245 = vector.shape_cast %244 : vector<16x16xf32> to vector<1x16x16xf32>
    %cst_151 = arith.constant dense<0.000000e+00> : vector<1xf32>
    %246 = vector.multi_reduction <add>, %245, %cst_151 [1, 2] : vector<1x16x16xf32> to vector<1xf32>
    %247 = vector.shape_cast %246 : vector<1xf32> to vector<1x1x1xf32>
    %248 = vector.extract %247[0, 0, 0] : f32 from vector<1x1x1xf32>
    %c2_i32_152 = arith.constant 2 : i32
    %249 = vector.broadcast %c2_i32_152 : i32 to vector<1x128xi32>
    %250 = arith.cmpi eq, %198, %249 : vector<1x128xi32>
    %251 = arith.extui %250 : vector<1x128xi1> to vector<1x128xi32>
    %252 = arith.sitofp %251 : vector<1x128xi32> to vector<1x128xf32>
    %253 = vector.broadcast %248 : f32 to vector<1x128xf32>
    %254 = arith.mulf %253, %252 : vector<1x128xf32>
    %255 = arith.addf %240, %254 : vector<1x128xf32>
    %cst_153 = arith.constant 0.201966107 : f32
    %256 = vector.broadcast %cst_153 : f32 to vector<16x16xf32>
    %257 = arith.cmpf oge, %98, %256 : vector<16x16xf32>
    %258 = arith.extui %257 : vector<16x16xi1> to vector<16x16xi32>
    %259 = arith.sitofp %258 : vector<16x16xi32> to vector<16x16xf32>
    %260 = vector.shape_cast %259 : vector<16x16xf32> to vector<1x16x16xf32>
    %cst_154 = arith.constant dense<0.000000e+00> : vector<1xf32>
    %261 = vector.multi_reduction <add>, %260, %cst_154 [1, 2] : vector<1x16x16xf32> to vector<1xf32>
    %262 = vector.shape_cast %261 : vector<1xf32> to vector<1x1x1xf32>
    %263 = vector.extract %262[0, 0, 0] : f32 from vector<1x1x1xf32>
    %c3_i32_155 = arith.constant 3 : i32
    %264 = vector.broadcast %c3_i32_155 : i32 to vector<1x128xi32>
    %265 = arith.cmpi eq, %198, %264 : vector<1x128xi32>
    %266 = arith.extui %265 : vector<1x128xi1> to vector<1x128xi32>
    %267 = arith.sitofp %266 : vector<1x128xi32> to vector<1x128xf32>
    %268 = vector.broadcast %263 : f32 to vector<1x128xf32>
    %269 = arith.mulf %268, %267 : vector<1x128xf32>
    %270 = arith.addf %255, %269 : vector<1x128xf32>
    %cst_156 = arith.constant 0.167088702 : f32
    %271 = vector.broadcast %cst_156 : f32 to vector<16x16xf32>
    %272 = arith.cmpf oge, %98, %271 : vector<16x16xf32>
    %273 = arith.extui %272 : vector<16x16xi1> to vector<16x16xi32>
    %274 = arith.sitofp %273 : vector<16x16xi32> to vector<16x16xf32>
    %275 = vector.shape_cast %274 : vector<16x16xf32> to vector<1x16x16xf32>
    %cst_157 = arith.constant dense<0.000000e+00> : vector<1xf32>
    %276 = vector.multi_reduction <add>, %275, %cst_157 [1, 2] : vector<1x16x16xf32> to vector<1xf32>
    %277 = vector.shape_cast %276 : vector<1xf32> to vector<1x1x1xf32>
    %278 = vector.extract %277[0, 0, 0] : f32 from vector<1x1x1xf32>
    %c4_i32_158 = arith.constant 4 : i32
    %279 = vector.broadcast %c4_i32_158 : i32 to vector<1x128xi32>
    %280 = arith.cmpi eq, %198, %279 : vector<1x128xi32>
    %281 = arith.extui %280 : vector<1x128xi1> to vector<1x128xi32>
    %282 = arith.sitofp %281 : vector<1x128xi32> to vector<1x128xf32>
    %283 = vector.broadcast %278 : f32 to vector<1x128xf32>
    %284 = arith.mulf %283, %282 : vector<1x128xf32>
    %285 = arith.addf %270, %284 : vector<1x128xf32>
    %cst_159 = arith.constant 0.138234273 : f32
    %286 = vector.broadcast %cst_159 : f32 to vector<16x16xf32>
    %287 = arith.cmpf oge, %98, %286 : vector<16x16xf32>
    %288 = arith.extui %287 : vector<16x16xi1> to vector<16x16xi32>
    %289 = arith.sitofp %288 : vector<16x16xi32> to vector<16x16xf32>
    %290 = vector.shape_cast %289 : vector<16x16xf32> to vector<1x16x16xf32>
    %cst_160 = arith.constant dense<0.000000e+00> : vector<1xf32>
    %291 = vector.multi_reduction <add>, %290, %cst_160 [1, 2] : vector<1x16x16xf32> to vector<1xf32>
    %292 = vector.shape_cast %291 : vector<1xf32> to vector<1x1x1xf32>
    %293 = vector.extract %292[0, 0, 0] : f32 from vector<1x1x1xf32>
    %c5_i32_161 = arith.constant 5 : i32
    %294 = vector.broadcast %c5_i32_161 : i32 to vector<1x128xi32>
    %295 = arith.cmpi eq, %198, %294 : vector<1x128xi32>
    %296 = arith.extui %295 : vector<1x128xi1> to vector<1x128xi32>
    %297 = arith.sitofp %296 : vector<1x128xi32> to vector<1x128xf32>
    %298 = vector.broadcast %293 : f32 to vector<1x128xf32>
    %299 = arith.mulf %298, %297 : vector<1x128xf32>
    %300 = arith.addf %285, %299 : vector<1x128xf32>
    %cst_162 = arith.constant 0.114362687 : f32
    %301 = vector.broadcast %cst_162 : f32 to vector<16x16xf32>
    %302 = arith.cmpf oge, %98, %301 : vector<16x16xf32>
    %303 = arith.extui %302 : vector<16x16xi1> to vector<16x16xi32>
    %304 = arith.sitofp %303 : vector<16x16xi32> to vector<16x16xf32>
    %305 = vector.shape_cast %304 : vector<16x16xf32> to vector<1x16x16xf32>
    %cst_163 = arith.constant dense<0.000000e+00> : vector<1xf32>
    %306 = vector.multi_reduction <add>, %305, %cst_163 [1, 2] : vector<1x16x16xf32> to vector<1xf32>
    %307 = vector.shape_cast %306 : vector<1xf32> to vector<1x1x1xf32>
    %308 = vector.extract %307[0, 0, 0] : f32 from vector<1x1x1xf32>
    %c6_i32_164 = arith.constant 6 : i32
    %309 = vector.broadcast %c6_i32_164 : i32 to vector<1x128xi32>
    %310 = arith.cmpi eq, %198, %309 : vector<1x128xi32>
    %311 = arith.extui %310 : vector<1x128xi1> to vector<1x128xi32>
    %312 = arith.sitofp %311 : vector<1x128xi32> to vector<1x128xf32>
    %313 = vector.broadcast %308 : f32 to vector<1x128xf32>
    %314 = arith.mulf %313, %312 : vector<1x128xf32>
    %315 = arith.addf %300, %314 : vector<1x128xf32>
    %cst_165 = arith.constant 0.0946134701 : f32
    %316 = vector.broadcast %cst_165 : f32 to vector<16x16xf32>
    %317 = arith.cmpf oge, %98, %316 : vector<16x16xf32>
    %318 = arith.extui %317 : vector<16x16xi1> to vector<16x16xi32>
    %319 = arith.sitofp %318 : vector<16x16xi32> to vector<16x16xf32>
    %320 = vector.shape_cast %319 : vector<16x16xf32> to vector<1x16x16xf32>
    %cst_166 = arith.constant dense<0.000000e+00> : vector<1xf32>
    %321 = vector.multi_reduction <add>, %320, %cst_166 [1, 2] : vector<1x16x16xf32> to vector<1xf32>
    %322 = vector.shape_cast %321 : vector<1xf32> to vector<1x1x1xf32>
    %323 = vector.extract %322[0, 0, 0] : f32 from vector<1x1x1xf32>
    %c7_i32_167 = arith.constant 7 : i32
    %324 = vector.broadcast %c7_i32_167 : i32 to vector<1x128xi32>
    %325 = arith.cmpi eq, %198, %324 : vector<1x128xi32>
    %326 = arith.extui %325 : vector<1x128xi1> to vector<1x128xi32>
    %327 = arith.sitofp %326 : vector<1x128xi32> to vector<1x128xf32>
    %328 = vector.broadcast %323 : f32 to vector<1x128xf32>
    %329 = arith.mulf %328, %327 : vector<1x128xf32>
    %330 = arith.addf %315, %329 : vector<1x128xf32>
    %cst_168 = arith.constant 0.0782747343 : f32
    %331 = vector.broadcast %cst_168 : f32 to vector<16x16xf32>
    %332 = arith.cmpf oge, %98, %331 : vector<16x16xf32>
    %333 = arith.extui %332 : vector<16x16xi1> to vector<16x16xi32>
    %334 = arith.sitofp %333 : vector<16x16xi32> to vector<16x16xf32>
    %335 = vector.shape_cast %334 : vector<16x16xf32> to vector<1x16x16xf32>
    %cst_169 = arith.constant dense<0.000000e+00> : vector<1xf32>
    %336 = vector.multi_reduction <add>, %335, %cst_169 [1, 2] : vector<1x16x16xf32> to vector<1xf32>
    %337 = vector.shape_cast %336 : vector<1xf32> to vector<1x1x1xf32>
    %338 = vector.extract %337[0, 0, 0] : f32 from vector<1x1x1xf32>
    %c8_i32 = arith.constant 8 : i32
    %339 = vector.broadcast %c8_i32 : i32 to vector<1x128xi32>
    %340 = arith.cmpi eq, %198, %339 : vector<1x128xi32>
    %341 = arith.extui %340 : vector<1x128xi1> to vector<1x128xi32>
    %342 = arith.sitofp %341 : vector<1x128xi32> to vector<1x128xf32>
    %343 = vector.broadcast %338 : f32 to vector<1x128xf32>
    %344 = arith.mulf %343, %342 : vector<1x128xf32>
    %345 = arith.addf %330, %344 : vector<1x128xf32>
    %cst_170 = arith.constant 0.0647575259 : f32
    %346 = vector.broadcast %cst_170 : f32 to vector<16x16xf32>
    %347 = arith.cmpf oge, %98, %346 : vector<16x16xf32>
    %348 = arith.extui %347 : vector<16x16xi1> to vector<16x16xi32>
    %349 = arith.sitofp %348 : vector<16x16xi32> to vector<16x16xf32>
    %350 = vector.shape_cast %349 : vector<16x16xf32> to vector<1x16x16xf32>
    %cst_171 = arith.constant dense<0.000000e+00> : vector<1xf32>
    %351 = vector.multi_reduction <add>, %350, %cst_171 [1, 2] : vector<1x16x16xf32> to vector<1xf32>
    %352 = vector.shape_cast %351 : vector<1xf32> to vector<1x1x1xf32>
    %353 = vector.extract %352[0, 0, 0] : f32 from vector<1x1x1xf32>
    %c9_i32 = arith.constant 9 : i32
    %354 = vector.broadcast %c9_i32 : i32 to vector<1x128xi32>
    %355 = arith.cmpi eq, %198, %354 : vector<1x128xi32>
    %356 = arith.extui %355 : vector<1x128xi1> to vector<1x128xi32>
    %357 = arith.sitofp %356 : vector<1x128xi32> to vector<1x128xf32>
    %358 = vector.broadcast %353 : f32 to vector<1x128xf32>
    %359 = arith.mulf %358, %357 : vector<1x128xf32>
    %360 = arith.addf %345, %359 : vector<1x128xf32>
    %cst_172 = arith.constant 0.0535745919 : f32
    %361 = vector.broadcast %cst_172 : f32 to vector<16x16xf32>
    %362 = arith.cmpf oge, %98, %361 : vector<16x16xf32>
    %363 = arith.extui %362 : vector<16x16xi1> to vector<16x16xi32>
    %364 = arith.sitofp %363 : vector<16x16xi32> to vector<16x16xf32>
    %365 = vector.shape_cast %364 : vector<16x16xf32> to vector<1x16x16xf32>
    %cst_173 = arith.constant dense<0.000000e+00> : vector<1xf32>
    %366 = vector.multi_reduction <add>, %365, %cst_173 [1, 2] : vector<1x16x16xf32> to vector<1xf32>
    %367 = vector.shape_cast %366 : vector<1xf32> to vector<1x1x1xf32>
    %368 = vector.extract %367[0, 0, 0] : f32 from vector<1x1x1xf32>
    %c10_i32 = arith.constant 10 : i32
    %369 = vector.broadcast %c10_i32 : i32 to vector<1x128xi32>
    %370 = arith.cmpi eq, %198, %369 : vector<1x128xi32>
    %371 = arith.extui %370 : vector<1x128xi1> to vector<1x128xi32>
    %372 = arith.sitofp %371 : vector<1x128xi32> to vector<1x128xf32>
    %373 = vector.broadcast %368 : f32 to vector<1x128xf32>
    %374 = arith.mulf %373, %372 : vector<1x128xf32>
    %375 = arith.addf %360, %374 : vector<1x128xf32>
    %cst_174 = arith.constant 0.0443228297 : f32
    %376 = vector.broadcast %cst_174 : f32 to vector<16x16xf32>
    %377 = arith.cmpf oge, %98, %376 : vector<16x16xf32>
    %378 = arith.extui %377 : vector<16x16xi1> to vector<16x16xi32>
    %379 = arith.sitofp %378 : vector<16x16xi32> to vector<16x16xf32>
    %380 = vector.shape_cast %379 : vector<16x16xf32> to vector<1x16x16xf32>
    %cst_175 = arith.constant dense<0.000000e+00> : vector<1xf32>
    %381 = vector.multi_reduction <add>, %380, %cst_175 [1, 2] : vector<1x16x16xf32> to vector<1xf32>
    %382 = vector.shape_cast %381 : vector<1xf32> to vector<1x1x1xf32>
    %383 = vector.extract %382[0, 0, 0] : f32 from vector<1x1x1xf32>
    %c11_i32 = arith.constant 11 : i32
    %384 = vector.broadcast %c11_i32 : i32 to vector<1x128xi32>
    %385 = arith.cmpi eq, %198, %384 : vector<1x128xi32>
    %386 = arith.extui %385 : vector<1x128xi1> to vector<1x128xi32>
    %387 = arith.sitofp %386 : vector<1x128xi32> to vector<1x128xf32>
    %388 = vector.broadcast %383 : f32 to vector<1x128xf32>
    %389 = arith.mulf %388, %387 : vector<1x128xf32>
    %390 = arith.addf %375, %389 : vector<1x128xf32>
    %cst_176 = arith.constant 0.0366687514 : f32
    %391 = vector.broadcast %cst_176 : f32 to vector<16x16xf32>
    %392 = arith.cmpf oge, %98, %391 : vector<16x16xf32>
    %393 = arith.extui %392 : vector<16x16xi1> to vector<16x16xi32>
    %394 = arith.sitofp %393 : vector<16x16xi32> to vector<16x16xf32>
    %395 = vector.shape_cast %394 : vector<16x16xf32> to vector<1x16x16xf32>
    %cst_177 = arith.constant dense<0.000000e+00> : vector<1xf32>
    %396 = vector.multi_reduction <add>, %395, %cst_177 [1, 2] : vector<1x16x16xf32> to vector<1xf32>
    %397 = vector.shape_cast %396 : vector<1xf32> to vector<1x1x1xf32>
    %398 = vector.extract %397[0, 0, 0] : f32 from vector<1x1x1xf32>
    %c12_i32 = arith.constant 12 : i32
    %399 = vector.broadcast %c12_i32 : i32 to vector<1x128xi32>
    %400 = arith.cmpi eq, %198, %399 : vector<1x128xi32>
    %401 = arith.extui %400 : vector<1x128xi1> to vector<1x128xi32>
    %402 = arith.sitofp %401 : vector<1x128xi32> to vector<1x128xf32>
    %403 = vector.broadcast %398 : f32 to vector<1x128xf32>
    %404 = arith.mulf %403, %402 : vector<1x128xf32>
    %405 = arith.addf %390, %404 : vector<1x128xf32>
    %cst_178 = arith.constant 0.0303364489 : f32
    %406 = vector.broadcast %cst_178 : f32 to vector<16x16xf32>
    %407 = arith.cmpf oge, %98, %406 : vector<16x16xf32>
    %408 = arith.extui %407 : vector<16x16xi1> to vector<16x16xi32>
    %409 = arith.sitofp %408 : vector<16x16xi32> to vector<16x16xf32>
    %410 = vector.shape_cast %409 : vector<16x16xf32> to vector<1x16x16xf32>
    %cst_179 = arith.constant dense<0.000000e+00> : vector<1xf32>
    %411 = vector.multi_reduction <add>, %410, %cst_179 [1, 2] : vector<1x16x16xf32> to vector<1xf32>
    %412 = vector.shape_cast %411 : vector<1xf32> to vector<1x1x1xf32>
    %413 = vector.extract %412[0, 0, 0] : f32 from vector<1x1x1xf32>
    %c13_i32 = arith.constant 13 : i32
    %414 = vector.broadcast %c13_i32 : i32 to vector<1x128xi32>
    %415 = arith.cmpi eq, %198, %414 : vector<1x128xi32>
    %416 = arith.extui %415 : vector<1x128xi1> to vector<1x128xi32>
    %417 = arith.sitofp %416 : vector<1x128xi32> to vector<1x128xf32>
    %418 = vector.broadcast %413 : f32 to vector<1x128xf32>
    %419 = arith.mulf %418, %417 : vector<1x128xf32>
    %420 = arith.addf %405, %419 : vector<1x128xf32>
    %cst_180 = arith.constant 0.0250976682 : f32
    %421 = vector.broadcast %cst_180 : f32 to vector<16x16xf32>
    %422 = arith.cmpf oge, %98, %421 : vector<16x16xf32>
    %423 = arith.extui %422 : vector<16x16xi1> to vector<16x16xi32>
    %424 = arith.sitofp %423 : vector<16x16xi32> to vector<16x16xf32>
    %425 = vector.shape_cast %424 : vector<16x16xf32> to vector<1x16x16xf32>
    %cst_181 = arith.constant dense<0.000000e+00> : vector<1xf32>
    %426 = vector.multi_reduction <add>, %425, %cst_181 [1, 2] : vector<1x16x16xf32> to vector<1xf32>
    %427 = vector.shape_cast %426 : vector<1xf32> to vector<1x1x1xf32>
    %428 = vector.extract %427[0, 0, 0] : f32 from vector<1x1x1xf32>
    %c14_i32 = arith.constant 14 : i32
    %429 = vector.broadcast %c14_i32 : i32 to vector<1x128xi32>
    %430 = arith.cmpi eq, %198, %429 : vector<1x128xi32>
    %431 = arith.extui %430 : vector<1x128xi1> to vector<1x128xi32>
    %432 = arith.sitofp %431 : vector<1x128xi32> to vector<1x128xf32>
    %433 = vector.broadcast %428 : f32 to vector<1x128xf32>
    %434 = arith.mulf %433, %432 : vector<1x128xf32>
    %435 = arith.addf %420, %434 : vector<1x128xf32>
    %cst_182 = arith.constant 0.0207635686 : f32
    %436 = vector.broadcast %cst_182 : f32 to vector<16x16xf32>
    %437 = arith.cmpf oge, %98, %436 : vector<16x16xf32>
    %438 = arith.extui %437 : vector<16x16xi1> to vector<16x16xi32>
    %439 = arith.sitofp %438 : vector<16x16xi32> to vector<16x16xf32>
    %440 = vector.shape_cast %439 : vector<16x16xf32> to vector<1x16x16xf32>
    %cst_183 = arith.constant dense<0.000000e+00> : vector<1xf32>
    %441 = vector.multi_reduction <add>, %440, %cst_183 [1, 2] : vector<1x16x16xf32> to vector<1xf32>
    %442 = vector.shape_cast %441 : vector<1xf32> to vector<1x1x1xf32>
    %443 = vector.extract %442[0, 0, 0] : f32 from vector<1x1x1xf32>
    %c15_i32 = arith.constant 15 : i32
    %444 = vector.broadcast %c15_i32 : i32 to vector<1x128xi32>
    %445 = arith.cmpi eq, %198, %444 : vector<1x128xi32>
    %446 = arith.extui %445 : vector<1x128xi1> to vector<1x128xi32>
    %447 = arith.sitofp %446 : vector<1x128xi32> to vector<1x128xf32>
    %448 = vector.broadcast %443 : f32 to vector<1x128xf32>
    %449 = arith.mulf %448, %447 : vector<1x128xf32>
    %450 = arith.addf %435, %449 : vector<1x128xf32>
    %cst_184 = arith.constant 0.0171779208 : f32
    %451 = vector.broadcast %cst_184 : f32 to vector<16x16xf32>
    %452 = arith.cmpf oge, %98, %451 : vector<16x16xf32>
    %453 = arith.extui %452 : vector<16x16xi1> to vector<16x16xi32>
    %454 = arith.sitofp %453 : vector<16x16xi32> to vector<16x16xf32>
    %455 = vector.shape_cast %454 : vector<16x16xf32> to vector<1x16x16xf32>
    %cst_185 = arith.constant dense<0.000000e+00> : vector<1xf32>
    %456 = vector.multi_reduction <add>, %455, %cst_185 [1, 2] : vector<1x16x16xf32> to vector<1xf32>
    %457 = vector.shape_cast %456 : vector<1xf32> to vector<1x1x1xf32>
    %458 = vector.extract %457[0, 0, 0] : f32 from vector<1x1x1xf32>
    %c16_i32 = arith.constant 16 : i32
    %459 = vector.broadcast %c16_i32 : i32 to vector<1x128xi32>
    %460 = arith.cmpi eq, %198, %459 : vector<1x128xi32>
    %461 = arith.extui %460 : vector<1x128xi1> to vector<1x128xi32>
    %462 = arith.sitofp %461 : vector<1x128xi32> to vector<1x128xf32>
    %463 = vector.broadcast %458 : f32 to vector<1x128xf32>
    %464 = arith.mulf %463, %462 : vector<1x128xf32>
    %465 = arith.addf %450, %464 : vector<1x128xf32>
    %cst_186 = arith.constant 0.0142114777 : f32
    %466 = vector.broadcast %cst_186 : f32 to vector<16x16xf32>
    %467 = arith.cmpf oge, %98, %466 : vector<16x16xf32>
    %468 = arith.extui %467 : vector<16x16xi1> to vector<16x16xi32>
    %469 = arith.sitofp %468 : vector<16x16xi32> to vector<16x16xf32>
    %470 = vector.shape_cast %469 : vector<16x16xf32> to vector<1x16x16xf32>
    %cst_187 = arith.constant dense<0.000000e+00> : vector<1xf32>
    %471 = vector.multi_reduction <add>, %470, %cst_187 [1, 2] : vector<1x16x16xf32> to vector<1xf32>
    %472 = vector.shape_cast %471 : vector<1xf32> to vector<1x1x1xf32>
    %473 = vector.extract %472[0, 0, 0] : f32 from vector<1x1x1xf32>
    %c17_i32 = arith.constant 17 : i32
    %474 = vector.broadcast %c17_i32 : i32 to vector<1x128xi32>
    %475 = arith.cmpi eq, %198, %474 : vector<1x128xi32>
    %476 = arith.extui %475 : vector<1x128xi1> to vector<1x128xi32>
    %477 = arith.sitofp %476 : vector<1x128xi32> to vector<1x128xf32>
    %478 = vector.broadcast %473 : f32 to vector<1x128xf32>
    %479 = arith.mulf %478, %477 : vector<1x128xf32>
    %480 = arith.addf %465, %479 : vector<1x128xf32>
    %cst_188 = arith.constant 0.0117573068 : f32
    %481 = vector.broadcast %cst_188 : f32 to vector<16x16xf32>
    %482 = arith.cmpf oge, %98, %481 : vector<16x16xf32>
    %483 = arith.extui %482 : vector<16x16xi1> to vector<16x16xi32>
    %484 = arith.sitofp %483 : vector<16x16xi32> to vector<16x16xf32>
    %485 = vector.shape_cast %484 : vector<16x16xf32> to vector<1x16x16xf32>
    %cst_189 = arith.constant dense<0.000000e+00> : vector<1xf32>
    %486 = vector.multi_reduction <add>, %485, %cst_189 [1, 2] : vector<1x16x16xf32> to vector<1xf32>
    %487 = vector.shape_cast %486 : vector<1xf32> to vector<1x1x1xf32>
    %488 = vector.extract %487[0, 0, 0] : f32 from vector<1x1x1xf32>
    %c18_i32 = arith.constant 18 : i32
    %489 = vector.broadcast %c18_i32 : i32 to vector<1x128xi32>
    %490 = arith.cmpi eq, %198, %489 : vector<1x128xi32>
    %491 = arith.extui %490 : vector<1x128xi1> to vector<1x128xi32>
    %492 = arith.sitofp %491 : vector<1x128xi32> to vector<1x128xf32>
    %493 = vector.broadcast %488 : f32 to vector<1x128xf32>
    %494 = arith.mulf %493, %492 : vector<1x128xf32>
    %495 = arith.addf %480, %494 : vector<1x128xf32>
    %cst_190 = arith.constant 0.00972694531 : f32
    %496 = vector.broadcast %cst_190 : f32 to vector<16x16xf32>
    %497 = arith.cmpf oge, %98, %496 : vector<16x16xf32>
    %498 = arith.extui %497 : vector<16x16xi1> to vector<16x16xi32>
    %499 = arith.sitofp %498 : vector<16x16xi32> to vector<16x16xf32>
    %500 = vector.shape_cast %499 : vector<16x16xf32> to vector<1x16x16xf32>
    %cst_191 = arith.constant dense<0.000000e+00> : vector<1xf32>
    %501 = vector.multi_reduction <add>, %500, %cst_191 [1, 2] : vector<1x16x16xf32> to vector<1xf32>
    %502 = vector.shape_cast %501 : vector<1xf32> to vector<1x1x1xf32>
    %503 = vector.extract %502[0, 0, 0] : f32 from vector<1x1x1xf32>
    %c19_i32 = arith.constant 19 : i32
    %504 = vector.broadcast %c19_i32 : i32 to vector<1x128xi32>
    %505 = arith.cmpi eq, %198, %504 : vector<1x128xi32>
    %506 = arith.extui %505 : vector<1x128xi1> to vector<1x128xi32>
    %507 = arith.sitofp %506 : vector<1x128xi32> to vector<1x128xf32>
    %508 = vector.broadcast %503 : f32 to vector<1x128xf32>
    %509 = arith.mulf %508, %507 : vector<1x128xf32>
    %510 = arith.addf %495, %509 : vector<1x128xf32>
    %cst_192 = arith.constant 0.00804720632 : f32
    %511 = vector.broadcast %cst_192 : f32 to vector<16x16xf32>
    %512 = arith.cmpf oge, %98, %511 : vector<16x16xf32>
    %513 = arith.extui %512 : vector<16x16xi1> to vector<16x16xi32>
    %514 = arith.sitofp %513 : vector<16x16xi32> to vector<16x16xf32>
    %515 = vector.shape_cast %514 : vector<16x16xf32> to vector<1x16x16xf32>
    %cst_193 = arith.constant dense<0.000000e+00> : vector<1xf32>
    %516 = vector.multi_reduction <add>, %515, %cst_193 [1, 2] : vector<1x16x16xf32> to vector<1xf32>
    %517 = vector.shape_cast %516 : vector<1xf32> to vector<1x1x1xf32>
    %518 = vector.extract %517[0, 0, 0] : f32 from vector<1x1x1xf32>
    %c20_i32 = arith.constant 20 : i32
    %519 = vector.broadcast %c20_i32 : i32 to vector<1x128xi32>
    %520 = arith.cmpi eq, %198, %519 : vector<1x128xi32>
    %521 = arith.extui %520 : vector<1x128xi1> to vector<1x128xi32>
    %522 = arith.sitofp %521 : vector<1x128xi32> to vector<1x128xf32>
    %523 = vector.broadcast %518 : f32 to vector<1x128xf32>
    %524 = arith.mulf %523, %522 : vector<1x128xf32>
    %525 = arith.addf %510, %524 : vector<1x128xf32>
    %cst_194 = arith.constant 0.0066575394 : f32
    %526 = vector.broadcast %cst_194 : f32 to vector<16x16xf32>
    %527 = arith.cmpf oge, %98, %526 : vector<16x16xf32>
    %528 = arith.extui %527 : vector<16x16xi1> to vector<16x16xi32>
    %529 = arith.sitofp %528 : vector<16x16xi32> to vector<16x16xf32>
    %530 = vector.shape_cast %529 : vector<16x16xf32> to vector<1x16x16xf32>
    %cst_195 = arith.constant dense<0.000000e+00> : vector<1xf32>
    %531 = vector.multi_reduction <add>, %530, %cst_195 [1, 2] : vector<1x16x16xf32> to vector<1xf32>
    %532 = vector.shape_cast %531 : vector<1xf32> to vector<1x1x1xf32>
    %533 = vector.extract %532[0, 0, 0] : f32 from vector<1x1x1xf32>
    %c21_i32 = arith.constant 21 : i32
    %534 = vector.broadcast %c21_i32 : i32 to vector<1x128xi32>
    %535 = arith.cmpi eq, %198, %534 : vector<1x128xi32>
    %536 = arith.extui %535 : vector<1x128xi1> to vector<1x128xi32>
    %537 = arith.sitofp %536 : vector<1x128xi32> to vector<1x128xf32>
    %538 = vector.broadcast %533 : f32 to vector<1x128xf32>
    %539 = arith.mulf %538, %537 : vector<1x128xf32>
    %540 = arith.addf %525, %539 : vector<1x128xf32>
    %cst_196 = arith.constant 0.00550785335 : f32
    %541 = vector.broadcast %cst_196 : f32 to vector<16x16xf32>
    %542 = arith.cmpf oge, %98, %541 : vector<16x16xf32>
    %543 = arith.extui %542 : vector<16x16xi1> to vector<16x16xi32>
    %544 = arith.sitofp %543 : vector<16x16xi32> to vector<16x16xf32>
    %545 = vector.shape_cast %544 : vector<16x16xf32> to vector<1x16x16xf32>
    %cst_197 = arith.constant dense<0.000000e+00> : vector<1xf32>
    %546 = vector.multi_reduction <add>, %545, %cst_197 [1, 2] : vector<1x16x16xf32> to vector<1xf32>
    %547 = vector.shape_cast %546 : vector<1xf32> to vector<1x1x1xf32>
    %548 = vector.extract %547[0, 0, 0] : f32 from vector<1x1x1xf32>
    %c22_i32 = arith.constant 22 : i32
    %549 = vector.broadcast %c22_i32 : i32 to vector<1x128xi32>
    %550 = arith.cmpi eq, %198, %549 : vector<1x128xi32>
    %551 = arith.extui %550 : vector<1x128xi1> to vector<1x128xi32>
    %552 = arith.sitofp %551 : vector<1x128xi32> to vector<1x128xf32>
    %553 = vector.broadcast %548 : f32 to vector<1x128xf32>
    %554 = arith.mulf %553, %552 : vector<1x128xf32>
    %555 = arith.addf %540, %554 : vector<1x128xf32>
    %cst_198 = arith.constant 0.00455670571 : f32
    %556 = vector.broadcast %cst_198 : f32 to vector<16x16xf32>
    %557 = arith.cmpf oge, %98, %556 : vector<16x16xf32>
    %558 = arith.extui %557 : vector<16x16xi1> to vector<16x16xi32>
    %559 = arith.sitofp %558 : vector<16x16xi32> to vector<16x16xf32>
    %560 = vector.shape_cast %559 : vector<16x16xf32> to vector<1x16x16xf32>
    %cst_199 = arith.constant dense<0.000000e+00> : vector<1xf32>
    %561 = vector.multi_reduction <add>, %560, %cst_199 [1, 2] : vector<1x16x16xf32> to vector<1xf32>
    %562 = vector.shape_cast %561 : vector<1xf32> to vector<1x1x1xf32>
    %563 = vector.extract %562[0, 0, 0] : f32 from vector<1x1x1xf32>
    %c23_i32 = arith.constant 23 : i32
    %564 = vector.broadcast %c23_i32 : i32 to vector<1x128xi32>
    %565 = arith.cmpi eq, %198, %564 : vector<1x128xi32>
    %566 = arith.extui %565 : vector<1x128xi1> to vector<1x128xi32>
    %567 = arith.sitofp %566 : vector<1x128xi32> to vector<1x128xf32>
    %568 = vector.broadcast %563 : f32 to vector<1x128xf32>
    %569 = arith.mulf %568, %567 : vector<1x128xf32>
    %570 = arith.addf %555, %569 : vector<1x128xf32>
    %cst_200 = arith.constant 0.00376981148 : f32
    %571 = vector.broadcast %cst_200 : f32 to vector<16x16xf32>
    %572 = arith.cmpf oge, %98, %571 : vector<16x16xf32>
    %573 = arith.extui %572 : vector<16x16xi1> to vector<16x16xi32>
    %574 = arith.sitofp %573 : vector<16x16xi32> to vector<16x16xf32>
    %575 = vector.shape_cast %574 : vector<16x16xf32> to vector<1x16x16xf32>
    %cst_201 = arith.constant dense<0.000000e+00> : vector<1xf32>
    %576 = vector.multi_reduction <add>, %575, %cst_201 [1, 2] : vector<1x16x16xf32> to vector<1xf32>
    %577 = vector.shape_cast %576 : vector<1xf32> to vector<1x1x1xf32>
    %578 = vector.extract %577[0, 0, 0] : f32 from vector<1x1x1xf32>
    %c24_i32 = arith.constant 24 : i32
    %579 = vector.broadcast %c24_i32 : i32 to vector<1x128xi32>
    %580 = arith.cmpi eq, %198, %579 : vector<1x128xi32>
    %581 = arith.extui %580 : vector<1x128xi1> to vector<1x128xi32>
    %582 = arith.sitofp %581 : vector<1x128xi32> to vector<1x128xf32>
    %583 = vector.broadcast %578 : f32 to vector<1x128xf32>
    %584 = arith.mulf %583, %582 : vector<1x128xf32>
    %585 = arith.addf %570, %584 : vector<1x128xf32>
    %cst_202 = arith.constant 0.00311880512 : f32
    %586 = vector.broadcast %cst_202 : f32 to vector<16x16xf32>
    %587 = arith.cmpf oge, %98, %586 : vector<16x16xf32>
    %588 = arith.extui %587 : vector<16x16xi1> to vector<16x16xi32>
    %589 = arith.sitofp %588 : vector<16x16xi32> to vector<16x16xf32>
    %590 = vector.shape_cast %589 : vector<16x16xf32> to vector<1x16x16xf32>
    %cst_203 = arith.constant dense<0.000000e+00> : vector<1xf32>
    %591 = vector.multi_reduction <add>, %590, %cst_203 [1, 2] : vector<1x16x16xf32> to vector<1xf32>
    %592 = vector.shape_cast %591 : vector<1xf32> to vector<1x1x1xf32>
    %593 = vector.extract %592[0, 0, 0] : f32 from vector<1x1x1xf32>
    %c25_i32 = arith.constant 25 : i32
    %594 = vector.broadcast %c25_i32 : i32 to vector<1x128xi32>
    %595 = arith.cmpi eq, %198, %594 : vector<1x128xi32>
    %596 = arith.extui %595 : vector<1x128xi1> to vector<1x128xi32>
    %597 = arith.sitofp %596 : vector<1x128xi32> to vector<1x128xf32>
    %598 = vector.broadcast %593 : f32 to vector<1x128xf32>
    %599 = arith.mulf %598, %597 : vector<1x128xf32>
    %600 = arith.addf %585, %599 : vector<1x128xf32>
    %cst_204 = arith.constant 0.00258022081 : f32
    %601 = vector.broadcast %cst_204 : f32 to vector<16x16xf32>
    %602 = arith.cmpf oge, %98, %601 : vector<16x16xf32>
    %603 = arith.extui %602 : vector<16x16xi1> to vector<16x16xi32>
    %604 = arith.sitofp %603 : vector<16x16xi32> to vector<16x16xf32>
    %605 = vector.shape_cast %604 : vector<16x16xf32> to vector<1x16x16xf32>
    %cst_205 = arith.constant dense<0.000000e+00> : vector<1xf32>
    %606 = vector.multi_reduction <add>, %605, %cst_205 [1, 2] : vector<1x16x16xf32> to vector<1xf32>
    %607 = vector.shape_cast %606 : vector<1xf32> to vector<1x1x1xf32>
    %608 = vector.extract %607[0, 0, 0] : f32 from vector<1x1x1xf32>
    %c26_i32 = arith.constant 26 : i32
    %609 = vector.broadcast %c26_i32 : i32 to vector<1x128xi32>
    %610 = arith.cmpi eq, %198, %609 : vector<1x128xi32>
    %611 = arith.extui %610 : vector<1x128xi1> to vector<1x128xi32>
    %612 = arith.sitofp %611 : vector<1x128xi32> to vector<1x128xf32>
    %613 = vector.broadcast %608 : f32 to vector<1x128xf32>
    %614 = arith.mulf %613, %612 : vector<1x128xf32>
    %615 = arith.addf %600, %614 : vector<1x128xf32>
    %cst_206 = arith.constant 0.00213464419 : f32
    %616 = vector.broadcast %cst_206 : f32 to vector<16x16xf32>
    %617 = arith.cmpf oge, %98, %616 : vector<16x16xf32>
    %618 = arith.extui %617 : vector<16x16xi1> to vector<16x16xi32>
    %619 = arith.sitofp %618 : vector<16x16xi32> to vector<16x16xf32>
    %620 = vector.shape_cast %619 : vector<16x16xf32> to vector<1x16x16xf32>
    %cst_207 = arith.constant dense<0.000000e+00> : vector<1xf32>
    %621 = vector.multi_reduction <add>, %620, %cst_207 [1, 2] : vector<1x16x16xf32> to vector<1xf32>
    %622 = vector.shape_cast %621 : vector<1xf32> to vector<1x1x1xf32>
    %623 = vector.extract %622[0, 0, 0] : f32 from vector<1x1x1xf32>
    %c27_i32 = arith.constant 27 : i32
    %624 = vector.broadcast %c27_i32 : i32 to vector<1x128xi32>
    %625 = arith.cmpi eq, %198, %624 : vector<1x128xi32>
    %626 = arith.extui %625 : vector<1x128xi1> to vector<1x128xi32>
    %627 = arith.sitofp %626 : vector<1x128xi32> to vector<1x128xf32>
    %628 = vector.broadcast %623 : f32 to vector<1x128xf32>
    %629 = arith.mulf %628, %627 : vector<1x128xf32>
    %630 = arith.addf %615, %629 : vector<1x128xf32>
    %cst_208 = arith.constant 0.00176601391 : f32
    %631 = vector.broadcast %cst_208 : f32 to vector<16x16xf32>
    %632 = arith.cmpf oge, %98, %631 : vector<16x16xf32>
    %633 = arith.extui %632 : vector<16x16xi1> to vector<16x16xi32>
    %634 = arith.sitofp %633 : vector<16x16xi32> to vector<16x16xf32>
    %635 = vector.shape_cast %634 : vector<16x16xf32> to vector<1x16x16xf32>
    %cst_209 = arith.constant dense<0.000000e+00> : vector<1xf32>
    %636 = vector.multi_reduction <add>, %635, %cst_209 [1, 2] : vector<1x16x16xf32> to vector<1xf32>
    %637 = vector.shape_cast %636 : vector<1xf32> to vector<1x1x1xf32>
    %638 = vector.extract %637[0, 0, 0] : f32 from vector<1x1x1xf32>
    %c28_i32 = arith.constant 28 : i32
    %639 = vector.broadcast %c28_i32 : i32 to vector<1x128xi32>
    %640 = arith.cmpi eq, %198, %639 : vector<1x128xi32>
    %641 = arith.extui %640 : vector<1x128xi1> to vector<1x128xi32>
    %642 = arith.sitofp %641 : vector<1x128xi32> to vector<1x128xf32>
    %643 = vector.broadcast %638 : f32 to vector<1x128xf32>
    %644 = arith.mulf %643, %642 : vector<1x128xf32>
    %645 = arith.addf %630, %644 : vector<1x128xf32>
    %cst_210 = arith.constant 0.00146104221 : f32
    %646 = vector.broadcast %cst_210 : f32 to vector<16x16xf32>
    %647 = arith.cmpf oge, %98, %646 : vector<16x16xf32>
    %648 = arith.extui %647 : vector<16x16xi1> to vector<16x16xi32>
    %649 = arith.sitofp %648 : vector<16x16xi32> to vector<16x16xf32>
    %650 = vector.shape_cast %649 : vector<16x16xf32> to vector<1x16x16xf32>
    %cst_211 = arith.constant dense<0.000000e+00> : vector<1xf32>
    %651 = vector.multi_reduction <add>, %650, %cst_211 [1, 2] : vector<1x16x16xf32> to vector<1xf32>
    %652 = vector.shape_cast %651 : vector<1xf32> to vector<1x1x1xf32>
    %653 = vector.extract %652[0, 0, 0] : f32 from vector<1x1x1xf32>
    %c29_i32 = arith.constant 29 : i32
    %654 = vector.broadcast %c29_i32 : i32 to vector<1x128xi32>
    %655 = arith.cmpi eq, %198, %654 : vector<1x128xi32>
    %656 = arith.extui %655 : vector<1x128xi1> to vector<1x128xi32>
    %657 = arith.sitofp %656 : vector<1x128xi32> to vector<1x128xf32>
    %658 = vector.broadcast %653 : f32 to vector<1x128xf32>
    %659 = arith.mulf %658, %657 : vector<1x128xf32>
    %660 = arith.addf %645, %659 : vector<1x128xf32>
    %cst_212 = arith.constant 0.00120873575 : f32
    %661 = vector.broadcast %cst_212 : f32 to vector<16x16xf32>
    %662 = arith.cmpf oge, %98, %661 : vector<16x16xf32>
    %663 = arith.extui %662 : vector<16x16xi1> to vector<16x16xi32>
    %664 = arith.sitofp %663 : vector<16x16xi32> to vector<16x16xf32>
    %665 = vector.shape_cast %664 : vector<16x16xf32> to vector<1x16x16xf32>
    %cst_213 = arith.constant dense<0.000000e+00> : vector<1xf32>
    %666 = vector.multi_reduction <add>, %665, %cst_213 [1, 2] : vector<1x16x16xf32> to vector<1xf32>
    %667 = vector.shape_cast %666 : vector<1xf32> to vector<1x1x1xf32>
    %668 = vector.extract %667[0, 0, 0] : f32 from vector<1x1x1xf32>
    %c30_i32 = arith.constant 30 : i32
    %669 = vector.broadcast %c30_i32 : i32 to vector<1x128xi32>
    %670 = arith.cmpi eq, %198, %669 : vector<1x128xi32>
    %671 = arith.extui %670 : vector<1x128xi1> to vector<1x128xi32>
    %672 = arith.sitofp %671 : vector<1x128xi32> to vector<1x128xf32>
    %673 = vector.broadcast %668 : f32 to vector<1x128xf32>
    %674 = arith.mulf %673, %672 : vector<1x128xf32>
    %675 = arith.addf %660, %674 : vector<1x128xf32>
    %cst_214 = arith.constant 1.000000e-03 : f32
    %676 = vector.broadcast %cst_214 : f32 to vector<16x16xf32>
    %677 = arith.cmpf oge, %98, %676 : vector<16x16xf32>
    %678 = arith.extui %677 : vector<16x16xi1> to vector<16x16xi32>
    %679 = arith.sitofp %678 : vector<16x16xi32> to vector<16x16xf32>
    %680 = vector.shape_cast %679 : vector<16x16xf32> to vector<1x16x16xf32>
    %cst_215 = arith.constant dense<0.000000e+00> : vector<1xf32>
    %681 = vector.multi_reduction <add>, %680, %cst_215 [1, 2] : vector<1x16x16xf32> to vector<1xf32>
    %682 = vector.shape_cast %681 : vector<1xf32> to vector<1x1x1xf32>
    %683 = vector.extract %682[0, 0, 0] : f32 from vector<1x1x1xf32>
    %c31_i32 = arith.constant 31 : i32
    %684 = vector.broadcast %c31_i32 : i32 to vector<1x128xi32>
    %685 = arith.cmpi eq, %198, %684 : vector<1x128xi32>
    %686 = arith.extui %685 : vector<1x128xi1> to vector<1x128xi32>
    %687 = arith.sitofp %686 : vector<1x128xi32> to vector<1x128xf32>
    %688 = vector.broadcast %683 : f32 to vector<1x128xf32>
    %689 = arith.mulf %688, %687 : vector<1x128xf32>
    %690 = arith.addf %675, %689 : vector<1x128xf32>
    %c0_216 = arith.constant 0 : index
    %c0_217 = arith.constant 0 : index
    %c0_218 = arith.constant 0 : index
    %c0_219 = arith.constant 0 : index
    %691 = vector.load %arg7[%c0_216, %c0_217, %c0_218, %c0_219] : memref<1x1x2x128xf32, #tpu.memory_space<vmem>>, vector<1x1x1x128xf32>
    %692 = vector.shape_cast %691 : vector<1x1x1x128xf32> to vector<1x128xf32>
    %693 = vector.shape_cast %690 : vector<1x128xf32> to vector<1x1x1x128xf32>
    tpu.vector_store %arg7[%c0_216, %c0_217, %c0_218, %c0_219], %693 {strides = array<i32>} : memref<1x1x2x128xf32, #tpu.memory_space<vmem>>, vector<1x1x1x128xf32>,
    %c32_i32_220 = arith.constant 32 : i32
    %694 = vector.broadcast %c32_i32_220 : i32 to vector<1x128xi32>
    %695 = arith.cmpi eq, %198, %694 : vector<1x128xi32>
    %696 = arith.extui %695 : vector<1x128xi1> to vector<1x128xi32>
    %697 = arith.sitofp %696 : vector<1x128xi32> to vector<1x128xf32>
    %698 = vector.broadcast %204 : f32 to vector<1x128xf32>
    %699 = arith.mulf %698, %697 : vector<1x128xf32>
    %cst_221 = arith.constant 0.356674939 : f32
    %700 = vector.broadcast %cst_221 : f32 to vector<16x16xf32>
    %701 = arith.cmpf oge, %191, %700 : vector<16x16xf32>
    %702 = arith.extui %701 : vector<16x16xi1> to vector<16x16xi32>
    %703 = arith.sitofp %702 : vector<16x16xi32> to vector<16x16xf32>
    %704 = vector.shape_cast %703 : vector<16x16xf32> to vector<1x16x16xf32>
    %cst_222 = arith.constant dense<0.000000e+00> : vector<1xf32>
    %705 = vector.multi_reduction <add>, %704, %cst_222 [1, 2] : vector<1x16x16xf32> to vector<1xf32>
    %706 = vector.shape_cast %705 : vector<1xf32> to vector<1x1x1xf32>
    %707 = vector.extract %706[0, 0, 0] : f32 from vector<1x1x1xf32>
    %c0_i32_223 = arith.constant 0 : i32
    %708 = vector.broadcast %c0_i32_223 : i32 to vector<1x128xi32>
    %709 = arith.cmpi eq, %198, %708 : vector<1x128xi32>
    %710 = arith.extui %709 : vector<1x128xi1> to vector<1x128xi32>
    %711 = arith.sitofp %710 : vector<1x128xi32> to vector<1x128xf32>
    %712 = vector.broadcast %707 : f32 to vector<1x128xf32>
    %713 = arith.mulf %712, %711 : vector<1x128xf32>
    %714 = arith.addf %699, %713 : vector<1x128xf32>
    %cst_224 = arith.constant 2.950810e-01 : f32
    %715 = vector.broadcast %cst_224 : f32 to vector<16x16xf32>
    %716 = arith.cmpf oge, %191, %715 : vector<16x16xf32>
    %717 = arith.extui %716 : vector<16x16xi1> to vector<16x16xi32>
    %718 = arith.sitofp %717 : vector<16x16xi32> to vector<16x16xf32>
    %719 = vector.shape_cast %718 : vector<16x16xf32> to vector<1x16x16xf32>
    %cst_225 = arith.constant dense<0.000000e+00> : vector<1xf32>
    %720 = vector.multi_reduction <add>, %719, %cst_225 [1, 2] : vector<1x16x16xf32> to vector<1xf32>
    %721 = vector.shape_cast %720 : vector<1xf32> to vector<1x1x1xf32>
    %722 = vector.extract %721[0, 0, 0] : f32 from vector<1x1x1xf32>
    %c1_i32_226 = arith.constant 1 : i32
    %723 = vector.broadcast %c1_i32_226 : i32 to vector<1x128xi32>
    %724 = arith.cmpi eq, %198, %723 : vector<1x128xi32>
    %725 = arith.extui %724 : vector<1x128xi1> to vector<1x128xi32>
    %726 = arith.sitofp %725 : vector<1x128xi32> to vector<1x128xf32>
    %727 = vector.broadcast %722 : f32 to vector<1x128xf32>
    %728 = arith.mulf %727, %726 : vector<1x128xf32>
    %729 = arith.addf %714, %728 : vector<1x128xf32>
    %cst_227 = arith.constant 0.244123653 : f32
    %730 = vector.broadcast %cst_227 : f32 to vector<16x16xf32>
    %731 = arith.cmpf oge, %191, %730 : vector<16x16xf32>
    %732 = arith.extui %731 : vector<16x16xi1> to vector<16x16xi32>
    %733 = arith.sitofp %732 : vector<16x16xi32> to vector<16x16xf32>
    %734 = vector.shape_cast %733 : vector<16x16xf32> to vector<1x16x16xf32>
    %cst_228 = arith.constant dense<0.000000e+00> : vector<1xf32>
    %735 = vector.multi_reduction <add>, %734, %cst_228 [1, 2] : vector<1x16x16xf32> to vector<1xf32>
    %736 = vector.shape_cast %735 : vector<1xf32> to vector<1x1x1xf32>
    %737 = vector.extract %736[0, 0, 0] : f32 from vector<1x1x1xf32>
    %c2_i32_229 = arith.constant 2 : i32
    %738 = vector.broadcast %c2_i32_229 : i32 to vector<1x128xi32>
    %739 = arith.cmpi eq, %198, %738 : vector<1x128xi32>
    %740 = arith.extui %739 : vector<1x128xi1> to vector<1x128xi32>
    %741 = arith.sitofp %740 : vector<1x128xi32> to vector<1x128xf32>
    %742 = vector.broadcast %737 : f32 to vector<1x128xf32>
    %743 = arith.mulf %742, %741 : vector<1x128xf32>
    %744 = arith.addf %729, %743 : vector<1x128xf32>
    %cst_230 = arith.constant 0.201966107 : f32
    %745 = vector.broadcast %cst_230 : f32 to vector<16x16xf32>
    %746 = arith.cmpf oge, %191, %745 : vector<16x16xf32>
    %747 = arith.extui %746 : vector<16x16xi1> to vector<16x16xi32>
    %748 = arith.sitofp %747 : vector<16x16xi32> to vector<16x16xf32>
    %749 = vector.shape_cast %748 : vector<16x16xf32> to vector<1x16x16xf32>
    %cst_231 = arith.constant dense<0.000000e+00> : vector<1xf32>
    %750 = vector.multi_reduction <add>, %749, %cst_231 [1, 2] : vector<1x16x16xf32> to vector<1xf32>
    %751 = vector.shape_cast %750 : vector<1xf32> to vector<1x1x1xf32>
    %752 = vector.extract %751[0, 0, 0] : f32 from vector<1x1x1xf32>
    %c3_i32_232 = arith.constant 3 : i32
    %753 = vector.broadcast %c3_i32_232 : i32 to vector<1x128xi32>
    %754 = arith.cmpi eq, %198, %753 : vector<1x128xi32>
    %755 = arith.extui %754 : vector<1x128xi1> to vector<1x128xi32>
    %756 = arith.sitofp %755 : vector<1x128xi32> to vector<1x128xf32>
    %757 = vector.broadcast %752 : f32 to vector<1x128xf32>
    %758 = arith.mulf %757, %756 : vector<1x128xf32>
    %759 = arith.addf %744, %758 : vector<1x128xf32>
    %cst_233 = arith.constant 0.167088702 : f32
    %760 = vector.broadcast %cst_233 : f32 to vector<16x16xf32>
    %761 = arith.cmpf oge, %191, %760 : vector<16x16xf32>
    %762 = arith.extui %761 : vector<16x16xi1> to vector<16x16xi32>
    %763 = arith.sitofp %762 : vector<16x16xi32> to vector<16x16xf32>
    %764 = vector.shape_cast %763 : vector<16x16xf32> to vector<1x16x16xf32>
    %cst_234 = arith.constant dense<0.000000e+00> : vector<1xf32>
    %765 = vector.multi_reduction <add>, %764, %cst_234 [1, 2] : vector<1x16x16xf32> to vector<1xf32>
    %766 = vector.shape_cast %765 : vector<1xf32> to vector<1x1x1xf32>
    %767 = vector.extract %766[0, 0, 0] : f32 from vector<1x1x1xf32>
    %c4_i32_235 = arith.constant 4 : i32
    %768 = vector.broadcast %c4_i32_235 : i32 to vector<1x128xi32>
    %769 = arith.cmpi eq, %198, %768 : vector<1x128xi32>
    %770 = arith.extui %769 : vector<1x128xi1> to vector<1x128xi32>
    %771 = arith.sitofp %770 : vector<1x128xi32> to vector<1x128xf32>
    %772 = vector.broadcast %767 : f32 to vector<1x128xf32>
    %773 = arith.mulf %772, %771 : vector<1x128xf32>
    %774 = arith.addf %759, %773 : vector<1x128xf32>
    %cst_236 = arith.constant 0.138234273 : f32
    %775 = vector.broadcast %cst_236 : f32 to vector<16x16xf32>
    %776 = arith.cmpf oge, %191, %775 : vector<16x16xf32>
    %777 = arith.extui %776 : vector<16x16xi1> to vector<16x16xi32>
    %778 = arith.sitofp %777 : vector<16x16xi32> to vector<16x16xf32>
    %779 = vector.shape_cast %778 : vector<16x16xf32> to vector<1x16x16xf32>
    %cst_237 = arith.constant dense<0.000000e+00> : vector<1xf32>
    %780 = vector.multi_reduction <add>, %779, %cst_237 [1, 2] : vector<1x16x16xf32> to vector<1xf32>
    %781 = vector.shape_cast %780 : vector<1xf32> to vector<1x1x1xf32>
    %782 = vector.extract %781[0, 0, 0] : f32 from vector<1x1x1xf32>
    %c5_i32_238 = arith.constant 5 : i32
    %783 = vector.broadcast %c5_i32_238 : i32 to vector<1x128xi32>
    %784 = arith.cmpi eq, %198, %783 : vector<1x128xi32>
    %785 = arith.extui %784 : vector<1x128xi1> to vector<1x128xi32>
    %786 = arith.sitofp %785 : vector<1x128xi32> to vector<1x128xf32>
    %787 = vector.broadcast %782 : f32 to vector<1x128xf32>
    %788 = arith.mulf %787, %786 : vector<1x128xf32>
    %789 = arith.addf %774, %788 : vector<1x128xf32>
    %cst_239 = arith.constant 0.114362687 : f32
    %790 = vector.broadcast %cst_239 : f32 to vector<16x16xf32>
    %791 = arith.cmpf oge, %191, %790 : vector<16x16xf32>
    %792 = arith.extui %791 : vector<16x16xi1> to vector<16x16xi32>
    %793 = arith.sitofp %792 : vector<16x16xi32> to vector<16x16xf32>
    %794 = vector.shape_cast %793 : vector<16x16xf32> to vector<1x16x16xf32>
    %cst_240 = arith.constant dense<0.000000e+00> : vector<1xf32>
    %795 = vector.multi_reduction <add>, %794, %cst_240 [1, 2] : vector<1x16x16xf32> to vector<1xf32>
    %796 = vector.shape_cast %795 : vector<1xf32> to vector<1x1x1xf32>
    %797 = vector.extract %796[0, 0, 0] : f32 from vector<1x1x1xf32>
    %c6_i32_241 = arith.constant 6 : i32
    %798 = vector.broadcast %c6_i32_241 : i32 to vector<1x128xi32>
    %799 = arith.cmpi eq, %198, %798 : vector<1x128xi32>
    %800 = arith.extui %799 : vector<1x128xi1> to vector<1x128xi32>
    %801 = arith.sitofp %800 : vector<1x128xi32> to vector<1x128xf32>
    %802 = vector.broadcast %797 : f32 to vector<1x128xf32>
    %803 = arith.mulf %802, %801 : vector<1x128xf32>
    %804 = arith.addf %789, %803 : vector<1x128xf32>
    %cst_242 = arith.constant 0.0946134701 : f32
    %805 = vector.broadcast %cst_242 : f32 to vector<16x16xf32>
    %806 = arith.cmpf oge, %191, %805 : vector<16x16xf32>
    %807 = arith.extui %806 : vector<16x16xi1> to vector<16x16xi32>
    %808 = arith.sitofp %807 : vector<16x16xi32> to vector<16x16xf32>
    %809 = vector.shape_cast %808 : vector<16x16xf32> to vector<1x16x16xf32>
    %cst_243 = arith.constant dense<0.000000e+00> : vector<1xf32>
    %810 = vector.multi_reduction <add>, %809, %cst_243 [1, 2] : vector<1x16x16xf32> to vector<1xf32>
    %811 = vector.shape_cast %810 : vector<1xf32> to vector<1x1x1xf32>
    %812 = vector.extract %811[0, 0, 0] : f32 from vector<1x1x1xf32>
    %c7_i32_244 = arith.constant 7 : i32
    %813 = vector.broadcast %c7_i32_244 : i32 to vector<1x128xi32>
    %814 = arith.cmpi eq, %198, %813 : vector<1x128xi32>
    %815 = arith.extui %814 : vector<1x128xi1> to vector<1x128xi32>
    %816 = arith.sitofp %815 : vector<1x128xi32> to vector<1x128xf32>
    %817 = vector.broadcast %812 : f32 to vector<1x128xf32>
    %818 = arith.mulf %817, %816 : vector<1x128xf32>
    %819 = arith.addf %804, %818 : vector<1x128xf32>
    %cst_245 = arith.constant 0.0782747343 : f32
    %820 = vector.broadcast %cst_245 : f32 to vector<16x16xf32>
    %821 = arith.cmpf oge, %191, %820 : vector<16x16xf32>
    %822 = arith.extui %821 : vector<16x16xi1> to vector<16x16xi32>
    %823 = arith.sitofp %822 : vector<16x16xi32> to vector<16x16xf32>
    %824 = vector.shape_cast %823 : vector<16x16xf32> to vector<1x16x16xf32>
    %cst_246 = arith.constant dense<0.000000e+00> : vector<1xf32>
    %825 = vector.multi_reduction <add>, %824, %cst_246 [1, 2] : vector<1x16x16xf32> to vector<1xf32>
    %826 = vector.shape_cast %825 : vector<1xf32> to vector<1x1x1xf32>
    %827 = vector.extract %826[0, 0, 0] : f32 from vector<1x1x1xf32>
    %c8_i32_247 = arith.constant 8 : i32
    %828 = vector.broadcast %c8_i32_247 : i32 to vector<1x128xi32>
    %829 = arith.cmpi eq, %198, %828 : vector<1x128xi32>
    %830 = arith.extui %829 : vector<1x128xi1> to vector<1x128xi32>
    %831 = arith.sitofp %830 : vector<1x128xi32> to vector<1x128xf32>
    %832 = vector.broadcast %827 : f32 to vector<1x128xf32>
    %833 = arith.mulf %832, %831 : vector<1x128xf32>
    %834 = arith.addf %819, %833 : vector<1x128xf32>
    %cst_248 = arith.constant 0.0647575259 : f32
    %835 = vector.broadcast %cst_248 : f32 to vector<16x16xf32>
    %836 = arith.cmpf oge, %191, %835 : vector<16x16xf32>
    %837 = arith.extui %836 : vector<16x16xi1> to vector<16x16xi32>
    %838 = arith.sitofp %837 : vector<16x16xi32> to vector<16x16xf32>
    %839 = vector.shape_cast %838 : vector<16x16xf32> to vector<1x16x16xf32>
    %cst_249 = arith.constant dense<0.000000e+00> : vector<1xf32>
    %840 = vector.multi_reduction <add>, %839, %cst_249 [1, 2] : vector<1x16x16xf32> to vector<1xf32>
    %841 = vector.shape_cast %840 : vector<1xf32> to vector<1x1x1xf32>
    %842 = vector.extract %841[0, 0, 0] : f32 from vector<1x1x1xf32>
    %c9_i32_250 = arith.constant 9 : i32
    %843 = vector.broadcast %c9_i32_250 : i32 to vector<1x128xi32>
    %844 = arith.cmpi eq, %198, %843 : vector<1x128xi32>
    %845 = arith.extui %844 : vector<1x128xi1> to vector<1x128xi32>
    %846 = arith.sitofp %845 : vector<1x128xi32> to vector<1x128xf32>
    %847 = vector.broadcast %842 : f32 to vector<1x128xf32>
    %848 = arith.mulf %847, %846 : vector<1x128xf32>
    %849 = arith.addf %834, %848 : vector<1x128xf32>
    %cst_251 = arith.constant 0.0535745919 : f32
    %850 = vector.broadcast %cst_251 : f32 to vector<16x16xf32>
    %851 = arith.cmpf oge, %191, %850 : vector<16x16xf32>
    %852 = arith.extui %851 : vector<16x16xi1> to vector<16x16xi32>
    %853 = arith.sitofp %852 : vector<16x16xi32> to vector<16x16xf32>
    %854 = vector.shape_cast %853 : vector<16x16xf32> to vector<1x16x16xf32>
    %cst_252 = arith.constant dense<0.000000e+00> : vector<1xf32>
    %855 = vector.multi_reduction <add>, %854, %cst_252 [1, 2] : vector<1x16x16xf32> to vector<1xf32>
    %856 = vector.shape_cast %855 : vector<1xf32> to vector<1x1x1xf32>
    %857 = vector.extract %856[0, 0, 0] : f32 from vector<1x1x1xf32>
    %c10_i32_253 = arith.constant 10 : i32
    %858 = vector.broadcast %c10_i32_253 : i32 to vector<1x128xi32>
    %859 = arith.cmpi eq, %198, %858 : vector<1x128xi32>
    %860 = arith.extui %859 : vector<1x128xi1> to vector<1x128xi32>
    %861 = arith.sitofp %860 : vector<1x128xi32> to vector<1x128xf32>
    %862 = vector.broadcast %857 : f32 to vector<1x128xf32>
    %863 = arith.mulf %862, %861 : vector<1x128xf32>
    %864 = arith.addf %849, %863 : vector<1x128xf32>
    %cst_254 = arith.constant 0.0443228297 : f32
    %865 = vector.broadcast %cst_254 : f32 to vector<16x16xf32>
    %866 = arith.cmpf oge, %191, %865 : vector<16x16xf32>
    %867 = arith.extui %866 : vector<16x16xi1> to vector<16x16xi32>
    %868 = arith.sitofp %867 : vector<16x16xi32> to vector<16x16xf32>
    %869 = vector.shape_cast %868 : vector<16x16xf32> to vector<1x16x16xf32>
    %cst_255 = arith.constant dense<0.000000e+00> : vector<1xf32>
    %870 = vector.multi_reduction <add>, %869, %cst_255 [1, 2] : vector<1x16x16xf32> to vector<1xf32>
    %871 = vector.shape_cast %870 : vector<1xf32> to vector<1x1x1xf32>
    %872 = vector.extract %871[0, 0, 0] : f32 from vector<1x1x1xf32>
    %c11_i32_256 = arith.constant 11 : i32
    %873 = vector.broadcast %c11_i32_256 : i32 to vector<1x128xi32>
    %874 = arith.cmpi eq, %198, %873 : vector<1x128xi32>
    %875 = arith.extui %874 : vector<1x128xi1> to vector<1x128xi32>
    %876 = arith.sitofp %875 : vector<1x128xi32> to vector<1x128xf32>
    %877 = vector.broadcast %872 : f32 to vector<1x128xf32>
    %878 = arith.mulf %877, %876 : vector<1x128xf32>
    %879 = arith.addf %864, %878 : vector<1x128xf32>
    %cst_257 = arith.constant 0.0366687514 : f32
    %880 = vector.broadcast %cst_257 : f32 to vector<16x16xf32>
    %881 = arith.cmpf oge, %191, %880 : vector<16x16xf32>
    %882 = arith.extui %881 : vector<16x16xi1> to vector<16x16xi32>
    %883 = arith.sitofp %882 : vector<16x16xi32> to vector<16x16xf32>
    %884 = vector.shape_cast %883 : vector<16x16xf32> to vector<1x16x16xf32>
    %cst_258 = arith.constant dense<0.000000e+00> : vector<1xf32>
    %885 = vector.multi_reduction <add>, %884, %cst_258 [1, 2] : vector<1x16x16xf32> to vector<1xf32>
    %886 = vector.shape_cast %885 : vector<1xf32> to vector<1x1x1xf32>
    %887 = vector.extract %886[0, 0, 0] : f32 from vector<1x1x1xf32>
    %c12_i32_259 = arith.constant 12 : i32
    %888 = vector.broadcast %c12_i32_259 : i32 to vector<1x128xi32>
    %889 = arith.cmpi eq, %198, %888 : vector<1x128xi32>
    %890 = arith.extui %889 : vector<1x128xi1> to vector<1x128xi32>
    %891 = arith.sitofp %890 : vector<1x128xi32> to vector<1x128xf32>
    %892 = vector.broadcast %887 : f32 to vector<1x128xf32>
    %893 = arith.mulf %892, %891 : vector<1x128xf32>
    %894 = arith.addf %879, %893 : vector<1x128xf32>
    %cst_260 = arith.constant 0.0303364489 : f32
    %895 = vector.broadcast %cst_260 : f32 to vector<16x16xf32>
    %896 = arith.cmpf oge, %191, %895 : vector<16x16xf32>
    %897 = arith.extui %896 : vector<16x16xi1> to vector<16x16xi32>
    %898 = arith.sitofp %897 : vector<16x16xi32> to vector<16x16xf32>
    %899 = vector.shape_cast %898 : vector<16x16xf32> to vector<1x16x16xf32>
    %cst_261 = arith.constant dense<0.000000e+00> : vector<1xf32>
    %900 = vector.multi_reduction <add>, %899, %cst_261 [1, 2] : vector<1x16x16xf32> to vector<1xf32>
    %901 = vector.shape_cast %900 : vector<1xf32> to vector<1x1x1xf32>
    %902 = vector.extract %901[0, 0, 0] : f32 from vector<1x1x1xf32>
    %c13_i32_262 = arith.constant 13 : i32
    %903 = vector.broadcast %c13_i32_262 : i32 to vector<1x128xi32>
    %904 = arith.cmpi eq, %198, %903 : vector<1x128xi32>
    %905 = arith.extui %904 : vector<1x128xi1> to vector<1x128xi32>
    %906 = arith.sitofp %905 : vector<1x128xi32> to vector<1x128xf32>
    %907 = vector.broadcast %902 : f32 to vector<1x128xf32>
    %908 = arith.mulf %907, %906 : vector<1x128xf32>
    %909 = arith.addf %894, %908 : vector<1x128xf32>
    %cst_263 = arith.constant 0.0250976682 : f32
    %910 = vector.broadcast %cst_263 : f32 to vector<16x16xf32>
    %911 = arith.cmpf oge, %191, %910 : vector<16x16xf32>
    %912 = arith.extui %911 : vector<16x16xi1> to vector<16x16xi32>
    %913 = arith.sitofp %912 : vector<16x16xi32> to vector<16x16xf32>
    %914 = vector.shape_cast %913 : vector<16x16xf32> to vector<1x16x16xf32>
    %cst_264 = arith.constant dense<0.000000e+00> : vector<1xf32>
    %915 = vector.multi_reduction <add>, %914, %cst_264 [1, 2] : vector<1x16x16xf32> to vector<1xf32>
    %916 = vector.shape_cast %915 : vector<1xf32> to vector<1x1x1xf32>
    %917 = vector.extract %916[0, 0, 0] : f32 from vector<1x1x1xf32>
    %c14_i32_265 = arith.constant 14 : i32
    %918 = vector.broadcast %c14_i32_265 : i32 to vector<1x128xi32>
    %919 = arith.cmpi eq, %198, %918 : vector<1x128xi32>
    %920 = arith.extui %919 : vector<1x128xi1> to vector<1x128xi32>
    %921 = arith.sitofp %920 : vector<1x128xi32> to vector<1x128xf32>
    %922 = vector.broadcast %917 : f32 to vector<1x128xf32>
    %923 = arith.mulf %922, %921 : vector<1x128xf32>
    %924 = arith.addf %909, %923 : vector<1x128xf32>
    %cst_266 = arith.constant 0.0207635686 : f32
    %925 = vector.broadcast %cst_266 : f32 to vector<16x16xf32>
    %926 = arith.cmpf oge, %191, %925 : vector<16x16xf32>
    %927 = arith.extui %926 : vector<16x16xi1> to vector<16x16xi32>
    %928 = arith.sitofp %927 : vector<16x16xi32> to vector<16x16xf32>
    %929 = vector.shape_cast %928 : vector<16x16xf32> to vector<1x16x16xf32>
    %cst_267 = arith.constant dense<0.000000e+00> : vector<1xf32>
    %930 = vector.multi_reduction <add>, %929, %cst_267 [1, 2] : vector<1x16x16xf32> to vector<1xf32>
    %931 = vector.shape_cast %930 : vector<1xf32> to vector<1x1x1xf32>
    %932 = vector.extract %931[0, 0, 0] : f32 from vector<1x1x1xf32>
    %c15_i32_268 = arith.constant 15 : i32
    %933 = vector.broadcast %c15_i32_268 : i32 to vector<1x128xi32>
    %934 = arith.cmpi eq, %198, %933 : vector<1x128xi32>
    %935 = arith.extui %934 : vector<1x128xi1> to vector<1x128xi32>
    %936 = arith.sitofp %935 : vector<1x128xi32> to vector<1x128xf32>
    %937 = vector.broadcast %932 : f32 to vector<1x128xf32>
    %938 = arith.mulf %937, %936 : vector<1x128xf32>
    %939 = arith.addf %924, %938 : vector<1x128xf32>
    %cst_269 = arith.constant 0.0171779208 : f32
    %940 = vector.broadcast %cst_269 : f32 to vector<16x16xf32>
    %941 = arith.cmpf oge, %191, %940 : vector<16x16xf32>
    %942 = arith.extui %941 : vector<16x16xi1> to vector<16x16xi32>
    %943 = arith.sitofp %942 : vector<16x16xi32> to vector<16x16xf32>
    %944 = vector.shape_cast %943 : vector<16x16xf32> to vector<1x16x16xf32>
    %cst_270 = arith.constant dense<0.000000e+00> : vector<1xf32>
    %945 = vector.multi_reduction <add>, %944, %cst_270 [1, 2] : vector<1x16x16xf32> to vector<1xf32>
    %946 = vector.shape_cast %945 : vector<1xf32> to vector<1x1x1xf32>
    %947 = vector.extract %946[0, 0, 0] : f32 from vector<1x1x1xf32>
    %c16_i32_271 = arith.constant 16 : i32
    %948 = vector.broadcast %c16_i32_271 : i32 to vector<1x128xi32>
    %949 = arith.cmpi eq, %198, %948 : vector<1x128xi32>
    %950 = arith.extui %949 : vector<1x128xi1> to vector<1x128xi32>
    %951 = arith.sitofp %950 : vector<1x128xi32> to vector<1x128xf32>
    %952 = vector.broadcast %947 : f32 to vector<1x128xf32>
    %953 = arith.mulf %952, %951 : vector<1x128xf32>
    %954 = arith.addf %939, %953 : vector<1x128xf32>
    %cst_272 = arith.constant 0.0142114777 : f32
    %955 = vector.broadcast %cst_272 : f32 to vector<16x16xf32>
    %956 = arith.cmpf oge, %191, %955 : vector<16x16xf32>
    %957 = arith.extui %956 : vector<16x16xi1> to vector<16x16xi32>
    %958 = arith.sitofp %957 : vector<16x16xi32> to vector<16x16xf32>
    %959 = vector.shape_cast %958 : vector<16x16xf32> to vector<1x16x16xf32>
    %cst_273 = arith.constant dense<0.000000e+00> : vector<1xf32>
    %960 = vector.multi_reduction <add>, %959, %cst_273 [1, 2] : vector<1x16x16xf32> to vector<1xf32>
    %961 = vector.shape_cast %960 : vector<1xf32> to vector<1x1x1xf32>
    %962 = vector.extract %961[0, 0, 0] : f32 from vector<1x1x1xf32>
    %c17_i32_274 = arith.constant 17 : i32
    %963 = vector.broadcast %c17_i32_274 : i32 to vector<1x128xi32>
    %964 = arith.cmpi eq, %198, %963 : vector<1x128xi32>
    %965 = arith.extui %964 : vector<1x128xi1> to vector<1x128xi32>
    %966 = arith.sitofp %965 : vector<1x128xi32> to vector<1x128xf32>
    %967 = vector.broadcast %962 : f32 to vector<1x128xf32>
    %968 = arith.mulf %967, %966 : vector<1x128xf32>
    %969 = arith.addf %954, %968 : vector<1x128xf32>
    %cst_275 = arith.constant 0.0117573068 : f32
    %970 = vector.broadcast %cst_275 : f32 to vector<16x16xf32>
    %971 = arith.cmpf oge, %191, %970 : vector<16x16xf32>
    %972 = arith.extui %971 : vector<16x16xi1> to vector<16x16xi32>
    %973 = arith.sitofp %972 : vector<16x16xi32> to vector<16x16xf32>
    %974 = vector.shape_cast %973 : vector<16x16xf32> to vector<1x16x16xf32>
    %cst_276 = arith.constant dense<0.000000e+00> : vector<1xf32>
    %975 = vector.multi_reduction <add>, %974, %cst_276 [1, 2] : vector<1x16x16xf32> to vector<1xf32>
    %976 = vector.shape_cast %975 : vector<1xf32> to vector<1x1x1xf32>
    %977 = vector.extract %976[0, 0, 0] : f32 from vector<1x1x1xf32>
    %c18_i32_277 = arith.constant 18 : i32
    %978 = vector.broadcast %c18_i32_277 : i32 to vector<1x128xi32>
    %979 = arith.cmpi eq, %198, %978 : vector<1x128xi32>
    %980 = arith.extui %979 : vector<1x128xi1> to vector<1x128xi32>
    %981 = arith.sitofp %980 : vector<1x128xi32> to vector<1x128xf32>
    %982 = vector.broadcast %977 : f32 to vector<1x128xf32>
    %983 = arith.mulf %982, %981 : vector<1x128xf32>
    %984 = arith.addf %969, %983 : vector<1x128xf32>
    %cst_278 = arith.constant 0.00972694531 : f32
    %985 = vector.broadcast %cst_278 : f32 to vector<16x16xf32>
    %986 = arith.cmpf oge, %191, %985 : vector<16x16xf32>
    %987 = arith.extui %986 : vector<16x16xi1> to vector<16x16xi32>
    %988 = arith.sitofp %987 : vector<16x16xi32> to vector<16x16xf32>
    %989 = vector.shape_cast %988 : vector<16x16xf32> to vector<1x16x16xf32>
    %cst_279 = arith.constant dense<0.000000e+00> : vector<1xf32>
    %990 = vector.multi_reduction <add>, %989, %cst_279 [1, 2] : vector<1x16x16xf32> to vector<1xf32>
    %991 = vector.shape_cast %990 : vector<1xf32> to vector<1x1x1xf32>
    %992 = vector.extract %991[0, 0, 0] : f32 from vector<1x1x1xf32>
    %c19_i32_280 = arith.constant 19 : i32
    %993 = vector.broadcast %c19_i32_280 : i32 to vector<1x128xi32>
    %994 = arith.cmpi eq, %198, %993 : vector<1x128xi32>
    %995 = arith.extui %994 : vector<1x128xi1> to vector<1x128xi32>
    %996 = arith.sitofp %995 : vector<1x128xi32> to vector<1x128xf32>
    %997 = vector.broadcast %992 : f32 to vector<1x128xf32>
    %998 = arith.mulf %997, %996 : vector<1x128xf32>
    %999 = arith.addf %984, %998 : vector<1x128xf32>
    %cst_281 = arith.constant 0.00804720632 : f32
    %1000 = vector.broadcast %cst_281 : f32 to vector<16x16xf32>
    %1001 = arith.cmpf oge, %191, %1000 : vector<16x16xf32>
    %1002 = arith.extui %1001 : vector<16x16xi1> to vector<16x16xi32>
    %1003 = arith.sitofp %1002 : vector<16x16xi32> to vector<16x16xf32>
    %1004 = vector.shape_cast %1003 : vector<16x16xf32> to vector<1x16x16xf32>
    %cst_282 = arith.constant dense<0.000000e+00> : vector<1xf32>
    %1005 = vector.multi_reduction <add>, %1004, %cst_282 [1, 2] : vector<1x16x16xf32> to vector<1xf32>
    %1006 = vector.shape_cast %1005 : vector<1xf32> to vector<1x1x1xf32>
    %1007 = vector.extract %1006[0, 0, 0] : f32 from vector<1x1x1xf32>
    %c20_i32_283 = arith.constant 20 : i32
    %1008 = vector.broadcast %c20_i32_283 : i32 to vector<1x128xi32>
    %1009 = arith.cmpi eq, %198, %1008 : vector<1x128xi32>
    %1010 = arith.extui %1009 : vector<1x128xi1> to vector<1x128xi32>
    %1011 = arith.sitofp %1010 : vector<1x128xi32> to vector<1x128xf32>
    %1012 = vector.broadcast %1007 : f32 to vector<1x128xf32>
    %1013 = arith.mulf %1012, %1011 : vector<1x128xf32>
    %1014 = arith.addf %999, %1013 : vector<1x128xf32>
    %cst_284 = arith.constant 0.0066575394 : f32
    %1015 = vector.broadcast %cst_284 : f32 to vector<16x16xf32>
    %1016 = arith.cmpf oge, %191, %1015 : vector<16x16xf32>
    %1017 = arith.extui %1016 : vector<16x16xi1> to vector<16x16xi32>
    %1018 = arith.sitofp %1017 : vector<16x16xi32> to vector<16x16xf32>
    %1019 = vector.shape_cast %1018 : vector<16x16xf32> to vector<1x16x16xf32>
    %cst_285 = arith.constant dense<0.000000e+00> : vector<1xf32>
    %1020 = vector.multi_reduction <add>, %1019, %cst_285 [1, 2] : vector<1x16x16xf32> to vector<1xf32>
    %1021 = vector.shape_cast %1020 : vector<1xf32> to vector<1x1x1xf32>
    %1022 = vector.extract %1021[0, 0, 0] : f32 from vector<1x1x1xf32>
    %c21_i32_286 = arith.constant 21 : i32
    %1023 = vector.broadcast %c21_i32_286 : i32 to vector<1x128xi32>
    %1024 = arith.cmpi eq, %198, %1023 : vector<1x128xi32>
    %1025 = arith.extui %1024 : vector<1x128xi1> to vector<1x128xi32>
    %1026 = arith.sitofp %1025 : vector<1x128xi32> to vector<1x128xf32>
    %1027 = vector.broadcast %1022 : f32 to vector<1x128xf32>
    %1028 = arith.mulf %1027, %1026 : vector<1x128xf32>
    %1029 = arith.addf %1014, %1028 : vector<1x128xf32>
    %cst_287 = arith.constant 0.00550785335 : f32
    %1030 = vector.broadcast %cst_287 : f32 to vector<16x16xf32>
    %1031 = arith.cmpf oge, %191, %1030 : vector<16x16xf32>
    %1032 = arith.extui %1031 : vector<16x16xi1> to vector<16x16xi32>
    %1033 = arith.sitofp %1032 : vector<16x16xi32> to vector<16x16xf32>
    %1034 = vector.shape_cast %1033 : vector<16x16xf32> to vector<1x16x16xf32>
    %cst_288 = arith.constant dense<0.000000e+00> : vector<1xf32>
    %1035 = vector.multi_reduction <add>, %1034, %cst_288 [1, 2] : vector<1x16x16xf32> to vector<1xf32>
    %1036 = vector.shape_cast %1035 : vector<1xf32> to vector<1x1x1xf32>
    %1037 = vector.extract %1036[0, 0, 0] : f32 from vector<1x1x1xf32>
    %c22_i32_289 = arith.constant 22 : i32
    %1038 = vector.broadcast %c22_i32_289 : i32 to vector<1x128xi32>
    %1039 = arith.cmpi eq, %198, %1038 : vector<1x128xi32>
    %1040 = arith.extui %1039 : vector<1x128xi1> to vector<1x128xi32>
    %1041 = arith.sitofp %1040 : vector<1x128xi32> to vector<1x128xf32>
    %1042 = vector.broadcast %1037 : f32 to vector<1x128xf32>
    %1043 = arith.mulf %1042, %1041 : vector<1x128xf32>
    %1044 = arith.addf %1029, %1043 : vector<1x128xf32>
    %cst_290 = arith.constant 0.00455670571 : f32
    %1045 = vector.broadcast %cst_290 : f32 to vector<16x16xf32>
    %1046 = arith.cmpf oge, %191, %1045 : vector<16x16xf32>
    %1047 = arith.extui %1046 : vector<16x16xi1> to vector<16x16xi32>
    %1048 = arith.sitofp %1047 : vector<16x16xi32> to vector<16x16xf32>
    %1049 = vector.shape_cast %1048 : vector<16x16xf32> to vector<1x16x16xf32>
    %cst_291 = arith.constant dense<0.000000e+00> : vector<1xf32>
    %1050 = vector.multi_reduction <add>, %1049, %cst_291 [1, 2] : vector<1x16x16xf32> to vector<1xf32>
    %1051 = vector.shape_cast %1050 : vector<1xf32> to vector<1x1x1xf32>
    %1052 = vector.extract %1051[0, 0, 0] : f32 from vector<1x1x1xf32>
    %c23_i32_292 = arith.constant 23 : i32
    %1053 = vector.broadcast %c23_i32_292 : i32 to vector<1x128xi32>
    %1054 = arith.cmpi eq, %198, %1053 : vector<1x128xi32>
    %1055 = arith.extui %1054 : vector<1x128xi1> to vector<1x128xi32>
    %1056 = arith.sitofp %1055 : vector<1x128xi32> to vector<1x128xf32>
    %1057 = vector.broadcast %1052 : f32 to vector<1x128xf32>
    %1058 = arith.mulf %1057, %1056 : vector<1x128xf32>
    %1059 = arith.addf %1044, %1058 : vector<1x128xf32>
    %cst_293 = arith.constant 0.00376981148 : f32
    %1060 = vector.broadcast %cst_293 : f32 to vector<16x16xf32>
    %1061 = arith.cmpf oge, %191, %1060 : vector<16x16xf32>
    %1062 = arith.extui %1061 : vector<16x16xi1> to vector<16x16xi32>
    %1063 = arith.sitofp %1062 : vector<16x16xi32> to vector<16x16xf32>
    %1064 = vector.shape_cast %1063 : vector<16x16xf32> to vector<1x16x16xf32>
    %cst_294 = arith.constant dense<0.000000e+00> : vector<1xf32>
    %1065 = vector.multi_reduction <add>, %1064, %cst_294 [1, 2] : vector<1x16x16xf32> to vector<1xf32>
    %1066 = vector.shape_cast %1065 : vector<1xf32> to vector<1x1x1xf32>
    %1067 = vector.extract %1066[0, 0, 0] : f32 from vector<1x1x1xf32>
    %c24_i32_295 = arith.constant 24 : i32
    %1068 = vector.broadcast %c24_i32_295 : i32 to vector<1x128xi32>
    %1069 = arith.cmpi eq, %198, %1068 : vector<1x128xi32>
    %1070 = arith.extui %1069 : vector<1x128xi1> to vector<1x128xi32>
    %1071 = arith.sitofp %1070 : vector<1x128xi32> to vector<1x128xf32>
    %1072 = vector.broadcast %1067 : f32 to vector<1x128xf32>
    %1073 = arith.mulf %1072, %1071 : vector<1x128xf32>
    %1074 = arith.addf %1059, %1073 : vector<1x128xf32>
    %cst_296 = arith.constant 0.00311880512 : f32
    %1075 = vector.broadcast %cst_296 : f32 to vector<16x16xf32>
    %1076 = arith.cmpf oge, %191, %1075 : vector<16x16xf32>
    %1077 = arith.extui %1076 : vector<16x16xi1> to vector<16x16xi32>
    %1078 = arith.sitofp %1077 : vector<16x16xi32> to vector<16x16xf32>
    %1079 = vector.shape_cast %1078 : vector<16x16xf32> to vector<1x16x16xf32>
    %cst_297 = arith.constant dense<0.000000e+00> : vector<1xf32>
    %1080 = vector.multi_reduction <add>, %1079, %cst_297 [1, 2] : vector<1x16x16xf32> to vector<1xf32>
    %1081 = vector.shape_cast %1080 : vector<1xf32> to vector<1x1x1xf32>
    %1082 = vector.extract %1081[0, 0, 0] : f32 from vector<1x1x1xf32>
    %c25_i32_298 = arith.constant 25 : i32
    %1083 = vector.broadcast %c25_i32_298 : i32 to vector<1x128xi32>
    %1084 = arith.cmpi eq, %198, %1083 : vector<1x128xi32>
    %1085 = arith.extui %1084 : vector<1x128xi1> to vector<1x128xi32>
    %1086 = arith.sitofp %1085 : vector<1x128xi32> to vector<1x128xf32>
    %1087 = vector.broadcast %1082 : f32 to vector<1x128xf32>
    %1088 = arith.mulf %1087, %1086 : vector<1x128xf32>
    %1089 = arith.addf %1074, %1088 : vector<1x128xf32>
    %cst_299 = arith.constant 0.00258022081 : f32
    %1090 = vector.broadcast %cst_299 : f32 to vector<16x16xf32>
    %1091 = arith.cmpf oge, %191, %1090 : vector<16x16xf32>
    %1092 = arith.extui %1091 : vector<16x16xi1> to vector<16x16xi32>
    %1093 = arith.sitofp %1092 : vector<16x16xi32> to vector<16x16xf32>
    %1094 = vector.shape_cast %1093 : vector<16x16xf32> to vector<1x16x16xf32>
    %cst_300 = arith.constant dense<0.000000e+00> : vector<1xf32>
    %1095 = vector.multi_reduction <add>, %1094, %cst_300 [1, 2] : vector<1x16x16xf32> to vector<1xf32>
    %1096 = vector.shape_cast %1095 : vector<1xf32> to vector<1x1x1xf32>
    %1097 = vector.extract %1096[0, 0, 0] : f32 from vector<1x1x1xf32>
    %c26_i32_301 = arith.constant 26 : i32
    %1098 = vector.broadcast %c26_i32_301 : i32 to vector<1x128xi32>
    %1099 = arith.cmpi eq, %198, %1098 : vector<1x128xi32>
    %1100 = arith.extui %1099 : vector<1x128xi1> to vector<1x128xi32>
    %1101 = arith.sitofp %1100 : vector<1x128xi32> to vector<1x128xf32>
    %1102 = vector.broadcast %1097 : f32 to vector<1x128xf32>
    %1103 = arith.mulf %1102, %1101 : vector<1x128xf32>
    %1104 = arith.addf %1089, %1103 : vector<1x128xf32>
    %cst_302 = arith.constant 0.00213464419 : f32
    %1105 = vector.broadcast %cst_302 : f32 to vector<16x16xf32>
    %1106 = arith.cmpf oge, %191, %1105 : vector<16x16xf32>
    %1107 = arith.extui %1106 : vector<16x16xi1> to vector<16x16xi32>
    %1108 = arith.sitofp %1107 : vector<16x16xi32> to vector<16x16xf32>
    %1109 = vector.shape_cast %1108 : vector<16x16xf32> to vector<1x16x16xf32>
    %cst_303 = arith.constant dense<0.000000e+00> : vector<1xf32>
    %1110 = vector.multi_reduction <add>, %1109, %cst_303 [1, 2] : vector<1x16x16xf32> to vector<1xf32>
    %1111 = vector.shape_cast %1110 : vector<1xf32> to vector<1x1x1xf32>
    %1112 = vector.extract %1111[0, 0, 0] : f32 from vector<1x1x1xf32>
    %c27_i32_304 = arith.constant 27 : i32
    %1113 = vector.broadcast %c27_i32_304 : i32 to vector<1x128xi32>
    %1114 = arith.cmpi eq, %198, %1113 : vector<1x128xi32>
    %1115 = arith.extui %1114 : vector<1x128xi1> to vector<1x128xi32>
    %1116 = arith.sitofp %1115 : vector<1x128xi32> to vector<1x128xf32>
    %1117 = vector.broadcast %1112 : f32 to vector<1x128xf32>
    %1118 = arith.mulf %1117, %1116 : vector<1x128xf32>
    %1119 = arith.addf %1104, %1118 : vector<1x128xf32>
    %cst_305 = arith.constant 0.00176601391 : f32
    %1120 = vector.broadcast %cst_305 : f32 to vector<16x16xf32>
    %1121 = arith.cmpf oge, %191, %1120 : vector<16x16xf32>
    %1122 = arith.extui %1121 : vector<16x16xi1> to vector<16x16xi32>
    %1123 = arith.sitofp %1122 : vector<16x16xi32> to vector<16x16xf32>
    %1124 = vector.shape_cast %1123 : vector<16x16xf32> to vector<1x16x16xf32>
    %cst_306 = arith.constant dense<0.000000e+00> : vector<1xf32>
    %1125 = vector.multi_reduction <add>, %1124, %cst_306 [1, 2] : vector<1x16x16xf32> to vector<1xf32>
    %1126 = vector.shape_cast %1125 : vector<1xf32> to vector<1x1x1xf32>
    %1127 = vector.extract %1126[0, 0, 0] : f32 from vector<1x1x1xf32>
    %c28_i32_307 = arith.constant 28 : i32
    %1128 = vector.broadcast %c28_i32_307 : i32 to vector<1x128xi32>
    %1129 = arith.cmpi eq, %198, %1128 : vector<1x128xi32>
    %1130 = arith.extui %1129 : vector<1x128xi1> to vector<1x128xi32>
    %1131 = arith.sitofp %1130 : vector<1x128xi32> to vector<1x128xf32>
    %1132 = vector.broadcast %1127 : f32 to vector<1x128xf32>
    %1133 = arith.mulf %1132, %1131 : vector<1x128xf32>
    %1134 = arith.addf %1119, %1133 : vector<1x128xf32>
    %cst_308 = arith.constant 0.00146104221 : f32
    %1135 = vector.broadcast %cst_308 : f32 to vector<16x16xf32>
    %1136 = arith.cmpf oge, %191, %1135 : vector<16x16xf32>
    %1137 = arith.extui %1136 : vector<16x16xi1> to vector<16x16xi32>
    %1138 = arith.sitofp %1137 : vector<16x16xi32> to vector<16x16xf32>
    %1139 = vector.shape_cast %1138 : vector<16x16xf32> to vector<1x16x16xf32>
    %cst_309 = arith.constant dense<0.000000e+00> : vector<1xf32>
    %1140 = vector.multi_reduction <add>, %1139, %cst_309 [1, 2] : vector<1x16x16xf32> to vector<1xf32>
    %1141 = vector.shape_cast %1140 : vector<1xf32> to vector<1x1x1xf32>
    %1142 = vector.extract %1141[0, 0, 0] : f32 from vector<1x1x1xf32>
    %c29_i32_310 = arith.constant 29 : i32
    %1143 = vector.broadcast %c29_i32_310 : i32 to vector<1x128xi32>
    %1144 = arith.cmpi eq, %198, %1143 : vector<1x128xi32>
    %1145 = arith.extui %1144 : vector<1x128xi1> to vector<1x128xi32>
    %1146 = arith.sitofp %1145 : vector<1x128xi32> to vector<1x128xf32>
    %1147 = vector.broadcast %1142 : f32 to vector<1x128xf32>
    %1148 = arith.mulf %1147, %1146 : vector<1x128xf32>
    %1149 = arith.addf %1134, %1148 : vector<1x128xf32>
    %cst_311 = arith.constant 0.00120873575 : f32
    %1150 = vector.broadcast %cst_311 : f32 to vector<16x16xf32>
    %1151 = arith.cmpf oge, %191, %1150 : vector<16x16xf32>
    %1152 = arith.extui %1151 : vector<16x16xi1> to vector<16x16xi32>
    %1153 = arith.sitofp %1152 : vector<16x16xi32> to vector<16x16xf32>
    %1154 = vector.shape_cast %1153 : vector<16x16xf32> to vector<1x16x16xf32>
    %cst_312 = arith.constant dense<0.000000e+00> : vector<1xf32>
    %1155 = vector.multi_reduction <add>, %1154, %cst_312 [1, 2] : vector<1x16x16xf32> to vector<1xf32>
    %1156 = vector.shape_cast %1155 : vector<1xf32> to vector<1x1x1xf32>
    %1157 = vector.extract %1156[0, 0, 0] : f32 from vector<1x1x1xf32>
    %c30_i32_313 = arith.constant 30 : i32
    %1158 = vector.broadcast %c30_i32_313 : i32 to vector<1x128xi32>
    %1159 = arith.cmpi eq, %198, %1158 : vector<1x128xi32>
    %1160 = arith.extui %1159 : vector<1x128xi1> to vector<1x128xi32>
    %1161 = arith.sitofp %1160 : vector<1x128xi32> to vector<1x128xf32>
    %1162 = vector.broadcast %1157 : f32 to vector<1x128xf32>
    %1163 = arith.mulf %1162, %1161 : vector<1x128xf32>
    %1164 = arith.addf %1149, %1163 : vector<1x128xf32>
    %cst_314 = arith.constant 1.000000e-03 : f32
    %1165 = vector.broadcast %cst_314 : f32 to vector<16x16xf32>
    %1166 = arith.cmpf oge, %191, %1165 : vector<16x16xf32>
    %1167 = arith.extui %1166 : vector<16x16xi1> to vector<16x16xi32>
    %1168 = arith.sitofp %1167 : vector<16x16xi32> to vector<16x16xf32>
    %1169 = vector.shape_cast %1168 : vector<16x16xf32> to vector<1x16x16xf32>
    %cst_315 = arith.constant dense<0.000000e+00> : vector<1xf32>
    %1170 = vector.multi_reduction <add>, %1169, %cst_315 [1, 2] : vector<1x16x16xf32> to vector<1xf32>
    %1171 = vector.shape_cast %1170 : vector<1xf32> to vector<1x1x1xf32>
    %1172 = vector.extract %1171[0, 0, 0] : f32 from vector<1x1x1xf32>
    %c31_i32_316 = arith.constant 31 : i32
    %1173 = vector.broadcast %c31_i32_316 : i32 to vector<1x128xi32>
    %1174 = arith.cmpi eq, %198, %1173 : vector<1x128xi32>
    %1175 = arith.extui %1174 : vector<1x128xi1> to vector<1x128xi32>
    %1176 = arith.sitofp %1175 : vector<1x128xi32> to vector<1x128xf32>
    %1177 = vector.broadcast %1172 : f32 to vector<1x128xf32>
    %1178 = arith.mulf %1177, %1176 : vector<1x128xf32>
    %1179 = arith.addf %1164, %1178 : vector<1x128xf32>
    %c0_317 = arith.constant 0 : index
    %c0_318 = arith.constant 0 : index
    %c1_319 = arith.constant 1 : index
    %c0_320 = arith.constant 0 : index
    %1180 = vector.load %arg7[%c0_317, %c0_318, %c1_319, %c0_320] : memref<1x1x2x128xf32, #tpu.memory_space<vmem>>, vector<1x1x1x128xf32>
    %1181 = vector.shape_cast %1180 : vector<1x1x1x128xf32> to vector<1x128xf32>
    %1182 = vector.shape_cast %1179 : vector<1x128xf32> to vector<1x1x1x128xf32>
    tpu.vector_store %arg7[%c0_317, %c0_318, %c1_319, %c0_320], %1182 {strides = array<i32>} : memref<1x1x2x128xf32, #tpu.memory_space<vmem>>, vector<1x1x1x128xf32>,
    return
  }
  func.func @transform_0(%arg0: i32, %arg1: i32) -> (i32, i32, i32, i32) {
    %c0_i32 = arith.constant 0 : i32
    %c0_i32_0 = arith.constant 0 : i32
    %c0_i32_1 = arith.constant 0 : i32
    return %arg0, %c0_i32, %arg1, %c0_i32_0 : i32, i32, i32, i32
  }
  func.func @transform_1(%arg0: i32, %arg1: i32) -> (i32, i32, i32, i32) {
    %c0_i32 = arith.constant 0 : i32
    %c0_i32_0 = arith.constant 0 : i32
    %c0_i32_1 = arith.constant 0 : i32
    return %arg0, %c0_i32, %arg1, %c0_i32_0 : i32, i32, i32, i32
  }
  func.func @transform_2(%arg0: i32, %arg1: i32) -> (i32, i32, i32) {
    %c0_i32 = arith.constant 0 : i32
    %c0_i32_0 = arith.constant 0 : i32
    return %arg0, %arg1, %c0_i32 : i32, i32, i32
  }
  func.func @transform_3(%arg0: i32, %arg1: i32) -> (i32, i32, i32) {
    %c0_i32 = arith.constant 0 : i32
    %c0_i32_0 = arith.constant 0 : i32
    return %arg0, %arg1, %c0_i32 : i32, i32, i32
  }
  func.func @transform_4(%arg0: i32, %arg1: i32) -> (i32, i32, i32) {
    %c0_i32 = arith.constant 0 : i32
    %c0_i32_0 = arith.constant 0 : i32
    return %arg0, %arg1, %c0_i32 : i32, i32, i32
  }
  func.func @transform_5(%arg0: i32, %arg1: i32) -> (i32, i32, i32, i32) {
    %c0_i32 = arith.constant 0 : i32
    %c0_i32_0 = arith.constant 0 : i32
    %c0_i32_1 = arith.constant 0 : i32
    return %arg0, %arg1, %c0_i32, %c0_i32_0 : i32, i32, i32, i32
  }
}

module attributes {stable_mosaic.version = 11 : i64} {
  func.func @_reduce_kernel(%arg0: i32, %arg1: i32, %arg2: memref<2xf32, #tpu.memory_space<smem>>, %arg3: memref<1x16x16xf32, #tpu.memory_space<vmem>>, %arg4: memref<1x16x16xf32, #tpu.memory_space<vmem>>, %arg5: memref<1x1x1x8xf32, #tpu.memory_space<vmem>>) attributes {dimension_semantics = [#tpu.dimension_semantics<parallel>, #tpu.dimension_semantics<parallel>], iteration_bounds = array<i64: 2, 1>, scalar_prefetch = 0 : i64, scratch_operands = 0 : i64, tpu.core_type = #tpu.core_type<tc>, window_params = [{transform_indices = @transform_0, window_bounds = array<i64: 2>}, {transform_indices = @transform_1, window_bounds = array<i64: 1, 16, 16>}, {transform_indices = @transform_2, window_bounds = array<i64: 1, 16, 16>}, {transform_indices = @transform_3, window_bounds = array<i64: 1, 1, 1, 8>}]} {
    %c0 = arith.constant 0 : index
    %c0_0 = arith.constant 0 : index
    %c0_1 = arith.constant 0 : index
    %0 = vector.load %arg3[%c0, %c0_0, %c0_1] : memref<1x16x16xf32, #tpu.memory_space<vmem>>, vector<1x16x16xf32>
    %1 = vector.shape_cast %0 : vector<1x16x16xf32> to vector<16x16xf32>
    %c0_2 = arith.constant 0 : index
    %c0_3 = arith.constant 0 : index
    %c0_4 = arith.constant 0 : index
    %2 = vector.load %arg4[%c0_2, %c0_3, %c0_4] : memref<1x16x16xf32, #tpu.memory_space<vmem>>, vector<1x16x16xf32>
    %3 = vector.shape_cast %2 : vector<1x16x16xf32> to vector<16x16xf32>
    %c0_5 = arith.constant 0 : index
    %4 = memref.load %arg2[%c0_5] : memref<2xf32, #tpu.memory_space<smem>>
    %5 = vector.broadcast %4 : f32 to vector<16x16xf32>
    %6 = arith.cmpf oge, %1, %5 : vector<16x16xf32>
    %c1 = arith.constant 1 : index
    %7 = memref.load %arg2[%c1] : memref<2xf32, #tpu.memory_space<smem>>
    %8 = vector.broadcast %7 : f32 to vector<16x16xf32>
    %9 = arith.cmpf oge, %3, %8 : vector<16x16xf32>
    %10 = arith.extui %6 : vector<16x16xi1> to vector<16x16xi32>
    %11 = arith.sitofp %10 : vector<16x16xi32> to vector<16x16xf32>
    %12 = arith.extui %9 : vector<16x16xi1> to vector<16x16xi32>
    %13 = arith.sitofp %12 : vector<16x16xi32> to vector<16x16xf32>
    %14 = arith.mulf %1, %11 : vector<16x16xf32>
    %15 = vector.shape_cast %14 : vector<16x16xf32> to vector<1x16x16xf32>
    %cst = arith.constant dense<0.000000e+00> : vector<1xf32>
    %16 = vector.multi_reduction <add>, %15, %cst [1, 2] : vector<1x16x16xf32> to vector<1xf32>
    %17 = vector.shape_cast %16 : vector<1xf32> to vector<1x1x1xf32>
    %18 = vector.extract %17[0, 0, 0] : f32 from vector<1x1x1xf32>
    %19 = vector.shape_cast %11 : vector<16x16xf32> to vector<1x16x16xf32>
    %cst_6 = arith.constant dense<0.000000e+00> : vector<1xf32>
    %20 = vector.multi_reduction <add>, %19, %cst_6 [1, 2] : vector<1x16x16xf32> to vector<1xf32>
    %21 = vector.shape_cast %20 : vector<1xf32> to vector<1x1x1xf32>
    %22 = vector.extract %21[0, 0, 0] : f32 from vector<1x1x1xf32>
    %23 = arith.mulf %3, %13 : vector<16x16xf32>
    %24 = vector.shape_cast %23 : vector<16x16xf32> to vector<1x16x16xf32>
    %cst_7 = arith.constant dense<0.000000e+00> : vector<1xf32>
    %25 = vector.multi_reduction <add>, %24, %cst_7 [1, 2] : vector<1x16x16xf32> to vector<1xf32>
    %26 = vector.shape_cast %25 : vector<1xf32> to vector<1x1x1xf32>
    %27 = vector.extract %26[0, 0, 0] : f32 from vector<1x1x1xf32>
    %28 = vector.shape_cast %13 : vector<16x16xf32> to vector<1x16x16xf32>
    %cst_8 = arith.constant dense<0.000000e+00> : vector<1xf32>
    %29 = vector.multi_reduction <add>, %28, %cst_8 [1, 2] : vector<1x16x16xf32> to vector<1xf32>
    %30 = vector.shape_cast %29 : vector<1xf32> to vector<1x1x1xf32>
    %31 = vector.extract %30[0, 0, 0] : f32 from vector<1x1x1xf32>
    %32 = tpu.iota {dimensions = array<i32: 1>} : vector<1x8xi32>
    %c0_i32 = arith.constant 0 : i32
    %33 = vector.broadcast %c0_i32 : i32 to vector<1x8xi32>
    %34 = arith.cmpi eq, %32, %33 : vector<1x8xi32>
    %35 = arith.extui %34 : vector<1x8xi1> to vector<1x8xi32>
    %36 = arith.sitofp %35 : vector<1x8xi32> to vector<1x8xf32>
    %37 = vector.broadcast %18 : f32 to vector<1x8xf32>
    %38 = arith.mulf %37, %36 : vector<1x8xf32>
    %c1_i32 = arith.constant 1 : i32
    %39 = vector.broadcast %c1_i32 : i32 to vector<1x8xi32>
    %40 = arith.cmpi eq, %32, %39 : vector<1x8xi32>
    %41 = arith.extui %40 : vector<1x8xi1> to vector<1x8xi32>
    %42 = arith.sitofp %41 : vector<1x8xi32> to vector<1x8xf32>
    %43 = vector.broadcast %22 : f32 to vector<1x8xf32>
    %44 = arith.mulf %43, %42 : vector<1x8xf32>
    %45 = arith.addf %38, %44 : vector<1x8xf32>
    %c2_i32 = arith.constant 2 : i32
    %46 = vector.broadcast %c2_i32 : i32 to vector<1x8xi32>
    %47 = arith.cmpi eq, %32, %46 : vector<1x8xi32>
    %48 = arith.extui %47 : vector<1x8xi1> to vector<1x8xi32>
    %49 = arith.sitofp %48 : vector<1x8xi32> to vector<1x8xf32>
    %50 = vector.broadcast %27 : f32 to vector<1x8xf32>
    %51 = arith.mulf %50, %49 : vector<1x8xf32>
    %52 = arith.addf %45, %51 : vector<1x8xf32>
    %c3_i32 = arith.constant 3 : i32
    %53 = vector.broadcast %c3_i32 : i32 to vector<1x8xi32>
    %54 = arith.cmpi eq, %32, %53 : vector<1x8xi32>
    %55 = arith.extui %54 : vector<1x8xi1> to vector<1x8xi32>
    %56 = arith.sitofp %55 : vector<1x8xi32> to vector<1x8xf32>
    %57 = vector.broadcast %31 : f32 to vector<1x8xf32>
    %58 = arith.mulf %57, %56 : vector<1x8xf32>
    %59 = arith.addf %52, %58 : vector<1x8xf32>
    %c0_9 = arith.constant 0 : index
    %c0_10 = arith.constant 0 : index
    %c0_11 = arith.constant 0 : index
    %c0_12 = arith.constant 0 : index
    %60 = vector.load %arg5[%c0_9, %c0_10, %c0_11, %c0_12] : memref<1x1x1x8xf32, #tpu.memory_space<vmem>>, vector<1x1x1x8xf32>
    %61 = vector.shape_cast %60 : vector<1x1x1x8xf32> to vector<1x8xf32>
    %62 = vector.shape_cast %59 : vector<1x8xf32> to vector<1x1x1x8xf32>
    tpu.vector_store %arg5[%c0_9, %c0_10, %c0_11, %c0_12], %62 {strides = array<i32>} : memref<1x1x1x8xf32, #tpu.memory_space<vmem>>, vector<1x1x1x8xf32>,
    return
  }
  func.func @transform_0(%arg0: i32, %arg1: i32) -> i32 {
    %c0_i32 = arith.constant 0 : i32
    %c0_i32_0 = arith.constant 0 : i32
    return %c0_i32 : i32
  }
  func.func @transform_1(%arg0: i32, %arg1: i32) -> (i32, i32, i32) {
    %c0_i32 = arith.constant 0 : i32
    %c0_i32_0 = arith.constant 0 : i32
    return %arg0, %arg1, %c0_i32 : i32, i32, i32
  }
  func.func @transform_2(%arg0: i32, %arg1: i32) -> (i32, i32, i32) {
    %c0_i32 = arith.constant 0 : i32
    %c0_i32_0 = arith.constant 0 : i32
    return %arg0, %arg1, %c0_i32 : i32, i32, i32
  }
  func.func @transform_3(%arg0: i32, %arg1: i32) -> (i32, i32, i32, i32) {
    %c0_i32 = arith.constant 0 : i32
    %c0_i32_0 = arith.constant 0 : i32
    %c0_i32_1 = arith.constant 0 : i32
    return %arg0, %arg1, %c0_i32, %c0_i32_0 : i32, i32, i32, i32
  }
}

</mosaic_0001>

<bundles_post_ra>
// kernel: ohem_with_aux.3
= control target key start
LH: loop header
LB: loop body
LE: loop exit
PB: predicated region body
PF: predicated region fallthrough
CT: control target
= control target key end

     0   :  { %8 = vsyncpa [#allocation3], 0  ;;  %s588_s12 = smov 0   ;;  %s590_s13 = smov 0   ;;  %s670_s0 = inlined_call_operand.vmem [shape: f32[2], index: 0, kind: input, shape index: {}]   ;;  %s671_s1 = inlined_call_operand.vmem [shape: f32[2,16,16], index: 1, kind: input, shape index: {}]   ;;  %s672_s2 = inlined_call_operand.vmem [shape: f32[2,16,16], index: 2, kind: input, shape index: {}]   ;;  %s673_s3 = inlined_call_operand.vmem [shape: f32[2,1,1,8], index: 3, kind: output, shape index: {}]  }
   0x1   :  { %s592_s14 = smov 0  }
   0x2 LB: > { %s455_s15 = sadd.s32 4294967295, %s564_s14   ;;  %s26_s16 = sadd.s32 1, %s560_s13  ;;  %s564_s14 = sphi %s592_s14, %s14_s14   ;;  %s560_s13 = sphi %s590_s13, %s677_s13   ;;  %s556_s12 = sphi %s588_s12, %s676_s12  }
   0x3   : > { %p28_p0 = scmp.ge.s32.totalorder %s26_s16, 2  ;;  %p457_p1 = scmp.ge.s32.totalorder %s564_s14, 1 }
   0x4   : > { %p136_p2 = scmp.lt.s32.totalorder %s564_s14, 3  ;;  %p613_p4 = scmp.eq.s32.totalorder %s455_s15, 0 }
   0x5   : > { %s679_s16 = smov (%p28_p0, %s26_s16), 0  ;;  %s149_s21 = sshll.u32 %s670_s0, 4  ;;  %s150_s21 = int_to_ptr.vmem [resolvable:$true] %s149_s21 }
   0x6   : > { %p609_p3 = pnand %p457_p1, %p136_p2  ;;  %s523_s22 = scalar_lea.vmem %s150_s21, 16 }
   0x7   : > { %p524_p7 = scmp.ne.s32.totalorder %s150_s21, %s523_s22  ;;  %p531_p11 = scmp.lt.s32.totalorder %s150_s21, %s150_s21 }
   0x8   : > { %p491_p5 = pneg %p609_p3  ;;  %p532_p12 = scmp.lt.s32.totalorder %s523_s22, %s523_s22 }
   0xa   : > { %p492_p6 = pnand %p613_p4, %p491_p5  ;;  %p533_p13 = por %p532_p12, %p531_p11 }
   0xc   : > { %p525_p8 = pneg %p492_p6 }
   0xe   : > { %p526_p9 = pnand %p525_p8, %p524_p7 }
  0x10   : > { %p527_p10 = pneg %p526_p9 }
  0x12   : > { %p534_p0 = pnand %p533_p13, %p527_p10 }
  0x14   : > { %537 = shalt.err (!%p534_p0)
}
  0x15   : > { %s566_s23 = smov [#allocation2]   ;;  %188 = sbr.rel (%p609_p3) target bundleno = 258 (0x102), region = 32 }
  0x16   : > { %494 = dma.vmem_to_smem (!%p492_p6), %s150_s21, 16, %s566_s23, [#allocation3]  }
  0x1a   : > { %551 = dma.done.wait (%p613_p4), [#allocation3], 16  }
  0x1b   : > { %553 = vsyncadd (%p613_p4), [#allocation3], 4294967280 }
  0x1c   : > { %194 = sfence }
  0x1d   : > { %p228_p1 = scmp.lt.s32.totalorder %s556_s12, 1  ;;  %s466_s24 = sld [smem:[#allocation2 + $0x1]]  ;;  %vm275_vm2 = vcmask 130048   ;;  %v567_v6 = vmov 0.0   ;;  %v326_v55 = vlaneseq  ;;  %vm351_vm9 = vcmask 57344  }
  0x1e   : > { %s257_s25 = sld [smem:[#allocation2]] }
  0x1f   : > { %s681_s12 = smov (!%p228_p1, %s556_s12), 1  ;;  %v327_v56 = vand.u32 127, %v326_v55 }
  0x20   : > { %s477_s26 = sshll.u32 %s681_s12, 4  ;;  %s252_s15 = scalar_lea.vmem %s673_s3, %s681_s12 }
  0x21   : > { %s245_s29 = scalar_lea.vmem %s672_s2, %s477_s26  ;;  %s235_s5 = scalar_lea.vmem %s671_s1, %s477_s26  ;;  %vm328_vm5 = vcmp.eq.s32.totalorder %v327_v56, 0  ;;  %vm333_vm6 = vcmp.eq.s32.totalorder %v327_v56, 1  ;;  %vm339_vm7 = vcmp.eq.s32.totalorder %v327_v56, 2  ;;  %vm345_vm8 = vcmp.eq.s32.totalorder %v327_v56, 3 }
  0x22   : > { %v255_v0 = vld [vmem:[%s245_s29] sm:$0xff]  ;;  %v256_v1 = vld [vmem:[%s245_s29 + $0x8] sm:$0xff]  ;;  %v471_v57 = vsel %vm328_vm5, 1.0, %v567_v6  ;;  %v472_v59 = vsel %vm333_vm6, 1.0, %v567_v6  ;;  %v473_v61 = vsel %vm339_vm7, 1.0, %v567_v6 }
  0x23   : > { %v262_v2 = vstv %s466_s24  ;;  %v253_v3 = vld [vmem:[%s235_s5] sm:$0xff]  ;;  %v254_v4 = vld [vmem:[%s235_s5 + $0x8] sm:$0xff] }
  0x24   : > { %vm263_vm0 = vcmp.ge.f32.partialorder %v255_v0, %v262_v2  ;;  %vm264_vm1 = vcmp.ge.f32.partialorder %v256_v1, %v262_v2  ;;  %v258_v5 = vstv %s257_s25 }
  0x25   : > { %v469_v7 = vsel %vm263_vm0, 1.0, %v567_v6  ;;  %v470_v8 = vsel %vm264_vm1, 1.0, %v567_v6  ;;  %vm259_vm3 = vcmp.ge.f32.partialorder %v253_v3, %v258_v5  ;;  %vm260_vm4 = vcmp.ge.f32.partialorder %v254_v4, %v258_v5 }
  0x26   : > { %v300_v9 = vmul.f32 %v469_v7, %v255_v0  ;;  %v301_v10 = vmul.f32 %v470_v8, %v256_v1  ;;  %v467_v11 = vsel %vm259_vm3, 1.0, %v567_v6  ;;  %v468_v12 = vsel %vm260_vm4, 1.0, %v567_v6 }
  0x27   : > { %v273_v13 = vmul.f32 %v467_v11, %v253_v3  ;;  %v274_v14 = vmul.f32 %v468_v12, %v254_v4  ;;  %v314_v15 = vsel %vm275_vm2, %v469_v7, 0.0  ;;  %v315_v18 = vsel %vm275_vm2, %v470_v8, 0.0 }
  0x28   : > { %v302_v16 = vsel %vm275_vm2, %v300_v9, 0.0  ;;  %v303_v17 = vsel %vm275_vm2, %v301_v10, 0.0  ;;  %v288_v19 = vsel %vm275_vm2, %v467_v11, 0.0  ;;  %v289_v23 = vsel %vm275_vm2, %v468_v12, 0.0 }
  0x29   : > { %v304_v20 = vadd.f32 %v303_v17, %v302_v16  ;;  %v276_v21 = vsel %vm275_vm2, %v273_v13, 0.0  ;;  %v277_v22 = vsel %vm275_vm2, %v274_v14, 0.0  ;;  %v316_v25 = vadd.f32 %v315_v18, %v314_v15 }
  0x2a   : > { %v278_v24 = vadd.f32 %v277_v22, %v276_v21  ;;  %v290_v26 = vadd.f32 %v289_v23, %v288_v19  ;;  %v474_v1 = vsel %vm345_vm8, 1.0, %v567_v6 }
  0x2b   : > { %305 = vadd.xlane.f32.xlu1 %v304_v20 }
  0x2c   : > { %279 = vadd.xlane.f32.xlu0 %v278_v24 }
  0x2f   : > { %317 = vadd.xlane.f32.xlu1 %v316_v25 }
  0x30   : > { %291 = vadd.xlane.f32.xlu0 %v290_v26 }
  0xb4   : > { %v306_v27 = vpop.xlane.xlu1 %305 }
  0xb5   : > { %v307_v28 = vrot.slane %v306_v27, 4  ;;  %v280_v29 = vpop.xlane.xlu0 %279 }
  0xb6   : > { %v281_v30 = vrot.slane %v280_v29, 4 }
  0xb7   : > { %v308_v31 = vadd.f32 %v307_v28, %v306_v27 }
  0xb8   : > { %v282_v32 = vadd.f32 %v281_v30, %v280_v29  ;;  %v318_v33 = vpop.xlane.xlu1 %317 }
  0xb9   : > { %v309_v34 = vrot.slane %v308_v31, 2  ;;  %v319_v35 = vrot.slane %v318_v33, 4  ;;  %v292_v36 = vpop.xlane.xlu0 %291 }
  0xba   : > { %v283_v37 = vrot.slane %v282_v32, 2  ;;  %v293_v38 = vrot.slane %v292_v36, 4 }
  0xbb   : > { %v320_v39 = vadd.f32 %v319_v35, %v318_v33  ;;  %v310_v43 = vadd.f32 %v309_v34, %v308_v31 }
  0xbc   : > { %v294_v40 = vadd.f32 %v293_v38, %v292_v36  ;;  %v284_v41 = vadd.f32 %v283_v37, %v282_v32 }
  0xbd   : > { %v321_v42 = vrot.slane %v320_v39, 2  ;;  %v311_v49 = vrot.slane %v310_v43, 1 }
  0xbe   : > { %v295_v44 = vrot.slane %v294_v40, 2  ;;  %v285_v45 = vrot.slane %v284_v41, 1 }
  0xbf   : > { %v322_v46 = vadd.f32 %v321_v42, %v320_v39  ;;  %v312_v54 = vadd.f32 %v311_v49, %v310_v43 }
  0xc0   : > { %v296_v47 = vadd.f32 %v295_v44, %v294_v40  ;;  %v286_v48 = vadd.f32 %v285_v45, %v284_v41 }
  0xc1   : > { %v323_v50 = vrot.slane %v322_v46, 1 }
  0xc2   : > { %479 = vpush %v286_v48  ;;  %v297_v51 = vrot.slane %v296_v47, 1 }
  0xc3   : > { %v324_v53 = vadd.f32 %v323_v50, %v322_v46 }
  0xc4   : > { %v298_v52 = vadd.f32 %v297_v51, %v296_v47 }
  0xc6   : > { %481 = vpush %v298_v52 }
  0xc7   : > { %483 = vpush %v312_v54 }
  0xc8   : > { %485 = vpush %v324_v53 }
  0xf3   : > { %s480_s6 = spop %479 }
  0xf4   : > { %v331_v58 = vstv %s480_s6 }
  0xf5   : > { %v332_v62 = vmul.f32 %v471_v57, %v331_v58 }
  0xf7   : > { %s482_s7 = spop %481 }
  0xf8   : > { %v336_v60 = vstv %s482_s7  ;;  %s484_s8 = spop %483 }
  0xf9   : > { %v337_v63 = vmul.f32 %v472_v59, %v336_v60  ;;  %v342_v0 = vstv %s484_s8  ;;  %s486_s9 = spop %485 }
  0xfa   : > { %v348_v2 = vstv %s486_s9  ;;  %v343_v4 = vmul.f32 %v473_v61, %v342_v0 }
  0xfb   : > { %v338_v3 = vadd.f32 %v337_v63, %v332_v62  ;;  %v349_v7 = vmul.f32 %v474_v1, %v348_v2 }
  0xfd   : > { %v344_v5 = vadd.f32 %v343_v4, %v338_v3 }
  0xff   : > { %v350_v8 = vadd.f32 %v349_v7, %v344_v5 }
 0x101   : > { %352 = vst.msk [vmem:[%s252_s15] sm:$0x1] %vm351_vm9, %v350_v8 }
 0x102 PF: > { %s14_s14 = sadd.s32 1, %s564_s14   ;;  %s676_s12 = smov %s560_s13 }
 0x103   : > { %p11_p2 = scmp.ge.s32.totalorder %s14_s14, 4   ;;  %s677_s13 = smov %s679_s16 }
 0x105   :  { %13 = sbr.rel (!%p11_p2) target bundleno = 2 (0x2), region = 70 }
 0x10a   :  { %376 = vsyncpa [#allocation3], 1 }
 0x10b   :  { %378 = vsyncpa [#allocation3 + $0x1], 1 }

// kernel: ohem_with_aux.2
= control target key start
LH: loop header
LB: loop body
LE: loop exit
PB: predicated region body
PF: predicated region fallthrough
CT: control target
= control target key end

     0   :  { %s4300_s0 = inlined_call_operand.hbm [shape: f32[2,8,16,16], index: 0, kind: input, shape index: {}]   ;;  %s4301_s1 = inlined_call_operand.hbm [shape: f32[2,8,16,16], index: 1, kind: input, shape index: {}]   ;;  %s4302_s2 = inlined_call_operand.hbm [shape: s32[2,16,16], index: 2, kind: input, shape index: {}]   ;;  %s4303_s3 = inlined_call_operand.vmem [shape: f32[2,16,16], index: 3, kind: output, shape index: {0}]   ;;  %s4304_s4 = inlined_call_operand.vmem [shape: f32[2,16,16], index: 4, kind: output, shape index: {1}]   ;;  %s4305_s5 = inlined_call_operand.vmem [shape: f32[2,1,2,128], index: 5, kind: output, shape index: {2}]  }
   0x1   :  { %4315 = sst [smem:[#allocation15_spill]] %s4300_s0 }
   0x2   :  { %4316 = sst [smem:[#allocation16_spill]] %s4301_s1 }
   0x3   :  { %11 = vsyncpa [#allocation3], 0 }
   0x4   :  { %13 = vsyncpa [#allocation3 + $0x1], 0 }
   0x5   :  { %14 = vsyncpa [#allocation5], 0 }
   0x6   :  { %16 = vsyncpa [#allocation5 + $0x1], 0  ;;  %s3045_s18 = smov 0   ;;  %s3047_s19 = smov 0  }
   0x7   :  { %s3049_s20 = smov 0   ;;  %s3051_s21 = smov 0  }
   0x8   :  { %s3053_s22 = smov 0   ;;  %s3055_s23 = smov 0  }
   0x9 LB: > { %s4306_s24 = sadd.s32 4294967295, %s3007_s23   ;;  %s34_s25 = sadd.s32 1, %s3003_s22  ;;  %s3007_s23 = sphi %s3055_s23, %s22_s23   ;;  %s3003_s22 = sphi %s3053_s22, %s4340_s22   ;;  %s2999_s21 = sphi %s3051_s21, %s4339_s21   ;;  %s2995_s20 = sphi %s3049_s20, %s4338_s20   ;;  %s2991_s19 = sphi %s3047_s19, %s4337_s19   ;;  %s2987_s18 = sphi %s3045_s18, %s4336_s18  }
   0xa   : > { %p36_p0 = scmp.ge.s32.totalorder %s34_s25, 2  ;;  %s43_s26 = sadd.s32 1, %s2995_s20 }
   0xb   : > { %p50_p1 = scmp.ne.s32.totalorder %s2995_s20, %s2991_s19  ;;  %p51_p2 = scmp.eq.s32.totalorder %s3007_s23, 0 }
   0xc   : > { %s4342_s25 = smov (%p36_p0, %s34_s25), 0  ;;  %p56_p4 = scmp.ne.s32.totalorder %s2991_s19, %s2987_s18 }
   0xd   : > { %p52_p3 = por %p51_p2, %p50_p1  ;;  %s38_s27 = ssub.s32 %s3003_s22, %s4342_s25 }
   0xe   : > { %p57_p5 = scmp.eq.s32.totalorder %s4306_s24, 0  ;;  %p41_p6 = scmp.eq.s32.totalorder %s38_s27, 0 }
   0xf   : > { %p2745_p8 = scmp.lt.s32.totalorder %s3007_s23, 2  ;;  %s3095_s30 = sand.u32 1, %s2995_s20  }
  0x10   : > { %p3086_p7 = por %p57_p5, %p56_p4  ;;  %s2594_s6 = sshll.u32 %s3003_s22, 11 }
  0x11   : > { %s3092_s29 = scalar_select %p41_p6, %s2995_s20, %s43_s26  }
  0x12   : > { %s2383_s7 = sshll.u32 %s3095_s30, 7  ;;  %p3099_p9 = pnand %p2745_p8, %p52_p3 }
  0x13   : > { %s243_s9 = sand.u32 1, %s3007_s23   ;;  %s4319_s1 = sld [smem:[#allocation16_spill]] }
  0x14   : > { %s247_s13 = scalar_lea.vmem [#allocation4], %s2383_s7  ;;  %p2392_p10 = scmp.ge.s32.totalorder %s3007_s23, 1 }
  0x15   : > { %s256_s14 = sshll.u32 %s247_s13, 4  ;;  %s3112_s15 = scalar_lea.sflag [#allocation5], %s243_s9  ;;  %s257_s14 = int_to_ptr.vmem [resolvable:$true] %s256_s14 }
  0x16   : > { %p2871_p11 = pneg %p3099_p9  ;;  %s2882_s16 = scalar_lea.vmem %s257_s14, 2048 }
  0x17   : > { %p2883_p12 = scmp.ne.s32.totalorder %s257_s14, %s2882_s16  ;;  %s3009_s17 = smov [#allocation4]  }
  0x18   : > { %s2887_s18 = sshll.u32 %s3009_s17, 4  ;;  %s2888_s18 = int_to_ptr.vmem [resolvable:$false] %s2887_s18 }
  0x19   : > { %s255_s12 = scalar_lea.hbm %s4319_s1, %s2594_s6  ;;  %p2885_p13 = pnand %p2883_p12, %p2871_p11 }
  0x1a   : > { %s2889_s26 = scalar_lea.vmem %s2888_s18, 4096  ;;  %p2890_p1 = scmp.lt.s32.totalorder %s257_s14, %s2888_s18 }
  0x1b   : > { %p2886_p0 = pneg %p2885_p13  ;;  %p2891_p2 = scmp.lt.s32.totalorder %s2889_s26, %s2882_s16 }
  0x1d   : > { %p2892_p3 = por %p2891_p2, %p2890_p1 }
  0x1f   : > { %p2893_p4 = pnand %p2892_p3, %p2886_p0 }
  0x21   : > { %2896 = shalt.err (!%p2893_p4)
}
  0x22   : > { %s4307_s27 = smov 128   ;;  %s3011_s9 = smov 8  }
  0x23   : > { %2741 = dma.hbm_to_vmem [thread:$0]  (!%p3099_p9), %s255_s12, 2048, %s257_s14, %s3112_s15, %s4307_s27, %s4307_s27, %s3011_s9  }
  0x24   : > { %p287_p5 = scmp.lt.s32.totalorder %s3007_s23, 3  ;;  %s4321_s0 = sld [smem:[#allocation15_spill]] }
  0x25   : > { %s224_s17 = scalar_lea.vmem [#allocation2], %s2383_s7  ;;  %s2389_s26 = sshll.u32 %s3095_s30, 4 }
  0x26   : > { %p3128_p6 = pnand %p2392_p10, %p287_p5  ;;  %s233_s18 = sshll.u32 %s224_s17, 4  ;;  %s234_s18 = int_to_ptr.vmem [resolvable:$true] %s233_s18 }
  0x27   : > { %s221_s24 = scalar_lea.sflag [#allocation3], %s3095_s30  ;;  %s2910_s1 = scalar_lea.vmem %s234_s18, 2048 }
  0x28   : > { %p2911_p8 = scmp.ne.s32.totalorder %s234_s18, %s2910_s1  ;;  %s3012_s12 = smov [#allocation2]  }
  0x29   : > { %s2915_s14 = sshll.u32 %s3012_s12, 4  ;;  %s2916_s14 = int_to_ptr.vmem [resolvable:$false] %s2915_s14 }
  0x2a   : > { %s232_s16 = scalar_lea.hbm %s4321_s0, %s2594_s6  ;;  %p2913_p12 = pnand %p2911_p8, %p2871_p11 }
  0x2b   : > { %s2917_s27 = scalar_lea.vmem %s2916_s14, 4096  ;;  %p2918_p13 = scmp.lt.s32.totalorder %s234_s18, %s2916_s14 }
  0x2c   : > { %p2914_p10 = pneg %p2913_p12  ;;  %p2919_p0 = scmp.lt.s32.totalorder %s2917_s27, %s2910_s1 }
  0x2e   : > { %p2920_p1 = por %p2919_p0, %p2918_p13 }
  0x30   : > { %p2921_p2 = pnand %p2920_p1, %p2914_p10 }
  0x32   : > { %2924 = shalt.err (!%p2921_p2)
}
  0x33   : > { %s4322_s6 = smov 128   ;;  %s2596_s30 = sshll.u32 %s3003_s22, 8 }
  0x34   : > { %2738 = dma.hbm_to_vmem [thread:$0]  (!%p3099_p9), %s232_s16, 2048, %s234_s18, %s221_s24, %s4322_s6, %s4322_s6, %s3011_s9  }
  0x35   : > { %s278_s13 = scalar_lea.hbm %s4302_s2, %s2596_s30  ;;  %s270_s17 = scalar_lea.vmem [#allocation6], %s2389_s26 }
  0x36   : > { %s279_s12 = sshll.u32 %s270_s17, 4  ;;  %s3013_s27 = smov [#allocation6]   ;;  %s280_s12 = int_to_ptr.vmem [resolvable:$true] %s279_s12 }
  0x37   : > { %s2938_s1 = scalar_lea.vmem %s280_s12, 256  ;;  %s2943_s14 = sshll.u32 %s3013_s27, 4  ;;  %s2944_s14 = int_to_ptr.vmem [resolvable:$false] %s2943_s14 }
  0x38   : > { %p2939_p3 = scmp.ne.s32.totalorder %s280_s12, %s2938_s1  ;;  %s2945_s0 = scalar_lea.vmem %s2944_s14, 512 }
  0x39   : > { %p2946_p8 = scmp.lt.s32.totalorder %s280_s12, %s2944_s14  ;;  %p2947_p12 = scmp.lt.s32.totalorder %s2945_s0, %s2938_s1 }
  0x3a   : > { %p2941_p4 = pnand %p2939_p3, %p2871_p11 }
  0x3b   : > { %p2948_p10 = por %p2947_p12, %p2946_p8 }
  0x3c   : > { %p2942_p5 = pneg %p2941_p4 }
  0x3e   : > { %p2949_p13 = pnand %p2948_p10, %p2942_p5 }
  0x40   : > { %2952 = shalt.err (!%p2949_p13)
}
  0x41   : > { %2744 = dma.hbm_to_vmem [thread:$0]  (!%p3099_p9), %s278_s13, 256, %s280_s12, %s3112_s15, %s4322_s6, %s4322_s6, %s3011_s9  }
  0x42   : > { %291 = sbr.rel (%p3128_p6) target bundleno = 499 (0x1f3), region = 32 }
  0x47   : > { %s293_s24 = sand.u32 1, %s2991_s19  }
  0x48   : > { %s2393_s16 = sshll.u32 %s293_s24, 7  ;;  %s294_s18 = scalar_lea.sflag [#allocation3], %s293_s24 }
  0x49   : > { %s3165_s26 = scalar_lea.vmem [#allocation2], %s2393_s16 }
  0x4a   : > { %2978 = dma.done.wait (%p3086_p7), %s294_s18, 2048  }
  0x4b   : > { %2980 = vsyncadd (%p3086_p7), %s294_s18, 4294965248  ;;  %s4323_s0 = sadd.s32 4294967295, %s3007_s23   ;;  %s3173_s9 = scalar_lea.vmem [#allocation4], %s2393_s16 }
  0x4c   : > { %s302_s8 = sand.u32 1, %s4323_s0  }
  0x4d   : > { %s303_s15 = scalar_lea.sflag [#allocation5], %s302_s8 }
  0x4e   : > { %2982 = dma.done.wait (%p3086_p7), %s303_s15, 2304  }
  0x4f   : > { %2984 = vsyncadd (%p3086_p7), %s303_s15, 4294964992  ;;  %s2395_s10 = sshll.u32 %s293_s24, 4  ;;  %v408_v1 = vld [vmem:[%s3165_s26] sm:$0xff]  ;;  %v409_v2 = vld [vmem:[%s3165_s26 + $0x8] sm:$0xff]  ;;  %vm674_vm1 = vcmask 130048   ;;  %v3014_v12 = vmov 0.0  }
  0x50   : > { %s315_s6 = scalar_lea.vmem [#allocation6], %s2395_s10  ;;  %v2401_v3 = vld [vmem:[%s3165_s26 + $0x10] sm:$0xff]  ;;  %v2402_v4 = vld [vmem:[%s3165_s26 + $0x18] sm:$0xff]  ;;  %v2403_v8 = vld [vmem:[%s3165_s26 + $0x20] sm:$0xff]  ;;  %p376_p7 = scmp.lt.s32.totalorder %s2999_s21, 1 }
  0x51   : > { %v3179_v0 = vld [vmem:[%s315_s6] sm:$0xff]  ;;  %v3185_v5 = vld [vmem:[%s315_s6 + $0x8] sm:$0xff]  ;;  %v413_v6 = vmax.f32 %v408_v1, %v2401_v3  ;;  %v414_v7 = vmax.f32 %v409_v2, %v2402_v4 }
  0x52   : > { %vm404_vm0 = vcmp.ne.s32.totalorder %v3179_v0, 255  ;;  %v2404_v9 = vld [vmem:[%s3165_s26 + $0x28] sm:$0xff]  ;;  %v2405_v10 = vld [vmem:[%s3165_s26 + $0x30] sm:$0xff]  ;;  %v2406_v11 = vld [vmem:[%s3165_s26 + $0x38] sm:$0xff]  ;;  %vm405_vm2 = vcmp.ne.s32.totalorder %v3185_v5, 255  ;;  %s4344_s21 = smov (!%p376_p7, %s2999_s21), 1 }
  0x53   : > { %v2429_v13 = vsel %vm404_vm0, 1.0, %v3014_v12  ;;  %v418_v14 = vmax.f32 %v413_v6, %v2403_v8  ;;  %v419_v15 = vmax.f32 %v414_v7, %v2404_v9  ;;  %v2407_v16 = vld [vmem:[%s3165_s26 + $0x40] sm:$0xff]  ;;  %v2408_v17 = vld [vmem:[%s3165_s26 + $0x48] sm:$0xff]  ;;  %v3199_v18 = vld [vmem:[%s3165_s26 + $0x50] sm:$0xff]  ;;  %v2430_v24 = vsel %vm405_vm2, 1.0, %v3014_v12  ;;  %s2597_s28 = sshll.u32 %s4344_s21, 4 }
  0x54   : > { %v3202_v21 = vld [vmem:[%s3173_s9] sm:$0xff]  ;;  %v3205_v22 = vld [vmem:[%s3173_s9 + $0x8] sm:$0xff]  ;;  %v3208_v23 = vld [vmem:[%s3173_s9 + $0x10] sm:$0xff]  ;;  %v685_v25 = vsel %vm674_vm1, %v2429_v13, 0.0  ;;  %v686_v30 = vsel %vm674_vm1, %v2430_v24, 0.0  ;;  %v3241_v44 = vsel %vm405_vm2, %v3185_v5, 0  ;;  %s383_s11 = scalar_lea.vmem %s4303_s3, %s2597_s28  ;;  %s393_s12 = scalar_lea.vmem %s4304_s4, %s2597_s28 }
  0x55   : > { %v423_v19 = vmax.f32 %v418_v14, %v2405_v10  ;;  %v424_v20 = vmax.f32 %v419_v15, %v2406_v11  ;;  %v2410_v26 = vld [vmem:[%s3165_s26 + $0x58] sm:$0xff]  ;;  %v554_v28 = vmax.f32 %v3202_v21, %v3208_v23  ;;  %v3221_v29 = vld [vmem:[%s3173_s9 + $0x20] sm:$0xff]  ;;  %v687_v33 = vadd.f32 %v686_v30, %v685_v25  ;;  %v2412_v35 = vld [vmem:[%s3165_s26 + $0x68] sm:$0xff] }
  0x56   : > { %v3216_v27 = vld [vmem:[%s3173_s9 + $0x18] sm:$0xff]  ;;  %v2411_v34 = vld [vmem:[%s3165_s26 + $0x60] sm:$0xff]  ;;  %v3230_v39 = vld [vmem:[%s3173_s9 + $0x28] sm:$0xff]  ;;  %vm454_vm3 = vcmp.eq.s32.totalorder %v3241_v44, 0  ;;  %v3264_v60 = vsel %vm404_vm0, %v3179_v0, 0  ;;  %vm466_vm4 = vcmp.eq.s32.totalorder %v3241_v44, 1 }
  0x57   : > { %v428_v31 = vmax.f32 %v423_v19, %v2407_v16  ;;  %v429_v32 = vmax.f32 %v424_v20, %v2408_v17  ;;  %v555_v36 = vmax.f32 %v3205_v22, %v3216_v27  ;;  %v559_v40 = vmax.f32 %v554_v28, %v3221_v29  ;;  %688 = vadd.xlane.f32.xlu0 %v687_v33  ;;  %v2413_v41 = vld [vmem:[%s3165_s26 + $0x70] sm:$0xff]  ;;  %v2414_v42 = vld [vmem:[%s3165_s26 + $0x78] sm:$0xff]  ;;  %v3250_v52 = vld [vmem:[%s3173_s9 + $0x40] sm:$0xff] }
  0x58   : > { %v3236_v43 = vld [vmem:[%s3173_s9 + $0x30] sm:$0xff]  ;;  %v3245_v50 = vld [vmem:[%s3173_s9 + $0x38] sm:$0xff]  ;;  %vm453_vm5 = vcmp.eq.s32.totalorder %v3264_v60, 0  ;;  %v3302_v25 = vld [vmem:[%s3173_s9 + $0x60] sm:$0xff]  ;;  %vm478_vm6 = vcmp.eq.s32.totalorder %v3241_v44, 2  ;;  %vm465_vm7 = vcmp.eq.s32.totalorder %v3264_v60, 1 }
  0x59   : > { %v433_v37 = vmax.f32 %v428_v31, %v3199_v18  ;;  %v434_v38 = vmax.f32 %v429_v32, %v2410_v26  ;;  %v560_v47 = vmax.f32 %v555_v36, %v3230_v39  ;;  %v564_v51 = vmax.f32 %v559_v40, %v3236_v43  ;;  %v3278_v7 = vld [vmem:[%s3173_s9 + $0x50] sm:$0xff]  ;;  %v3314_v33 = vld [vmem:[%s3173_s9 + $0x68] sm:$0xff] }
  0x5a   : > { %v3321_v40 = vld [vmem:[%s3173_s9 + $0x70] sm:$0xff]  ;;  %vm490_vm8 = vcmp.eq.s32.totalorder %v3241_v44, 3  ;;  %vm502_vm9 = vcmp.eq.s32.totalorder %v3241_v44, 4  ;;  %vm514_vm10 = vcmp.eq.s32.totalorder %v3241_v44, 5  ;;  %vm526_vm11 = vcmp.eq.s32.totalorder %v3241_v44, 6 }
  0x5b   : > { %v438_v45 = vmax.f32 %v433_v37, %v2411_v34  ;;  %v439_v46 = vmax.f32 %v434_v38, %v2412_v35  ;;  %v565_v59 = vmax.f32 %v560_v47, %v3245_v50  ;;  %vm477_vm12 = vcmp.eq.s32.totalorder %v3264_v60, 2 }
  0x5c   : > { %vm538_vm13 = vcmp.eq.s32.totalorder %v3241_v44, 7  ;;  %vm489_vm14 = vcmp.eq.s32.totalorder %v3264_v60, 3  ;;  %vm501_vm15 = vcmp.eq.s32.totalorder %v3264_v60, 4 }
  0x5d   : > { %v443_v48 = vmax.f32 %v438_v45, %v2413_v41  ;;  %v444_v49 = vmax.f32 %v439_v46, %v2414_v42 }
  0x5f   : > { %v3252_v53 = vsub.f32 %v408_v1, %v443_v48  ;;  %v446_v54 = vsub.f32 %v409_v2, %v444_v49  ;;  %v3254_v55 = vsub.f32 %v2401_v3, %v443_v48  ;;  %v458_v56 = vsub.f32 %v2402_v4, %v444_v49  ;;  %v3270_v1 = vld [vmem:[%s3173_s9 + $0x48] sm:$0xff] }
  0x60   : > { %v3256_v57 = vsub.f32 %v2403_v8, %v443_v48  ;;  %v3258_v58 = vsub.f32 %v2404_v9, %v444_v49  ;;  %v3267_v63 = vsub.f32 %v2405_v10, %v443_v48  ;;  %v569_v2 = vmax.f32 %v564_v51, %v3250_v52 }
  0x61   : > { %v447_v61 = vmul.f32 1.442695, %v3252_v53  ;;  %v449_v62 = vmul.f32 1.442695, %v446_v54  ;;  %v459_v3 = vmul.f32 1.442695, %v3254_v55  ;;  %v3275_v6 = vsub.f32 %v2406_v11, %v444_v49 }
  0x62   : > { %v461_v4 = vmul.f32 1.442695, %v458_v56  ;;  %v471_v8 = vmul.f32 1.442695, %v3256_v57  ;;  %v3281_v9 = vsub.f32 %v2407_v16, %v443_v48  ;;  %v473_v10 = vmul.f32 1.442695, %v3258_v58 }
  0x63   : > { %2797 = vpow2.f32 %v447_v61  ;;  %v3285_v13 = vsub.f32 %v2408_v17, %v444_v49  ;;  %v570_v14 = vmax.f32 %v565_v59, %v3270_v1  ;;  %v483_v11 = vmul.f32 1.442695, %v3267_v63  ;;  %v3299_v17 = vld [vmem:[%s3173_s9 + $0x58] sm:$0xff] }
  0x64   : > { %2799 = vpow2.f32 %v449_v62  ;;  %v3290_v15 = vsub.f32 %v3199_v18, %v443_v48  ;;  %v574_v19 = vmax.f32 %v569_v2, %v3278_v7  ;;  %v456_v16 = vsel %vm454_vm3, %v446_v54, 0.0 }
  0x65   : > { %2801 = vpow2.f32 %v459_v3  ;;  %v485_v20 = vmul.f32 1.442695, %v3275_v6  ;;  %v3296_v24 = vsub.f32 %v2410_v26, %v444_v49  ;;  %v495_v18 = vmul.f32 1.442695, %v3281_v9 }
  0x66   : > { %2803 = vpow2.f32 %v461_v4  ;;  %v497_v28 = vmul.f32 1.442695, %v3285_v13  ;;  %v3306_v30 = vsub.f32 %v2411_v34, %v443_v48  ;;  %v507_v31 = vmul.f32 1.442695, %v3290_v15 }
  0x67   : > { %2805 = vpow2.f32 %v471_v8  ;;  %v3309_v32 = vsub.f32 %v2412_v35, %v444_v49  ;;  %v3311_v26 = vsub.f32 %v2413_v41, %v443_v48  ;;  %v3316_v36 = vsub.f32 %v2414_v42, %v444_v49  ;;  %v3330_v41 = vld [vmem:[%s3173_s9 + $0x78] sm:$0xff] }
  0x68   : > { %2807 = vpow2.f32 %v473_v10  ;;  %v575_v37 = vmax.f32 %v570_v14, %v3299_v17  ;;  %v579_v38 = vmax.f32 %v574_v19, %v3302_v25  ;;  %v3325_v34 = vsel %vm466_vm4, %v458_v56, %v456_v16 }
  0x69   : > { %2809 = vpow2.f32 %v483_v11  ;;  %v509_v35 = vmul.f32 1.442695, %v3296_v24  ;;  %v519_v42 = vmul.f32 1.442695, %v3306_v30  ;;  %v521_v45 = vmul.f32 1.442695, %v3309_v32 }
  0x6a   : > { %2811 = vpow2.f32 %v485_v20  ;;  %v580_v46 = vmax.f32 %v575_v37, %v3314_v33  ;;  %v531_v47 = vmul.f32 1.442695, %v3311_v26  ;;  %v3339_v48 = vmax.f32 %v579_v38, %v3321_v40 }
  0x6b   : > { %2813 = vpow2.f32 %v495_v18  ;;  %v455_v49 = vsel %vm453_vm5, %v3252_v53, 0.0  ;;  %v533_v51 = vmul.f32 1.442695, %v3316_v36 }
  0x6c   : > { %2815 = vpow2.f32 %v497_v28  ;;  %v3346_v54 = vmax.f32 %v580_v46, %v3330_v41  ;;  %v3351_v56 = vsel %vm465_vm7, %v3254_v55, %v455_v49  ;;  %v3355_v59 = vsub.f32 %v3202_v21, %v3339_v48 }
  0x6d   : > { %2817 = vpow2.f32 %v507_v31  ;;  %v3359_v61 = vsub.f32 %v3208_v23, %v3339_v48  ;;  %v3363_v53 = vsub.f32 %v3221_v29, %v3339_v48  ;;  %v3382_v11 = vsub.f32 %v3236_v43, %v3339_v48 }
  0x6e   : > { %2819 = vpow2.f32 %v509_v35  ;;  %v587_v55 = vsub.f32 %v3205_v22, %v3346_v54  ;;  %v597_v62 = vsub.f32 %v3216_v27, %v3346_v54  ;;  %v607_v21 = vsub.f32 %v3230_v39, %v3346_v54 }
  0x6f   : > { %2821 = vpow2.f32 %v519_v42  ;;  %v588_v23 = vmul.f32 1.442695, %v3355_v59  ;;  %v598_v3 = vmul.f32 1.442695, %v3359_v61  ;;  %v608_v29 = vmul.f32 1.442695, %v3363_v53 }
  0x70   : > { %v2798_v2 = vpop.eup %2797  ;;  %2823 = vpow2.f32 %v521_v45  ;;  %v590_v8 = vmul.f32 1.442695, %v587_v55  ;;  %v595_v22 = vsel %vm454_vm3, %v587_v55, 0.0  ;;  %v600_v27 = vmul.f32 1.442695, %v597_v62 }
  0x71   : > { %v2800_v4 = vpop.eup %2799  ;;  %2825 = vpow2.f32 %v531_v47  ;;  %v605_v39 = vsel %vm466_vm4, %v597_v62, %v595_v22  ;;  %v610_v14 = vmul.f32 1.442695, %v607_v21  ;;  %v617_v18 = vsub.f32 %v3245_v50, %v3346_v54 }
  0x72   : > { %v2802_v10 = vpop.eup %2801  ;;  %2827 = vpow2.f32 %v533_v51  ;;  %v615_v20 = vsel %vm478_vm6, %v607_v21, %v605_v39  ;;  %v618_v37 = vmul.f32 1.442695, %v3382_v11  ;;  %v3392_v43 = vsub.f32 %v3250_v52, %v3339_v48 }
  0x73   : > { %v2804_v19 = vpop.eup %2803  ;;  %v463_v16 = vadd.f32 %v2802_v10, %v2798_v2  ;;  %2829 = vpow2.f32 %v588_v23  ;;  %v620_v42 = vmul.f32 1.442695, %v617_v18  ;;  %v625_v50 = vsel %vm490_vm8, %v617_v18, %v615_v20 }
  0x74   : > { %v2806_v28 = vpop.eup %2805  ;;  %v464_v31 = vadd.f32 %v2804_v19, %v2800_v4  ;;  %2831 = vpow2.f32 %v590_v8  ;;  %v627_v47 = vsub.f32 %v3270_v1, %v3346_v54  ;;  %v628_v52 = vmul.f32 1.442695, %v3392_v43 }
  0x75   : > { %v2808_v38 = vpop.eup %2807  ;;  %v475_v35 = vadd.f32 %v2806_v28, %v463_v16  ;;  %2833 = vpow2.f32 %v598_v3  ;;  %v3403_v55 = vsub.f32 %v3278_v7, %v3339_v48  ;;  %v637_v62 = vsub.f32 %v3299_v17, %v3346_v54 }
  0x76   : > { %v2810_v45 = vpop.eup %2809  ;;  %v476_v46 = vadd.f32 %v2808_v38, %v464_v31  ;;  %2835 = vpow2.f32 %v600_v27  ;;  %v630_v23 = vmul.f32 1.442695, %v627_v47  ;;  %v635_v1 = vsel %vm502_vm9, %v627_v47, %v625_v50 }
  0x77   : > { %v2812_v49 = vpop.eup %2811  ;;  %v487_v51 = vadd.f32 %v2810_v45, %v475_v35  ;;  %2837 = vpow2.f32 %v608_v29  ;;  %v638_v29 = vmul.f32 1.442695, %v3403_v55  ;;  %v640_v8 = vmul.f32 1.442695, %v637_v62 }
  0x78   : > { %v2814_v21 = vpop.eup %2813  ;;  %v488_v2 = vadd.f32 %v2812_v49, %v476_v46  ;;  %2839 = vpow2.f32 %v610_v14  ;;  %v645_v17 = vsel %vm514_vm10, %v637_v62, %v635_v1  ;;  %v646_v27 = vsub.f32 %v3302_v25, %v3339_v48 }
  0x79   : > { %v2816_v3 = vpop.eup %2815  ;;  %v499_v4 = vadd.f32 %v2814_v21, %v487_v51  ;;  %2841 = vpow2.f32 %v618_v37  ;;  %v647_v14 = vsub.f32 %v3314_v33, %v3346_v54  ;;  %v656_v19 = vsub.f32 %v3321_v40, %v3339_v48 }
  0x7a   : > { %v2818_v7 = vpop.eup %2817  ;;  %v500_v22 = vadd.f32 %v2816_v3, %v488_v2  ;;  %2843 = vpow2.f32 %v620_v42  ;;  %v648_v18 = vmul.f32 1.442695, %v646_v27  ;;  %v657_v28 = vsub.f32 %v3330_v41, %v3346_v54 }
  0x7b   : > { %v2820_v10 = vpop.eup %2819  ;;  %v511_v39 = vadd.f32 %v2818_v7, %v499_v4  ;;  %2845 = vpow2.f32 %v628_v52  ;;  %v650_v25 = vmul.f32 1.442695, %v647_v14  ;;  %v655_v38 = vsel %vm526_vm11, %v647_v14, %v645_v17 }
  0x7c   : > { %v2822_v16 = vpop.eup %2821  ;;  %v512_v20 = vadd.f32 %v2820_v10, %v500_v22  ;;  %2847 = vpow2.f32 %v630_v23  ;;  %v480_v33 = vsel %vm478_vm6, %v3258_v58, %v3325_v34  ;;  %v658_v48 = vmul.f32 1.442695, %v656_v19 }
  0x7d   : > { %v2824_v31 = vpop.eup %2823  ;;  %v523_v37 = vadd.f32 %v2822_v16, %v511_v39  ;;  %2849 = vpow2.f32 %v638_v29  ;;  %v3429_v41 = vsel %vm538_vm13, %v657_v28, %v655_v38  ;;  %v479_v54 = vsel %vm477_vm12, %v3256_v57, %v3351_v56 }
  0x7e   : > { %v2826_v35 = vpop.eup %2825  ;;  %v524_v40 = vadd.f32 %v2824_v31, %v512_v20  ;;  %2851 = vpow2.f32 %v640_v8  ;;  %v660_v47 = vmul.f32 1.442695, %v657_v28  ;;  %v594_v58 = vsel %vm453_vm5, %v3355_v59, 0.0 }
  0x7f   : > { %v2828_v42 = vpop.eup %2827  ;;  %v535_v50 = vadd.f32 %v2826_v35, %v523_v37  ;;  %2853 = vpow2.f32 %v648_v18  ;;  %v604_v52 = vsel %vm465_vm7, %v3359_v61, %v594_v58  ;;  %v491_v57 = vsel %vm489_vm14, %v3267_v63, %v479_v54 }
  0x80   : > { %v2830_v45 = vpop.eup %2829  ;;  %v536_v46 = vadd.f32 %v2828_v42, %v524_v40  ;;  %2855 = vpow2.f32 %v650_v25  ;;  %v614_v56 = vsel %vm477_vm12, %v3363_v53, %v604_v52  ;;  %v492_v59 = vsel %vm490_vm8, %v3275_v6, %v480_v33 }
  0x81   : > { %v2832_v34 = vpop.eup %2831  ;;  %2857 = vlog2.f32 %v535_v50  ;;  %v624_v61 = vsel %vm489_vm14, %v3382_v11, %v614_v56  ;;  %vm513_vm3 = vcmp.eq.s32.totalorder %v3264_v60, 5  ;;  %v503_v1 = vsel %vm501_vm15, %v3281_v9, %v491_v57 }
  0x82   : > { %v2834_v49 = vpop.eup %2833  ;;  %2859 = vlog2.f32 %v536_v46  ;;  %v634_v63 = vsel %vm501_vm15, %v3392_v43, %v624_v61  ;;  %vm525_vm4 = vcmp.eq.s32.totalorder %v3264_v60, 6  ;;  %v504_v11 = vsel %vm502_vm9, %v3285_v13, %v492_v59 }
  0x83   : > { %v2836_v51 = vpop.eup %2835  ;;  %v602_v62 = vadd.f32 %v2834_v49, %v2830_v45  ;;  %2861 = vpow2.f32 %v658_v48  ;;  %v644_v6 = vsel %vm513_vm3, %v3403_v55, %v634_v63  ;;  %vm537_vm5 = vcmp.eq.s32.totalorder %v3264_v60, 7 }
  0x84   : > { %v2838_v21 = vpop.eup %2837  ;;  %v603_v2 = vadd.f32 %v2836_v51, %v2832_v34  ;;  %2863 = vpow2.f32 %v660_v47  ;;  %v654_v43 = vsel %vm525_vm4, %v646_v27, %v644_v6  ;;  %v515_v55 = vsel %vm513_vm3, %v3290_v15, %v503_v1 }
  0x85   : > { %v2840_v23 = vpop.eup %2839  ;;  %v612_v53 = vadd.f32 %v2838_v21, %v602_v62  ;;  %v3469_v9 = vsel %vm537_vm5, %v656_v19, %v654_v43  ;;  %v516_v13 = vsel %vm514_vm10, %v3296_v24, %v504_v11  ;;  %v527_v19 = vsel %vm525_vm4, %v3306_v30, %v515_v55 }
  0x86   : > { %v2842_v3 = vpop.eup %2841  ;;  %v613_v4 = vadd.f32 %v2840_v23, %v603_v2  ;;  %v528_v18 = vsel %vm526_vm11, %v3309_v32, %v516_v13  ;;  %v539_v24 = vsel %vm537_vm5, %v3311_v26, %v527_v19 }
  0x87   : > { %v2844_v29 = vpop.eup %2843  ;;  %v622_v8 = vadd.f32 %v2842_v3, %v612_v53  ;;  %v540_v35 = vsel %vm538_vm13, %v3316_v36, %v528_v18 }
  0x88   : > { %v2846_v7 = vpop.eup %2845  ;;  %v623_v22 = vadd.f32 %v2844_v29, %v613_v4 }
  0x89   : > { %v2848_v17 = vpop.eup %2847  ;;  %v632_v10 = vadd.f32 %v2846_v7, %v622_v8 }
  0x8a   : > { %v2850_v39 = vpop.eup %2849  ;;  %v633_v27 = vadd.f32 %v2848_v17, %v623_v22 }
  0x8b   : > { %v2852_v14 = vpop.eup %2851  ;;  %v642_v16 = vadd.f32 %v2850_v39, %v632_v10 }
  0x8c   : > { %v2854_v20 = vpop.eup %2853  ;;  %v643_v15 = vadd.f32 %v2852_v14, %v633_v27 }
  0x8d   : > { %v2856_v28 = vpop.eup %2855  ;;  %v652_v31 = vadd.f32 %v2854_v20, %v642_v16 }
  0x8e   : > { %v2858_v37 = vpop.eup %2857  ;;  %v653_v25 = vadd.f32 %v2856_v28, %v643_v15 }
  0x8f   : > { %v2860_v38 = vpop.eup %2859  ;;  %v542_v30 = vmul.f32 0.6931472, %v2858_v37 }
  0x90   : > { %v2862_v33 = vpop.eup %2861  ;;  %v544_v40 = vmul.f32 0.6931472, %v2860_v38 }
  0x91   : > { %v2864_v48 = vpop.eup %2863  ;;  %v662_v42 = vadd.f32 %v2862_v33, %v652_v31  ;;  %v545_v32 = vsub.f32 %v542_v30, %v539_v24 }
  0x92   : > { %v546_v50 = vsub.f32 %v544_v40, %v540_v35  ;;  %v663_v54 = vadd.f32 %v2864_v48, %v653_v25 }
  0x93   : > { %2865 = vlog2.f32 %v662_v42  ;;  %v3491_v45 = vsel %vm404_vm0, %v545_v32, -1.0 }
  0x94   : > { %v3495_v60 = vsel %vm405_vm2, %v546_v50, -1.0  ;;  %2867 = vlog2.f32 %v663_v54  ;;  %vm726_vm6 = vcmp.ge.f32.partialorder %v3491_v45, 0.295081  ;;  %vm702_vm7 = vcmp.ge.f32.partialorder %v3491_v45, 0.35667494  ;;  %675 = vst.msk [vmem:[%s383_s11] sm:$0xff] %vm674_vm1, %v3491_v45 }
  0x95   : > { %vm727_vm8 = vcmp.ge.f32.partialorder %v3495_v60, 0.295081  ;;  %v2435_v44 = vsel %vm726_vm6, 1.0, %v3014_v12  ;;  %vm703_vm9 = vcmp.ge.f32.partialorder %v3495_v60, 0.35667494  ;;  %v2432_v26 = vsel %vm702_vm7, 1.0, %v3014_v12 }
  0x96   : > { %v2436_v36 = vsel %vm727_vm8, 1.0, %v3014_v12  ;;  %v732_v46 = vsel %vm674_vm1, %v2435_v44, 0.0  ;;  %v2433_v47 = vsel %vm703_vm9, 1.0, %v3014_v12  ;;  %v708_v58 = vsel %vm674_vm1, %v2432_v26, 0.0  ;;  %676 = vst.msk [vmem:[%s383_s11 + $0x8] sm:$0xff] %vm674_vm1, %v3495_v60 }
  0x97   : > { %v733_v34 = vsel %vm674_vm1, %v2436_v36, 0.0  ;;  %v709_v52 = vsel %vm674_vm1, %v2433_v47, 0.0  ;;  %vm750_vm10 = vcmp.ge.f32.partialorder %v3491_v45, 0.24412365  ;;  %vm751_vm11 = vcmp.ge.f32.partialorder %v3495_v60, 0.24412365 }
  0x98   : > { %v734_v49 = vadd.f32 %v733_v34, %v732_v46  ;;  %v710_v57 = vadd.f32 %v709_v52, %v708_v58  ;;  %v2438_v56 = vsel %vm750_vm10, 1.0, %v3014_v12  ;;  %v2439_v51 = vsel %vm751_vm11, 1.0, %v3014_v12 }
  0x99   : > { %v756_v59 = vsel %vm674_vm1, %v2438_v56, 0.0  ;;  %v757_v62 = vsel %vm674_vm1, %v2439_v51, 0.0  ;;  %vm774_vm12 = vcmp.ge.f32.partialorder %v3491_v45, 0.2019661  ;;  %vm775_vm13 = vcmp.ge.f32.partialorder %v3495_v60, 0.2019661 }
  0x9a   : > { %735 = vadd.xlane.f32.xlu1 %v734_v49  ;;  %711 = vadd.xlane.f32.xlu0 %v710_v57  ;;  %v758_v61 = vadd.f32 %v757_v62, %v756_v59  ;;  %v2441_v21 = vsel %vm774_vm12, 1.0, %v3014_v12  ;;  %v2442_v2 = vsel %vm775_vm13, 1.0, %v3014_v12  ;;  %vm798_vm14 = vcmp.ge.f32.partialorder %v3491_v45, 0.1670887 }
  0x9b   : > { %v780_v63 = vsel %vm674_vm1, %v2441_v21, 0.0  ;;  %v781_v23 = vsel %vm674_vm1, %v2442_v2, 0.0  ;;  %vm799_vm15 = vcmp.ge.f32.partialorder %v3495_v60, 0.1670887  ;;  %v2444_v53 = vsel %vm798_vm14, 1.0, %v3014_v12 }
  0x9c   : > { %v782_v1 = vadd.f32 %v781_v23, %v780_v63  ;;  %v2445_v6 = vsel %vm799_vm15, 1.0, %v3014_v12  ;;  %v804_v3 = vsel %vm674_vm1, %v2444_v53, 0.0  ;;  %vm822_vm3 = vcmp.ge.f32.partialorder %v3491_v45, 0.13823427 }
  0x9d   : > { %v805_v11 = vsel %vm674_vm1, %v2445_v6, 0.0  ;;  %vm823_vm4 = vcmp.ge.f32.partialorder %v3495_v60, 0.13823427  ;;  %v2447_v4 = vsel %vm822_vm3, 1.0, %v3014_v12  ;;  %vm846_vm5 = vcmp.ge.f32.partialorder %v3491_v45, 0.11436269 }
  0x9e   : > { %759 = vadd.xlane.f32.xlu1 %v758_v61  ;;  %783 = vadd.xlane.f32.xlu0 %v782_v1  ;;  %v806_v43 = vadd.f32 %v805_v11, %v804_v3  ;;  %v2448_v29 = vsel %vm823_vm4, 1.0, %v3014_v12  ;;  %v828_v8 = vsel %vm674_vm1, %v2447_v4, 0.0  ;;  %vm847_vm6 = vcmp.ge.f32.partialorder %v3495_v60, 0.11436269 }
  0x9f   : > { %v829_v7 = vsel %vm674_vm1, %v2448_v29, 0.0  ;;  %v2450_v22 = vsel %vm846_vm5, 1.0, %v3014_v12  ;;  %v2451_v55 = vsel %vm847_vm6, 1.0, %v3014_v12  ;;  %vm870_vm7 = vcmp.ge.f32.partialorder %v3491_v45, 0.09461347 }
  0xa0   : > { %v2866_v17 = vpop.eup %2865  ;;  %v830_v13 = vadd.f32 %v829_v7, %v828_v8  ;;  %v852_v10 = vsel %vm674_vm1, %v2450_v22, 0.0  ;;  %v853_v39 = vsel %vm674_vm1, %v2451_v55, 0.0  ;;  %vm871_vm8 = vcmp.ge.f32.partialorder %v3495_v60, 0.09461347 }
  0xa1   : > { %v2868_v27 = vpop.eup %2867  ;;  %v3541_v14 = vmul.f32 0.6931472, %v2866_v17  ;;  %v2453_v16 = vsel %vm870_vm7, 1.0, %v3014_v12  ;;  %v2454_v19 = vsel %vm871_vm8, 1.0, %v3014_v12  ;;  %v854_v20 = vadd.f32 %v853_v39, %v852_v10 }
  0xa2   : > { %807 = vadd.xlane.f32.xlu1 %v806_v43  ;;  %831 = vadd.xlane.f32.xlu0 %v830_v13  ;;  %v876_v18 = vsel %vm674_vm1, %v2453_v16, 0.0  ;;  %v877_v15 = vsel %vm674_vm1, %v2454_v19, 0.0  ;;  %vm894_vm9 = vcmp.ge.f32.partialorder %v3491_v45, 0.078274734  ;;  %v3548_v28 = vmul.f32 0.6931472, %v2868_v27 }
  0xa3   : > { %v878_v31 = vadd.f32 %v877_v15, %v876_v18  ;;  %vm895_vm10 = vcmp.ge.f32.partialorder %v3495_v60, 0.078274734  ;;  %v2456_v37 = vsel %vm894_vm9, 1.0, %v3014_v12  ;;  %vm918_vm11 = vcmp.ge.f32.partialorder %v3491_v45, 0.064757526 }
  0xa4   : > { %v2457_v25 = vsel %vm895_vm10, 1.0, %v3014_v12  ;;  %v900_v24 = vsel %vm674_vm1, %v2456_v37, 0.0  ;;  %vm919_vm12 = vcmp.ge.f32.partialorder %v3495_v60, 0.064757526  ;;  %v2459_v35 = vsel %vm918_vm11, 1.0, %v3014_v12 }
  0xa5   : > { %v901_v38 = vsel %vm674_vm1, %v2457_v25, 0.0  ;;  %v670_v30 = vsub.f32 %v3541_v14, %v3469_v9  ;;  %v2460_v40 = vsel %vm919_vm12, 1.0, %v3014_v12  ;;  %v924_v48 = vsel %vm674_vm1, %v2459_v35, 0.0 }
  0xa6   : > { %855 = vadd.xlane.f32.xlu1 %v854_v20  ;;  %879 = vadd.xlane.f32.xlu0 %v878_v31  ;;  %v902_v33 = vadd.f32 %v901_v38, %v900_v24  ;;  %v671_v42 = vsub.f32 %v3548_v28, %v3429_v41  ;;  %v925_v32 = vsel %vm674_vm1, %v2460_v40, 0.0  ;;  %vm942_vm13 = vcmp.ge.f32.partialorder %v3491_v45, 0.053574592 }
  0xa7   : > { %vm943_vm14 = vcmp.ge.f32.partialorder %v3495_v60, 0.053574592  ;;  %v926_v50 = vadd.f32 %v925_v32, %v924_v48  ;;  %v2462_v54 = vsel %vm942_vm13, 1.0, %v3014_v12  ;;  %vm966_vm15 = vcmp.ge.f32.partialorder %v3491_v45, 0.04432283 }
  0xa8   : > { %v2463_v44 = vsel %vm943_vm14, 1.0, %v3014_v12  ;;  %v948_v26 = vsel %vm674_vm1, %v2462_v54, 0.0  ;;  %vm967_vm3 = vcmp.ge.f32.partialorder %v3495_v60, 0.04432283  ;;  %v2465_v46 = vsel %vm966_vm15, 1.0, %v3014_v12 }
  0xa9   : > { %v949_v36 = vsel %vm674_vm1, %v2463_v44, 0.0  ;;  %v2466_v58 = vsel %vm967_vm3, 1.0, %v3014_v12  ;;  %v972_v34 = vsel %vm674_vm1, %v2465_v46, 0.0  ;;  %vm990_vm4 = vcmp.ge.f32.partialorder %v3491_v45, 0.03666875 }
  0xaa   : > { %903 = vadd.xlane.f32.xlu1 %v902_v33  ;;  %927 = vadd.xlane.f32.xlu0 %v926_v50  ;;  %v950_v47 = vadd.f32 %v949_v36, %v948_v26  ;;  %v973_v52 = vsel %vm674_vm1, %v2466_v58, 0.0  ;;  %vm991_vm5 = vcmp.ge.f32.partialorder %v3495_v60, 0.03666875  ;;  %v2468_v49 = vsel %vm990_vm4, 1.0, %v3014_v12 }
  0xab   : > { %vm1014_vm6 = vcmp.ge.f32.partialorder %v3491_v45, 0.030336449  ;;  %v974_v57 = vadd.f32 %v973_v52, %v972_v34  ;;  %v2469_v56 = vsel %vm991_vm5, 1.0, %v3014_v12  ;;  %v996_v51 = vsel %vm674_vm1, %v2468_v49, 0.0 }
  0xac   : > { %vm1015_vm7 = vcmp.ge.f32.partialorder %v3495_v60, 0.030336449  ;;  %v997_v59 = vsel %vm674_vm1, %v2469_v56, 0.0  ;;  %v2471_v62 = vsel %vm1014_vm6, 1.0, %v3014_v12  ;;  %vm1038_vm8 = vcmp.ge.f32.partialorder %v3491_v45, 0.025097668 }
  0xad   : > { %v2472_v61 = vsel %vm1015_vm7, 1.0, %v3014_v12  ;;  %v998_v21 = vadd.f32 %v997_v59, %v996_v51  ;;  %v1020_v2 = vsel %vm674_vm1, %v2471_v62, 0.0  ;;  %vm1039_vm9 = vcmp.ge.f32.partialorder %v3495_v60, 0.025097668 }
  0xae   : > { %951 = vadd.xlane.f32.xlu1 %v950_v47  ;;  %975 = vadd.xlane.f32.xlu0 %v974_v57  ;;  %v1021_v63 = vsel %vm674_vm1, %v2472_v61, 0.0  ;;  %v2474_v53 = vsel %vm1038_vm8, 1.0, %v3014_v12  ;;  %v2475_v1 = vsel %vm1039_vm9, 1.0, %v3014_v12  ;;  %vm1062_vm10 = vcmp.ge.f32.partialorder %v3491_v45, 0.020763569 }
  0xaf   : > { %v1022_v23 = vadd.f32 %v1021_v63, %v1020_v2  ;;  %v1044_v6 = vsel %vm674_vm1, %v2474_v53, 0.0  ;;  %v1045_v3 = vsel %vm674_vm1, %v2475_v1, 0.0  ;;  %vm1063_vm11 = vcmp.ge.f32.partialorder %v3495_v60, 0.020763569 }
  0xb0   : > { %v2477_v11 = vsel %vm1062_vm10, 1.0, %v3014_v12  ;;  %v1046_v4 = vadd.f32 %v1045_v3, %v1044_v6  ;;  %v2478_v43 = vsel %vm1063_vm11, 1.0, %v3014_v12  ;;  %vm1086_vm12 = vcmp.ge.f32.partialorder %v3491_v45, 0.01717792 }
  0xb1   : > { %v1068_v29 = vsel %vm674_vm1, %v2477_v11, 0.0  ;;  %v1069_v8 = vsel %vm674_vm1, %v2478_v43, 0.0  ;;  %vm1087_vm13 = vcmp.ge.f32.partialorder %v3495_v60, 0.01717792  ;;  %v2480_v7 = vsel %vm1086_vm12, 1.0, %v3014_v12 }
  0xb2   : > { %999 = vadd.xlane.f32.xlu1 %v998_v21  ;;  %1023 = vadd.xlane.f32.xlu0 %v1022_v23  ;;  %vm1110_vm14 = vcmp.ge.f32.partialorder %v3491_v45, 0.014211478  ;;  %v1070_v22 = vadd.f32 %v1069_v8, %v1068_v29  ;;  %v2481_v55 = vsel %vm1087_vm13, 1.0, %v3014_v12  ;;  %v1092_v17 = vsel %vm674_vm1, %v2480_v7, 0.0 }
  0xb3   : > { %vm1111_vm15 = vcmp.ge.f32.partialorder %v3495_v60, 0.014211478  ;;  %v1093_v13 = vsel %vm674_vm1, %v2481_v55, 0.0  ;;  %v2483_v10 = vsel %vm1110_vm14, 1.0, %v3014_v12  ;;  %vm1134_vm3 = vcmp.ge.f32.partialorder %v3491_v45, 0.011757307 }
  0xb4   : > { %v2484_v39 = vsel %vm1111_vm15, 1.0, %v3014_v12  ;;  %v1094_v27 = vadd.f32 %v1093_v13, %v1092_v17  ;;  %v1116_v16 = vsel %vm674_vm1, %v2483_v10, 0.0  ;;  %vm1135_vm4 = vcmp.ge.f32.partialorder %v3495_v60, 0.011757307 }
  0xb5   : > { %v1117_v19 = vsel %vm674_vm1, %v2484_v39, 0.0  ;;  %v2486_v18 = vsel %vm1134_vm3, 1.0, %v3014_v12  ;;  %v2487_v15 = vsel %vm1135_vm4, 1.0, %v3014_v12  ;;  %vm1158_vm5 = vcmp.ge.f32.partialorder %v3491_v45, 0.009726945 }
  0xb6   : > { %1047 = vadd.xlane.f32.xlu1 %v1046_v4  ;;  %1071 = vadd.xlane.f32.xlu0 %v1070_v22  ;;  %v1118_v20 = vadd.f32 %v1117_v19, %v1116_v16  ;;  %v1140_v31 = vsel %vm674_vm1, %v2486_v18, 0.0  ;;  %v1141_v37 = vsel %vm674_vm1, %v2487_v15, 0.0  ;;  %vm1159_vm6 = vcmp.ge.f32.partialorder %v3495_v60, 0.009726945 }
  0xb7   : > { %v2489_v25 = vsel %vm1158_vm5, 1.0, %v3014_v12  ;;  %v1142_v24 = vadd.f32 %v1141_v37, %v1140_v31  ;;  %v2490_v38 = vsel %vm1159_vm6, 1.0, %v3014_v12  ;;  %vm1182_vm7 = vcmp.ge.f32.partialorder %v3491_v45, 0.008047206 }
  0xb8   : > { %v1164_v35 = vsel %vm674_vm1, %v2489_v25, 0.0  ;;  %v1165_v33 = vsel %vm674_vm1, %v2490_v38, 0.0  ;;  %vm1183_vm8 = vcmp.ge.f32.partialorder %v3495_v60, 0.008047206  ;;  %v2492_v40 = vsel %vm1182_vm7, 1.0, %v3014_v12 }
  0xb9   : > { %vm1206_vm9 = vcmp.ge.f32.partialorder %v3491_v45, 0.0066575394  ;;  %v1166_v48 = vadd.f32 %v1165_v33, %v1164_v35  ;;  %v2493_v32 = vsel %vm1183_vm8, 1.0, %v3014_v12  ;;  %v1188_v50 = vsel %vm674_vm1, %v2492_v40, 0.0 }
  0xba   : > { %1095 = vadd.xlane.f32.xlu1 %v1094_v27  ;;  %1119 = vadd.xlane.f32.xlu0 %v1118_v20  ;;  %vm1207_vm10 = vcmp.ge.f32.partialorder %v3495_v60, 0.0066575394  ;;  %v1189_v54 = vsel %vm674_vm1, %v2493_v32, 0.0  ;;  %v2495_v44 = vsel %vm1206_vm9, 1.0, %v3014_v12  ;;  %vm1230_vm11 = vcmp.ge.f32.partialorder %v3491_v45, 0.0055078533 }
  0xbb   : > { %v2496_v26 = vsel %vm1207_vm10, 1.0, %v3014_v12  ;;  %v1190_v36 = vadd.f32 %v1189_v54, %v1188_v50  ;;  %v1212_v46 = vsel %vm674_vm1, %v2495_v44, 0.0  ;;  %vm1231_vm12 = vcmp.ge.f32.partialorder %v3495_v60, 0.0055078533 }
  0xbc   : > { %v1213_v47 = vsel %vm674_vm1, %v2496_v26, 0.0  ;;  %v2498_v34 = vsel %vm1230_vm11, 1.0, %v3014_v12  ;;  %v2499_v52 = vsel %vm1231_vm12, 1.0, %v3014_v12  ;;  %vm1254_vm13 = vcmp.ge.f32.partialorder %v3491_v45, 0.0045567057 }
  0xbd   : > { %v1214_v58 = vadd.f32 %v1213_v47, %v1212_v46  ;;  %v1236_v49 = vsel %vm674_vm1, %v2498_v34, 0.0  ;;  %v1237_v57 = vsel %vm674_vm1, %v2499_v52, 0.0  ;;  %vm1255_vm14 = vcmp.ge.f32.partialorder %v3495_v60, 0.0045567057 }
  0xbe   : > { %1143 = vadd.xlane.f32.xlu1 %v1142_v24  ;;  %1167 = vadd.xlane.f32.xlu0 %v1166_v48  ;;  %v2501_v56 = vsel %vm1254_vm13, 1.0, %v3014_v12  ;;  %v1238_v51 = vadd.f32 %v1237_v57, %v1236_v49  ;;  %v2502_v59 = vsel %vm1255_vm14, 1.0, %v3014_v12  ;;  %vm1278_vm15 = vcmp.ge.f32.partialorder %v3491_v45, 0.0037698115 }
  0xbf   : > { %v1260_v62 = vsel %vm674_vm1, %v2501_v56, 0.0  ;;  %v1261_v61 = vsel %vm674_vm1, %v2502_v59, 0.0  ;;  %vm1279_vm3 = vcmp.ge.f32.partialorder %v3495_v60, 0.0037698115  ;;  %v2504_v21 = vsel %vm1278_vm15, 1.0, %v3014_v12 }
  0xc0   : > { %vm1302_vm4 = vcmp.ge.f32.partialorder %v3491_v45, 0.0031188051  ;;  %v1262_v2 = vadd.f32 %v1261_v61, %v1260_v62  ;;  %v2505_v63 = vsel %vm1279_vm3, 1.0, %v3014_v12  ;;  %v1284_v23 = vsel %vm674_vm1, %v2504_v21, 0.0 }
  0xc1   : > { %vm1303_vm5 = vcmp.ge.f32.partialorder %v3495_v60, 0.0031188051  ;;  %v1285_v53 = vsel %vm674_vm1, %v2505_v63, 0.0  ;;  %v2507_v1 = vsel %vm1302_vm4, 1.0, %v3014_v12  ;;  %vm1326_vm6 = vcmp.ge.f32.partialorder %v3491_v45, 0.0025802208 }
  0xc2   : > { %1191 = vadd.xlane.f32.xlu1 %v1190_v36  ;;  %1215 = vadd.xlane.f32.xlu0 %v1214_v58  ;;  %v2508_v6 = vsel %vm1303_vm5, 1.0, %v3014_v12  ;;  %v3665_v3 = vsel %vm404_vm0, %v670_v30, -1.0  ;;  %v1308_v11 = vsel %vm674_vm1, %v2507_v1, 0.0  ;;  %vm1327_vm7 = vcmp.ge.f32.partialorder %v3495_v60, 0.0025802208 }
  0xc3   : > { %v1309_v4 = vsel %vm674_vm1, %v2508_v6, 0.0  ;;  %v1286_v43 = vadd.f32 %v1285_v53, %v1284_v23  ;;  %v2510_v29 = vsel %vm1326_vm6, 1.0, %v3014_v12  ;;  %v2511_v8 = vsel %vm1327_vm7, 1.0, %v3014_v12  ;;  %677 = vst.msk [vmem:[%s393_s12] sm:$0xff] %vm674_vm1, %v3665_v3 }
  0xc4   : > { %vm1350_vm8 = vcmp.ge.f32.partialorder %v3491_v45, 0.0021346442  ;;  %v1332_v7 = vsel %vm674_vm1, %v2510_v29, 0.0  ;;  %v1333_v9 = vsel %vm674_vm1, %v2511_v8, 0.0  ;;  %vm1351_vm0 = vcmp.ge.f32.partialorder %v3495_v60, 0.0021346442 }
  0xc5   : > { %v2513_v0 = vsel %vm1350_vm8, 1.0, %v3014_v12  ;;  %v1310_v14 = vadd.f32 %v1309_v4, %v1308_v11  ;;  %v2514_v30 = vsel %vm1351_vm0, 1.0, %v3014_v12  ;;  %vm1374_vm9 = vcmp.ge.f32.partialorder %v3491_v45, 0.0017660139 }
  0xc6   : > { %1239 = vadd.xlane.f32.xlu1 %v1238_v51  ;;  %1263 = vadd.xlane.f32.xlu0 %v1262_v2  ;;  %v1356_v22 = vsel %vm674_vm1, %v2513_v0, 0.0  ;;  %v1357_v55 = vsel %vm674_vm1, %v2514_v30, 0.0  ;;  %vm1375_vm10 = vcmp.ge.f32.partialorder %v3495_v60, 0.0017660139  ;;  %v2516_v17 = vsel %vm1374_vm9, 1.0, %v3014_v12 }
  0xc7   : > { %vm1398_vm11 = vcmp.ge.f32.partialorder %v3491_v45, 0.0014610422  ;;  %v1334_v13 = vadd.f32 %v1333_v9, %v1332_v7  ;;  %v2517_v10 = vsel %vm1375_vm10, 1.0, %v3014_v12  ;;  %v1380_v39 = vsel %vm674_vm1, %v2516_v17, 0.0 }
  0xc8   : > { %vm1399_vm12 = vcmp.ge.f32.partialorder %v3495_v60, 0.0014610422  ;;  %v1381_v27 = vsel %vm674_vm1, %v2517_v10, 0.0  ;;  %v2519_v16 = vsel %vm1398_vm11, 1.0, %v3014_v12  ;;  %vm1422_vm13 = vcmp.ge.f32.partialorder %v3491_v45, 0.0012087357 }
  0xc9   : > { %v2520_v19 = vsel %vm1399_vm12, 1.0, %v3014_v12  ;;  %v1358_v20 = vadd.f32 %v1357_v55, %v1356_v22  ;;  %v1404_v18 = vsel %vm674_vm1, %v2519_v16, 0.0  ;;  %vm1423_vm14 = vcmp.ge.f32.partialorder %v3495_v60, 0.0012087357 }
  0xca   : > { %1287 = vadd.xlane.f32.xlu1 %v1286_v43  ;;  %1311 = vadd.xlane.f32.xlu0 %v1310_v14  ;;  %v1405_v15 = vsel %vm674_vm1, %v2520_v19, 0.0  ;;  %v3699_v31 = vsel %vm405_vm2, %v671_v42, -1.0  ;;  %v2522_v37 = vsel %vm1422_vm13, 1.0, %v3014_v12  ;;  %v2523_v25 = vsel %vm1423_vm14, 1.0, %v3014_v12 }
  0xcb   : > { %vm1446_vm15 = vcmp.ge.f32.partialorder %v3491_v45, 0.001  ;;  %v1382_v24 = vadd.f32 %v1381_v27, %v1380_v39  ;;  %v1406_v38 = vadd.f32 %v1405_v15, %v1404_v18  ;;  %vm1447_vm3 = vcmp.ge.f32.partialorder %v3495_v60, 0.001  ;;  %678 = vst.msk [vmem:[%s393_s12 + $0x8] sm:$0xff] %vm674_vm1, %v3699_v31 }
  0xcc   : > { %v2525_v35 = vsel %vm1446_vm15, 1.0, %v3014_v12  ;;  %v1428_v33 = vsel %vm674_vm1, %v2522_v37, 0.0  ;;  %v1429_v41 = vsel %vm674_vm1, %v2523_v25, 0.0  ;;  %v2526_v5 = vsel %vm1447_vm3, 1.0, %v3014_v12 }
  0xcd   : > { %vm1471_vm2 = vcmp.ge.f32.partialorder %v3665_v3, 0.35667494  ;;  %v1452_v28 = vsel %vm674_vm1, %v2525_v35, 0.0  ;;  %vm1472_vm4 = vcmp.ge.f32.partialorder %v3699_v31, 0.35667494  ;;  %v1453_v40 = vsel %vm674_vm1, %v2526_v5, 0.0 }
  0xce   : > { %1335 = vadd.xlane.f32.xlu1 %v1334_v13  ;;  %1359 = vadd.xlane.f32.xlu0 %v1358_v20  ;;  %v2528_v42 = vsel %vm1471_vm2, 1.0, %v3014_v12  ;;  %vm1492_vm5 = vcmp.ge.f32.partialorder %v3665_v3, 0.295081  ;;  %v2529_v48 = vsel %vm1472_vm4, 1.0, %v3014_v12  ;;  %vm1493_vm6 = vcmp.ge.f32.partialorder %v3699_v31, 0.295081 }
  0xcf   : > { %v1477_v32 = vsel %vm674_vm1, %v2528_v42, 0.0  ;;  %v1478_v50 = vsel %vm674_vm1, %v2529_v48, 0.0  ;;  %v2530_v54 = vsel %vm1492_vm5, 1.0, %v3014_v12  ;;  %v2531_v44 = vsel %vm1493_vm6, 1.0, %v3014_v12 }
  0xd0   : > { %vm1513_vm7 = vcmp.ge.f32.partialorder %v3665_v3, 0.24412365  ;;  %v1430_v26 = vadd.f32 %v1429_v41, %v1428_v33  ;;  %v1498_v36 = vsel %vm674_vm1, %v2530_v54, 0.0  ;;  %v1499_v46 = vsel %vm674_vm1, %v2531_v44, 0.0 }
  0xd1   : > { %vm1514_vm8 = vcmp.ge.f32.partialorder %v3699_v31, 0.24412365  ;;  %v1454_v47 = vadd.f32 %v1453_v40, %v1452_v28  ;;  %v2532_v58 = vsel %vm1513_vm7, 1.0, %v3014_v12  ;;  %vm1534_vm0 = vcmp.ge.f32.partialorder %v3665_v3, 0.2019661 }
  0xd2   : > { %1383 = vadd.xlane.f32.xlu1 %v1382_v24  ;;  %1407 = vadd.xlane.f32.xlu0 %v1406_v38  ;;  %v2533_v34 = vsel %vm1514_vm8, 1.0, %v3014_v12  ;;  %v1479_v52 = vadd.f32 %v1478_v50, %v1477_v32  ;;  %vm1535_vm9 = vcmp.ge.f32.partialorder %v3699_v31, 0.2019661  ;;  %v2534_v49 = vsel %vm1534_vm0, 1.0, %v3014_v12 }
  0xd3   : > { %v1500_v57 = vadd.f32 %v1499_v46, %v1498_v36  ;;  %v1519_v56 = vsel %vm674_vm1, %v2532_v58, 0.0  ;;  %v2535_v51 = vsel %vm1535_vm9, 1.0, %v3014_v12  ;;  %vm1555_vm10 = vcmp.ge.f32.partialorder %v3665_v3, 0.1670887 }
  0xd4   : > { %v1520_v59 = vsel %vm674_vm1, %v2533_v34, 0.0  ;;  %v1540_v62 = vsel %vm674_vm1, %v2534_v49, 0.0  ;;  %vm1556_vm11 = vcmp.ge.f32.partialorder %v3699_v31, 0.1670887  ;;  %vm1576_vm12 = vcmp.ge.f32.partialorder %v3665_v3, 0.13823427 }
  0xd5   : > { %v1541_v61 = vsel %vm674_vm1, %v2535_v51, 0.0  ;;  %v2536_v21 = vsel %vm1555_vm10, 1.0, %v3014_v12  ;;  %v2537_v2 = vsel %vm1556_vm11, 1.0, %v3014_v12  ;;  %vm1577_vm13 = vcmp.ge.f32.partialorder %v3699_v31, 0.13823427 }
  0xd6   : > { %1431 = vadd.xlane.f32.xlu1 %v1430_v26  ;;  %1455 = vadd.xlane.f32.xlu0 %v1454_v47  ;;  %v2538_v63 = vsel %vm1576_vm12, 1.0, %v3014_v12  ;;  %v2539_v23 = vsel %vm1577_vm13, 1.0, %v3014_v12  ;;  %vm1597_vm14 = vcmp.ge.f32.partialorder %v3665_v3, 0.11436269  ;;  %v1521_v53 = vadd.f32 %v1520_v59, %v1519_v56 }
  0xd7   : > { %vm1598_vm15 = vcmp.ge.f32.partialorder %v3699_v31, 0.11436269  ;;  %v1542_v1 = vadd.f32 %v1541_v61, %v1540_v62  ;;  %v1561_v6 = vsel %vm674_vm1, %v2536_v21, 0.0  ;;  %v1562_v11 = vsel %vm674_vm1, %v2537_v2, 0.0 }
  0xd8   : > { %vm1618_vm3 = vcmp.ge.f32.partialorder %v3665_v3, 0.09461347  ;;  %v1582_v4 = vsel %vm674_vm1, %v2538_v63, 0.0  ;;  %v1583_v43 = vsel %vm674_vm1, %v2539_v23, 0.0  ;;  %v2540_v29 = vsel %vm1597_vm14, 1.0, %v3014_v12 }
  0xd9   : > { %vm1619_vm2 = vcmp.ge.f32.partialorder %v3699_v31, 0.09461347  ;;  %v2541_v8 = vsel %vm1598_vm15, 1.0, %v3014_v12  ;;  %v2542_v7 = vsel %vm1618_vm3, 1.0, %v3014_v12  ;;  %vm1639_vm4 = vcmp.ge.f32.partialorder %v3665_v3, 0.078274734 }
  0xda   : > { %1480 = vadd.xlane.f32.xlu1 %v1479_v52  ;;  %1501 = vadd.xlane.f32.xlu0 %v1500_v57  ;;  %v2543_v9 = vsel %vm1619_vm2, 1.0, %v3014_v12  ;;  %vm1640_vm5 = vcmp.ge.f32.partialorder %v3699_v31, 0.078274734  ;;  %vm1660_vm6 = vcmp.ge.f32.partialorder %v3665_v3, 0.064757526  ;;  %v1563_v0 = vadd.f32 %v1562_v11, %v1561_v6 }
  0xdb   : > { %v1584_v14 = vadd.f32 %v1583_v43, %v1582_v4  ;;  %v1603_v30 = vsel %vm674_vm1, %v2540_v29, 0.0  ;;  %vm1661_vm7 = vcmp.ge.f32.partialorder %v3699_v31, 0.064757526  ;;  %v1604_v22 = vsel %vm674_vm1, %v2541_v8, 0.0 }
  0xdc   : > { %v1624_v55 = vsel %vm674_vm1, %v2542_v7, 0.0  ;;  %v1625_v17 = vsel %vm674_vm1, %v2543_v9, 0.0  ;;  %v2544_v13 = vsel %vm1639_vm4, 1.0, %v3014_v12  ;;  %v2545_v10 = vsel %vm1640_vm5, 1.0, %v3014_v12 }
  0xdd   : > { %v2546_v39 = vsel %vm1660_vm6, 1.0, %v3014_v12  ;;  %v2547_v27 = vsel %vm1661_vm7, 1.0, %v3014_v12  ;;  %vm1681_vm8 = vcmp.ge.f32.partialorder %v3665_v3, 0.053574592  ;;  %vm1682_vm0 = vcmp.ge.f32.partialorder %v3699_v31, 0.053574592 }
  0xde   : > { %1522 = vadd.xlane.f32.xlu1 %v1521_v53  ;;  %1543 = vadd.xlane.f32.xlu0 %v1542_v1  ;;  %vm1702_vm9 = vcmp.ge.f32.partialorder %v3665_v3, 0.04432283  ;;  %v1605_v16 = vadd.f32 %v1604_v22, %v1603_v30  ;;  %v1626_v19 = vadd.f32 %v1625_v17, %v1624_v55  ;;  %v1645_v20 = vsel %vm674_vm1, %v2544_v13, 0.0 }
  0xdf   : > { %vm1703_vm10 = vcmp.ge.f32.partialorder %v3699_v31, 0.04432283  ;;  %v1646_v18 = vsel %vm674_vm1, %v2545_v10, 0.0  ;;  %v1666_v15 = vsel %vm674_vm1, %v2546_v39, 0.0  ;;  %v1667_v37 = vsel %vm674_vm1, %v2547_v27, 0.0 }
  0xe0   : > { %v2548_v25 = vsel %vm1681_vm8, 1.0, %v3014_v12  ;;  %v2549_v24 = vsel %vm1682_vm0, 1.0, %v3014_v12  ;;  %v2550_v38 = vsel %vm1702_vm9, 1.0, %v3014_v12  ;;  %v2551_v35 = vsel %vm1703_vm10, 1.0, %v3014_v12 }
  0xe1   : > { %vm1723_vm11 = vcmp.ge.f32.partialorder %v3665_v3, 0.03666875  ;;  %vm1724_vm12 = vcmp.ge.f32.partialorder %v3699_v31, 0.03666875  ;;  %vm1744_vm13 = vcmp.ge.f32.partialorder %v3665_v3, 0.030336449  ;;  %v1647_v33 = vadd.f32 %v1646_v18, %v1645_v20 }
  0xe2   : > { %1564 = vadd.xlane.f32.xlu1 %v1563_v0  ;;  %1585 = vadd.xlane.f32.xlu0 %v1584_v14  ;;  %vm1745_vm14 = vcmp.ge.f32.partialorder %v3699_v31, 0.030336449  ;;  %v1668_v41 = vadd.f32 %v1667_v37, %v1666_v15  ;;  %v1687_v5 = vsel %vm674_vm1, %v2548_v25, 0.0  ;;  %v1688_v28 = vsel %vm674_vm1, %v2549_v24, 0.0 }
  0xe3   : > { %v1708_v42 = vsel %vm674_vm1, %v2550_v38, 0.0  ;;  %v1709_v40 = vsel %vm674_vm1, %v2551_v35, 0.0  ;;  %v2552_v48 = vsel %vm1723_vm11, 1.0, %v3014_v12  ;;  %v2553_v32 = vsel %vm1724_vm12, 1.0, %v3014_v12 }
  0xe4   : > { %v2554_v50 = vsel %vm1744_vm13, 1.0, %v3014_v12  ;;  %v2555_v54 = vsel %vm1745_vm14, 1.0, %v3014_v12  ;;  %vm1765_vm15 = vcmp.ge.f32.partialorder %v3665_v3, 0.025097668  ;;  %vm1766_vm3 = vcmp.ge.f32.partialorder %v3699_v31, 0.025097668 }
  0xe5   : > { %vm1786_vm2 = vcmp.ge.f32.partialorder %v3665_v3, 0.020763569  ;;  %vm1787_vm4 = vcmp.ge.f32.partialorder %v3699_v31, 0.020763569  ;;  %v1689_v44 = vadd.f32 %v1688_v28, %v1687_v5  ;;  %v1710_v26 = vadd.f32 %v1709_v40, %v1708_v42 }
  0xe6   : > { %1606 = vadd.xlane.f32.xlu1 %v1605_v16  ;;  %1627 = vadd.xlane.f32.xlu0 %v1626_v19  ;;  %v1729_v36 = vsel %vm674_vm1, %v2552_v48, 0.0  ;;  %v1730_v46 = vsel %vm674_vm1, %v2553_v32, 0.0  ;;  %v1750_v47 = vsel %vm674_vm1, %v2554_v50, 0.0  ;;  %v1751_v58 = vsel %vm674_vm1, %v2555_v54, 0.0 }
  0xe7   : > { %v2556_v34 = vsel %vm1765_vm15, 1.0, %v3014_v12  ;;  %v2557_v52 = vsel %vm1766_vm3, 1.0, %v3014_v12  ;;  %v2558_v49 = vsel %vm1786_vm2, 1.0, %v3014_v12  ;;  %v2559_v57 = vsel %vm1787_vm4, 1.0, %v3014_v12 }
  0xe8   : > { %vm1807_vm5 = vcmp.ge.f32.partialorder %v3665_v3, 0.01717792  ;;  %vm1808_vm6 = vcmp.ge.f32.partialorder %v3699_v31, 0.01717792  ;;  %vm1828_vm7 = vcmp.ge.f32.partialorder %v3665_v3, 0.014211478  ;;  %v1731_v56 = vadd.f32 %v1730_v46, %v1729_v36 }
  0xe9   : > { %vm1829_vm8 = vcmp.ge.f32.partialorder %v3699_v31, 0.014211478  ;;  %v1752_v51 = vadd.f32 %v1751_v58, %v1750_v47  ;;  %v1771_v59 = vsel %vm674_vm1, %v2556_v34, 0.0  ;;  %v1772_v62 = vsel %vm674_vm1, %v2557_v52, 0.0  ;;  %v689_v34 = vpop.xlane.xlu0 %688 }
  0xea   : > { %1648 = vadd.xlane.f32.xlu1 %v1647_v33  ;;  %1669 = vadd.xlane.f32.xlu0 %v1668_v41  ;;  %v1792_v61 = vsel %vm674_vm1, %v2558_v49, 0.0  ;;  %v1793_v21 = vsel %vm674_vm1, %v2559_v57, 0.0  ;;  %v2560_v2 = vsel %vm1807_vm5, 1.0, %v3014_v12  ;;  %v2561_v63 = vsel %vm1808_vm6, 1.0, %v3014_v12 }
  0xeb   : > { %v2562_v23 = vsel %vm1828_vm7, 1.0, %v3014_v12  ;;  %v2563_v53 = vsel %vm1829_vm8, 1.0, %v3014_v12  ;;  %vm1849_vm0 = vcmp.ge.f32.partialorder %v3665_v3, 0.011757307  ;;  %vm1850_vm9 = vcmp.ge.f32.partialorder %v3699_v31, 0.011757307 }
  0xec   : > { %vm1870_vm10 = vcmp.ge.f32.partialorder %v3665_v3, 0.009726945  ;;  %vm1871_vm11 = vcmp.ge.f32.partialorder %v3699_v31, 0.009726945  ;;  %v1773_v1 = vadd.f32 %v1772_v62, %v1771_v59  ;;  %v1794_v6 = vadd.f32 %v1793_v21, %v1792_v61 }
  0xed   : > { %v1813_v11 = vsel %vm674_vm1, %v2560_v2, 0.0  ;;  %v1814_v4 = vsel %vm674_vm1, %v2561_v63, 0.0  ;;  %v1834_v43 = vsel %vm674_vm1, %v2562_v23, 0.0  ;;  %v1835_v29 = vsel %vm674_vm1, %v2563_v53, 0.0 }
  0xee   : > { %1690 = vadd.xlane.f32.xlu1 %v1689_v44  ;;  %1711 = vadd.xlane.f32.xlu0 %v1710_v26  ;;  %v2564_v8 = vsel %vm1849_vm0, 1.0, %v3014_v12  ;;  %v2565_v7 = vsel %vm1850_vm9, 1.0, %v3014_v12  ;;  %v2566_v9 = vsel %vm1870_vm10, 1.0, %v3014_v12  ;;  %v2567_v0 = vsel %vm1871_vm11, 1.0, %v3014_v12 }
  0xef   : > { %vm1891_vm12 = vcmp.ge.f32.partialorder %v3665_v3, 0.008047206  ;;  %vm1892_vm13 = vcmp.ge.f32.partialorder %v3699_v31, 0.008047206  ;;  %vm1912_vm14 = vcmp.ge.f32.partialorder %v3665_v3, 0.0066575394  ;;  %v1815_v14 = vadd.f32 %v1814_v4, %v1813_v11 }
  0xf0   : > { %vm1913_vm15 = vcmp.ge.f32.partialorder %v3699_v31, 0.0066575394  ;;  %v1836_v30 = vadd.f32 %v1835_v29, %v1834_v43  ;;  %v1855_v22 = vsel %vm674_vm1, %v2564_v8, 0.0  ;;  %v1856_v55 = vsel %vm674_vm1, %v2565_v7, 0.0 }
  0xf1   : > { %v1876_v17 = vsel %vm674_vm1, %v2566_v9, 0.0  ;;  %v1877_v13 = vsel %vm674_vm1, %v2567_v0, 0.0  ;;  %v2568_v10 = vsel %vm1891_vm12, 1.0, %v3014_v12  ;;  %v2569_v39 = vsel %vm1892_vm13, 1.0, %v3014_v12 }
  0xf2   : > { %1732 = vadd.xlane.f32.xlu1 %v1731_v56  ;;  %1753 = vadd.xlane.f32.xlu0 %v1752_v51  ;;  %v2570_v27 = vsel %vm1912_vm14, 1.0, %v3014_v12  ;;  %v2571_v16 = vsel %vm1913_vm15, 1.0, %v3014_v12  ;;  %vm1933_vm3 = vcmp.ge.f32.partialorder %v3665_v3, 0.0055078533  ;;  %vm1934_vm2 = vcmp.ge.f32.partialorder %v3699_v31, 0.0055078533 }
  0xf3   : > { %vm1954_vm4 = vcmp.ge.f32.partialorder %v3665_v3, 0.0045567057  ;;  %vm1955_vm5 = vcmp.ge.f32.partialorder %v3699_v31, 0.0045567057  ;;  %v1857_v19 = vadd.f32 %v1856_v55, %v1855_v22  ;;  %v1878_v20 = vadd.f32 %v1877_v13, %v1876_v17 }
  0xf4   : > { %v1897_v18 = vsel %vm674_vm1, %v2568_v10, 0.0  ;;  %v1898_v15 = vsel %vm674_vm1, %v2569_v39, 0.0  ;;  %v1918_v37 = vsel %vm674_vm1, %v2570_v27, 0.0  ;;  %v1919_v25 = vsel %vm674_vm1, %v2571_v16, 0.0 }
  0xf5   : > { %v2572_v24 = vsel %vm1933_vm3, 1.0, %v3014_v12  ;;  %v2573_v38 = vsel %vm1934_vm2, 1.0, %v3014_v12  ;;  %v2574_v35 = vsel %vm1954_vm4, 1.0, %v3014_v12  ;;  %v2575_v33 = vsel %vm1955_vm5, 1.0, %v3014_v12 }
  0xf6   : > { %1774 = vadd.xlane.f32.xlu1 %v1773_v1  ;;  %1795 = vadd.xlane.f32.xlu0 %v1794_v6  ;;  %vm1975_vm6 = vcmp.ge.f32.partialorder %v3665_v3, 0.0037698115  ;;  %vm1976_vm7 = vcmp.ge.f32.partialorder %v3699_v31, 0.0037698115  ;;  %vm1996_vm8 = vcmp.ge.f32.partialorder %v3665_v3, 0.0031188051  ;;  %v1899_v41 = vadd.f32 %v1898_v15, %v1897_v18 }
  0xf7   : > { %vm1997_vm0 = vcmp.ge.f32.partialorder %v3699_v31, 0.0031188051  ;;  %v1920_v5 = vadd.f32 %v1919_v25, %v1918_v37  ;;  %v1939_v28 = vsel %vm674_vm1, %v2572_v24, 0.0  ;;  %v1940_v42 = vsel %vm674_vm1, %v2573_v38, 0.0 }
  0xf8   : > { %v1960_v40 = vsel %vm674_vm1, %v2574_v35, 0.0  ;;  %v1961_v48 = vsel %vm674_vm1, %v2575_v33, 0.0  ;;  %v2576_v32 = vsel %vm1975_vm6, 1.0, %v3014_v12  ;;  %v2577_v50 = vsel %vm1976_vm7, 1.0, %v3014_v12 }
  0xf9   : > { %v2578_v54 = vsel %vm1996_vm8, 1.0, %v3014_v12  ;;  %v2579_v44 = vsel %vm1997_vm0, 1.0, %v3014_v12  ;;  %vm2017_vm9 = vcmp.ge.f32.partialorder %v3665_v3, 0.0025802208  ;;  %vm2018_vm10 = vcmp.ge.f32.partialorder %v3699_v31, 0.0025802208 }
  0xfa   : > { %1816 = vadd.xlane.f32.xlu1 %v1815_v14  ;;  %1837 = vadd.xlane.f32.xlu0 %v1836_v30  ;;  %vm2038_vm11 = vcmp.ge.f32.partialorder %v3665_v3, 0.0021346442  ;;  %v1941_v26 = vadd.f32 %v1940_v42, %v1939_v28  ;;  %vm2039_vm12 = vcmp.ge.f32.partialorder %v3699_v31, 0.0021346442  ;;  %v1962_v36 = vadd.f32 %v1961_v48, %v1960_v40 }
  0xfb   : > { %v1981_v46 = vsel %vm674_vm1, %v2576_v32, 0.0  ;;  %v1982_v47 = vsel %vm674_vm1, %v2577_v50, 0.0  ;;  %v2002_v58 = vsel %vm674_vm1, %v2578_v54, 0.0  ;;  %v2003_v52 = vsel %vm674_vm1, %v2579_v44, 0.0 }
  0xfc   : > { %v2580_v49 = vsel %vm2017_vm9, 1.0, %v3014_v12  ;;  %v2581_v57 = vsel %vm2018_vm10, 1.0, %v3014_v12  ;;  %v2582_v56 = vsel %vm2038_vm11, 1.0, %v3014_v12  ;;  %v2583_v51 = vsel %vm2039_vm12, 1.0, %v3014_v12 }
  0xfd   : > { %vm2059_vm13 = vcmp.ge.f32.partialorder %v3665_v3, 0.0017660139  ;;  %vm2060_vm14 = vcmp.ge.f32.partialorder %v3699_v31, 0.0017660139  ;;  %v1983_v59 = vadd.f32 %v1982_v47, %v1981_v46  ;;  %vm2080_vm15 = vcmp.ge.f32.partialorder %v3665_v3, 0.0014610422 }
  0xfe   : > { %1858 = vadd.xlane.f32.xlu1 %v1857_v19  ;;  %1879 = vadd.xlane.f32.xlu0 %v1878_v20  ;;  %vm2081_vm3 = vcmp.ge.f32.partialorder %v3699_v31, 0.0014610422  ;;  %v690_v62 = vrot.slane %v689_v34, 4  ;;  %v2004_v61 = vadd.f32 %v2003_v52, %v2002_v58  ;;  %v2023_v21 = vsel %vm674_vm1, %v2580_v49, 0.0 }
  0xff   : > { %v2024_v2 = vsel %vm674_vm1, %v2581_v57, 0.0  ;;  %v2044_v63 = vsel %vm674_vm1, %v2582_v56, 0.0  ;;  %v2045_v23 = vsel %vm674_vm1, %v2583_v51, 0.0  ;;  %v2584_v53 = vsel %vm2059_vm13, 1.0, %v3014_v12 }
 0x100   : > { %v2585_v1 = vsel %vm2060_vm14, 1.0, %v3014_v12  ;;  %v691_v6 = vadd.f32 %v690_v62, %v689_v34  ;;  %v2586_v11 = vsel %vm2080_vm15, 1.0, %v3014_v12  ;;  %v2587_v4 = vsel %vm2081_vm3, 1.0, %v3014_v12 }
 0x101   : > { %vm2101_vm2 = vcmp.ge.f32.partialorder %v3665_v3, 0.0012087357  ;;  %vm2102_vm4 = vcmp.ge.f32.partialorder %v3699_v31, 0.0012087357  ;;  %vm2122_vm5 = vcmp.ge.f32.partialorder %v3665_v3, 0.001  ;;  %v2025_v29 = vadd.f32 %v2024_v2, %v2023_v21 }
 0x102   : > { %1900 = vadd.xlane.f32.xlu1 %v1899_v41  ;;  %1921 = vadd.xlane.f32.xlu0 %v1920_v5  ;;  %vm2123_vm6 = vcmp.ge.f32.partialorder %v3699_v31, 0.001  ;;  %v692_v43 = vrot.slane %v691_v6, 2  ;;  %v2046_v8 = vadd.f32 %v2045_v23, %v2044_v63  ;;  %v2065_v7 = vsel %vm674_vm1, %v2584_v53, 0.0 }
 0x103   : > { %v2066_v9 = vsel %vm674_vm1, %v2585_v1, 0.0  ;;  %v2086_v0 = vsel %vm674_vm1, %v2586_v11, 0.0  ;;  %v2087_v14 = vsel %vm674_vm1, %v2587_v4, 0.0  ;;  %v2588_v30 = vsel %vm2101_vm2, 1.0, %v3014_v12 }
 0x104   : > { %v693_v22 = vadd.f32 %v692_v43, %v691_v6  ;;  %v2589_v55 = vsel %vm2102_vm4, 1.0, %v3014_v12  ;;  %v2590_v17 = vsel %vm2122_vm5, 1.0, %v3014_v12  ;;  %v2591_v13 = vsel %vm2123_vm6, 1.0, %v3014_v12 }
 0x105   : > { %v2067_v39 = vadd.f32 %v2066_v9, %v2065_v7  ;;  %v2088_v27 = vadd.f32 %v2087_v14, %v2086_v0  ;;  %v2107_v16 = vsel %vm674_vm1, %v2588_v30, 0.0  ;;  %v2108_v19 = vsel %vm674_vm1, %v2589_v55, 0.0 }
 0x106   : > { %1942 = vadd.xlane.f32.xlu1 %v1941_v26  ;;  %1963 = vadd.xlane.f32.xlu0 %v1962_v36  ;;  %v694_v10 = vrot.slane %v693_v22, 1  ;;  %v2128_v20 = vsel %vm674_vm1, %v2590_v17, 0.0  ;;  %v2129_v18 = vsel %vm674_vm1, %v2591_v13, 0.0  ;;  %v2109_v37 = vadd.f32 %v2108_v19, %v2107_v16 }
 0x107   : > { %v2130_v25 = vadd.f32 %v2129_v18, %v2128_v20  ;;  %v679_v24 = vlaneseq }
 0x108   : > { %v695_v15 = vadd.f32 %v694_v10, %v693_v22 }
 0x109   : > { %v3903_v38 = vand.u32 127, %v679_v24 }
 0x10a   : > { %1984 = vadd.xlane.f32.xlu1 %v1983_v59  ;;  %2005 = vadd.xlane.f32.xlu0 %v2004_v61  ;;  %2599 = vpush %v695_v15 }
 0x10b   : > { %vm697_vm7 = vcmp.eq.s32.totalorder %v3903_v38, 32  ;;  %vm720_vm8 = vcmp.eq.s32.totalorder %v3903_v38, 0  ;;  %vm744_vm0 = vcmp.eq.s32.totalorder %v3903_v38, 1  ;;  %vm768_vm9 = vcmp.eq.s32.totalorder %v3903_v38, 2 }
 0x10c   : > { %vm792_vm10 = vcmp.eq.s32.totalorder %v3903_v38, 3  ;;  %vm816_vm11 = vcmp.eq.s32.totalorder %v3903_v38, 4  ;;  %v3912_v26 = vsel %vm697_vm7, 1.0, %v3014_v12  ;;  %v3915_v36 = vsel %vm720_vm8, 1.0, %v3014_v12 }
 0x10d   : > { %vm840_vm12 = vcmp.eq.s32.totalorder %v3903_v38, 5  ;;  %v3922_v57 = vsel %vm744_vm0, 1.0, %v3014_v12  ;;  %v3927_v56 = vsel %vm768_vm9, 1.0, %v3014_v12  ;;  %v3932_v51 = vsel %vm792_vm10, 1.0, %v3014_v12 }
 0x10e   : > { %2026 = vadd.xlane.f32.xlu1 %v2025_v29  ;;  %2047 = vadd.xlane.f32.xlu0 %v2046_v8  ;;  %v3937_v59 = vsel %vm816_vm11, 1.0, %v3014_v12  ;;  %v3945_v53 = vsel %vm840_vm12, 1.0, %v3014_v12  ;;  %vm864_vm13 = vcmp.eq.s32.totalorder %v3903_v38, 6  ;;  %vm888_vm14 = vcmp.eq.s32.totalorder %v3903_v38, 7 }
 0x10f   : > { %4324 = vst [vmem:[#allocation9_spill] sm:$0xff] %v3937_v59  ;;  %4325 = vst [vmem:[#allocation10_spill] sm:$0xff] %v3945_v53  ;;  %vm912_vm15 = vcmp.eq.s32.totalorder %v3903_v38, 8  ;;  %v3968_v17 = vsel %vm864_vm13, 1.0, %v3014_v12  ;;  %vm936_vm3 = vcmp.eq.s32.totalorder %v3903_v38, 9  ;;  %v3974_v31 = vsel %vm888_vm14, 1.0, %v3014_v12 }
 0x110   : > { %v3979_v19 = vsel %vm912_vm15, 1.0, %v3014_v12  ;;  %vm960_vm1 = vcmp.eq.s32.totalorder %v3903_v38, 10  ;;  %vm984_vm2 = vcmp.eq.s32.totalorder %v3903_v38, 11  ;;  %vm1008_vm4 = vcmp.eq.s32.totalorder %v3903_v38, 12 }
 0x111   : > { %vm1032_vm5 = vcmp.eq.s32.totalorder %v3903_v38, 13  ;;  %vm1056_vm6 = vcmp.eq.s32.totalorder %v3903_v38, 14  ;;  %vm1080_vm7 = vcmp.eq.s32.totalorder %v3903_v38, 15  ;;  %vm1104_vm8 = vcmp.eq.s32.totalorder %v3903_v38, 16 }
 0x112   : > { %2068 = vadd.xlane.f32.xlu1 %v2067_v39  ;;  %2089 = vadd.xlane.f32.xlu0 %v2088_v27  ;;  %vm1128_vm0 = vcmp.eq.s32.totalorder %v3903_v38, 17  ;;  %vm1152_vm9 = vcmp.eq.s32.totalorder %v3903_v38, 18  ;;  %vm1176_vm10 = vcmp.eq.s32.totalorder %v3903_v38, 19  ;;  %vm1200_vm11 = vcmp.eq.s32.totalorder %v3903_v38, 20 }
 0x113   : > { %vm1224_vm12 = vcmp.eq.s32.totalorder %v3903_v38, 21  ;;  %vm1248_vm13 = vcmp.eq.s32.totalorder %v3903_v38, 22  ;;  %vm1272_vm14 = vcmp.eq.s32.totalorder %v3903_v38, 23  ;;  %vm1296_vm15 = vcmp.eq.s32.totalorder %v3903_v38, 24 }
 0x116   : > { %2110 = vadd.xlane.f32.xlu1 %v2109_v37  ;;  %2131 = vadd.xlane.f32.xlu0 %v2130_v25 }
 0x123   : > { %v736_v35 = vpop.xlane.xlu1 %735  ;;  %v712_v33 = vpop.xlane.xlu0 %711 }
 0x124   : > { %v737_v41 = vrot.slane %v736_v35, 4  ;;  %v713_v5 = vrot.slane %v712_v33, 4 }
 0x126   : > { %v738_v28 = vadd.f32 %v737_v41, %v736_v35  ;;  %v714_v42 = vadd.f32 %v713_v5, %v712_v33 }
 0x127   : > { %v760_v40 = vpop.xlane.xlu1 %759  ;;  %v784_v48 = vpop.xlane.xlu0 %783 }
 0x128   : > { %v739_v32 = vrot.slane %v738_v28, 2  ;;  %v715_v50 = vrot.slane %v714_v42, 2  ;;  %v761_v54 = vrot.slane %v760_v40, 4  ;;  %v785_v44 = vrot.slane %v784_v48, 4 }
 0x12a   : > { %v762_v46 = vadd.f32 %v761_v54, %v760_v40  ;;  %v786_v47 = vadd.f32 %v785_v44, %v784_v48  ;;  %v716_v58 = vadd.f32 %v715_v50, %v714_v42  ;;  %v740_v34 = vadd.f32 %v739_v32, %v738_v28 }
 0x12b   : > { %v808_v52 = vpop.xlane.xlu1 %807  ;;  %v832_v49 = vpop.xlane.xlu0 %831  ;;  %v3986_v32 = vsel %vm936_vm3, 1.0, %v3014_v12  ;;  %vm1320_vm3 = vcmp.eq.s32.totalorder %v3903_v38, 25 }
 0x12c   : > { %v763_v62 = vrot.slane %v762_v46, 2  ;;  %v787_v61 = vrot.slane %v786_v47, 2  ;;  %v809_v21 = vrot.slane %v808_v52, 4  ;;  %v833_v2 = vrot.slane %v832_v49, 4 }
 0x12d   : > { %v717_v63 = vrot.slane %v716_v58, 1  ;;  %v741_v23 = vrot.slane %v740_v34, 1 }
 0x12e   : > { %v810_v1 = vadd.f32 %v809_v21, %v808_v52  ;;  %v834_v6 = vadd.f32 %v833_v2, %v832_v49  ;;  %v764_v11 = vadd.f32 %v763_v62, %v762_v46  ;;  %v788_v4 = vadd.f32 %v787_v61, %v786_v47 }
 0x12f   : > { %v856_v43 = vpop.xlane.xlu1 %855  ;;  %v880_v29 = vpop.xlane.xlu0 %879  ;;  %v718_v8 = vadd.f32 %v717_v63, %v716_v58  ;;  %v742_v7 = vadd.f32 %v741_v23, %v740_v34  ;;  %v3992_v34 = vsel %vm960_vm1, 1.0, %v3014_v12  ;;  %v3997_v52 = vsel %vm984_vm2, 1.0, %v3014_v12 }
 0x130   : > { %v811_v9 = vrot.slane %v810_v1, 2  ;;  %v835_v0 = vrot.slane %v834_v6, 2  ;;  %v857_v14 = vrot.slane %v856_v43, 4  ;;  %v881_v30 = vrot.slane %v880_v29, 4 }
 0x131   : > { %2601 = vpush %v718_v8  ;;  %v765_v22 = vrot.slane %v764_v11, 1  ;;  %v789_v55 = vrot.slane %v788_v4, 1  ;;  %vm1344_vm1 = vcmp.eq.s32.totalorder %v3903_v38, 26  ;;  %vm1368_vm2 = vcmp.eq.s32.totalorder %v3903_v38, 27 }
 0x132   : > { %v858_v45 = vadd.f32 %v857_v14, %v856_v43  ;;  %v882_v13 = vadd.f32 %v881_v30, %v880_v29  ;;  %2603 = vpush %v742_v7  ;;  %v812_v60 = vadd.f32 %v811_v9, %v810_v1  ;;  %v836_v10 = vadd.f32 %v835_v0, %v834_v6 }
 0x133   : > { %v904_v39 = vpop.xlane.xlu1 %903  ;;  %v928_v3 = vpop.xlane.xlu0 %927  ;;  %v766_v27 = vadd.f32 %v765_v22, %v764_v11  ;;  %v790_v16 = vadd.f32 %v789_v55, %v788_v4  ;;  %v4002_v6 = vsel %vm1008_vm4, 1.0, %v3014_v12  ;;  %vm1392_vm4 = vcmp.eq.s32.totalorder %v3903_v38, 28 }
 0x134   : > { %v859_v20 = vrot.slane %v858_v45, 2  ;;  %v883_v18 = vrot.slane %v882_v13, 2  ;;  %v905_v15 = vrot.slane %v904_v39, 4  ;;  %v929_v37 = vrot.slane %v928_v3, 4 }
 0x135   : > { %2605 = vpush %v766_v27  ;;  %v813_v25 = vrot.slane %v812_v60, 1  ;;  %v837_v24 = vrot.slane %v836_v10, 1 }
 0x136   : > { %v906_v35 = vadd.f32 %v905_v15, %v904_v39  ;;  %v930_v33 = vadd.f32 %v929_v37, %v928_v3  ;;  %2607 = vpush %v790_v16  ;;  %v860_v41 = vadd.f32 %v859_v20, %v858_v45  ;;  %v884_v5 = vadd.f32 %v883_v18, %v882_v13 }
 0x137   : > { %v952_v28 = vpop.xlane.xlu1 %951  ;;  %v976_v42 = vpop.xlane.xlu0 %975  ;;  %v814_v40 = vadd.f32 %v813_v25, %v812_v60  ;;  %v838_v48 = vadd.f32 %v837_v24, %v836_v10  ;;  %v4010_v60 = vsel %vm1032_vm5, 1.0, %v3014_v12  ;;  %v4016_v18 = vsel %vm1056_vm6, 1.0, %v3014_v12 }
 0x138   : > { %v907_v50 = vrot.slane %v906_v35, 2  ;;  %v931_v54 = vrot.slane %v930_v33, 2  ;;  %v953_v44 = vrot.slane %v952_v28, 4  ;;  %v977_v46 = vrot.slane %v976_v42, 4  ;;  %4326 = vst [vmem:[#allocation11_spill] sm:$0xff] %v4016_v18 }
 0x139   : > { %2609 = vpush %v814_v40  ;;  %v861_v47 = vrot.slane %v860_v41, 1  ;;  %v885_v58 = vrot.slane %v884_v5, 1  ;;  %v4021_v15 = vsel %vm1080_vm7, 1.0, %v3014_v12  ;;  %vm1416_vm5 = vcmp.eq.s32.totalorder %v3903_v38, 29 }
 0x13a   : > { %v954_v49 = vadd.f32 %v953_v44, %v952_v28  ;;  %v978_v62 = vadd.f32 %v977_v46, %v976_v42  ;;  %2611 = vpush %v838_v48  ;;  %v908_v61 = vadd.f32 %v907_v50, %v906_v35  ;;  %v932_v21 = vadd.f32 %v931_v54, %v930_v33 }
 0x13b   : > { %v1000_v2 = vpop.xlane.xlu1 %999  ;;  %v1024_v63 = vpop.xlane.xlu0 %1023  ;;  %v862_v23 = vadd.f32 %v861_v47, %v860_v41  ;;  %v886_v1 = vadd.f32 %v885_v58, %v884_v5  ;;  %4327 = vst [vmem:[#allocation12_spill] sm:$0xff] %v4021_v15  ;;  %v4026_v42 = vsel %vm1104_vm8, 1.0, %v3014_v12  ;;  %s4101_s1 = spop %2599  ;;  %vm1440_vm6 = vcmp.eq.s32.totalorder %v3903_v38, 30 }
 0x13c   : > { %v955_v11 = vrot.slane %v954_v49, 2  ;;  %v979_v4 = vrot.slane %v978_v62, 2  ;;  %v1001_v43 = vrot.slane %v1000_v2, 4  ;;  %v1025_v29 = vrot.slane %v1024_v63, 4 }
 0x13d   : > { %2613 = vpush %v862_v23  ;;  %v909_v8 = vrot.slane %v908_v61, 1  ;;  %v933_v7 = vrot.slane %v932_v21, 1  ;;  %v4034_v23 = vsel %vm1128_vm0, 1.0, %v3014_v12  ;;  %vm1464_vm7 = vcmp.eq.s32.totalorder %v3903_v38, 31 }
 0x13e   : > { %v1002_v9 = vadd.f32 %v1001_v43, %v1000_v2  ;;  %v1026_v0 = vadd.f32 %v1025_v29, %v1024_v63  ;;  %2615 = vpush %v886_v1  ;;  %v956_v14 = vadd.f32 %v955_v11, %v954_v49  ;;  %v980_v30 = vadd.f32 %v979_v4, %v978_v62 }
 0x13f   : > { %v1048_v22 = vpop.xlane.xlu1 %1047  ;;  %v1072_v55 = vpop.xlane.xlu0 %1071  ;;  %v910_v45 = vadd.f32 %v909_v8, %v908_v61  ;;  %v934_v13 = vadd.f32 %v933_v7, %v932_v21  ;;  %v4040_v7 = vsel %vm1152_vm9, 1.0, %v3014_v12 }
 0x140   : > { %v1003_v10 = vrot.slane %v1002_v9, 2  ;;  %v1027_v39 = vrot.slane %v1026_v0, 2  ;;  %v1049_v3 = vrot.slane %v1048_v22, 4  ;;  %v1073_v27 = vrot.slane %v1072_v55, 4 }
 0x141   : > { %2617 = vpush %v910_v45  ;;  %v957_v16 = vrot.slane %v956_v14, 1  ;;  %v981_v20 = vrot.slane %v980_v30, 1 }
 0x142   : > { %v1050_v37 = vadd.f32 %v1049_v3, %v1048_v22  ;;  %v1074_v25 = vadd.f32 %v1073_v27, %v1072_v55  ;;  %2619 = vpush %v934_v13  ;;  %v1004_v24 = vadd.f32 %v1003_v10, %v1002_v9  ;;  %v1028_v35 = vadd.f32 %v1027_v39, %v1026_v0 }
 0x143   : > { %v1096_v33 = vpop.xlane.xlu1 %1095  ;;  %v1120_v41 = vpop.xlane.xlu0 %1119  ;;  %v958_v5 = vadd.f32 %v957_v16, %v956_v14  ;;  %v982_v28 = vadd.f32 %v981_v20, %v980_v30  ;;  %v4045_v9 = vsel %vm1176_vm10, 1.0, %v3014_v12  ;;  %v4050_v39 = vsel %vm1200_vm11, 1.0, %v3014_v12 }
 0x144   : > { %v1051_v40 = vrot.slane %v1050_v37, 2  ;;  %v1075_v48 = vrot.slane %v1074_v25, 2  ;;  %v1097_v50 = vrot.slane %v1096_v33, 4  ;;  %v1121_v54 = vrot.slane %v1120_v41, 4  ;;  %4328 = vst [vmem:[#allocation13_spill] sm:$0xff] %v4045_v9 }
 0x145   : > { %2621 = vpush %v958_v5  ;;  %v1005_v44 = vrot.slane %v1004_v24, 1  ;;  %v1029_v46 = vrot.slane %v1028_v35, 1 }
 0x146   : > { %v1098_v47 = vadd.f32 %v1097_v50, %v1096_v33  ;;  %v1122_v58 = vadd.f32 %v1121_v54, %v1120_v41  ;;  %2623 = vpush %v982_v28  ;;  %v1052_v49 = vadd.f32 %v1051_v40, %v1050_v37  ;;  %v1076_v62 = vadd.f32 %v1075_v48, %v1074_v25 }
 0x147   : > { %v1144_v61 = vpop.xlane.xlu1 %1143  ;;  %v1168_v21 = vpop.xlane.xlu0 %1167  ;;  %v1006_v2 = vadd.f32 %v1005_v44, %v1004_v24  ;;  %v1030_v63 = vadd.f32 %v1029_v46, %v1028_v35  ;;  %v4058_v50 = vsel %vm1224_vm12, 1.0, %v3014_v12 }
 0x148   : > { %v1099_v1 = vrot.slane %v1098_v47, 2  ;;  %v1123_v11 = vrot.slane %v1122_v58, 2  ;;  %v1145_v4 = vrot.slane %v1144_v61, 4  ;;  %v1169_v43 = vrot.slane %v1168_v21, 4 }
 0x149   : > { %2625 = vpush %v1006_v2  ;;  %v1053_v29 = vrot.slane %v1052_v49, 1  ;;  %v1077_v8 = vrot.slane %v1076_v62, 1 }
 0x14a   : > { %v1146_v0 = vadd.f32 %v1145_v4, %v1144_v61  ;;  %v1170_v14 = vadd.f32 %v1169_v43, %v1168_v21  ;;  %2627 = vpush %v1030_v63  ;;  %v1100_v30 = vadd.f32 %v1099_v1, %v1098_v47  ;;  %v1124_v22 = vadd.f32 %v1123_v11, %v1122_v58 }
 0x14b   : > { %v1192_v55 = vpop.xlane.xlu1 %1191  ;;  %v1216_v45 = vpop.xlane.xlu0 %1215  ;;  %v1054_v13 = vadd.f32 %v1053_v29, %v1052_v49  ;;  %v1078_v10 = vadd.f32 %v1077_v8, %v1076_v62  ;;  %v4064_v62 = vsel %vm1248_vm13, 1.0, %v3014_v12  ;;  %v4069_v61 = vsel %vm1272_vm14, 1.0, %v3014_v12 }
 0x14c   : > { %v1147_v3 = vrot.slane %v1146_v0, 2  ;;  %v1171_v27 = vrot.slane %v1170_v14, 2  ;;  %v1193_v16 = vrot.slane %v1192_v55, 4  ;;  %v1217_v20 = vrot.slane %v1216_v45, 4  ;;  %4329 = vst [vmem:[#allocation14_spill] sm:$0xff] %v4069_v61 }
 0x14d   : > { %2629 = vpush %v1054_v13  ;;  %v1101_v37 = vrot.slane %v1100_v30, 1  ;;  %v1125_v25 = vrot.slane %v1124_v22, 1  ;;  %v4074_v8 = vsel %vm1296_vm15, 1.0, %v3014_v12 }
 0x14e   : > { %v1194_v24 = vadd.f32 %v1193_v16, %v1192_v55  ;;  %v1218_v35 = vadd.f32 %v1217_v20, %v1216_v45  ;;  %2631 = vpush %v1078_v10  ;;  %v1148_v33 = vadd.f32 %v1147_v3, %v1146_v0  ;;  %v1172_v41 = vadd.f32 %v1171_v27, %v1170_v14 }
 0x14f   : > { %v1240_v5 = vpop.xlane.xlu1 %1239  ;;  %v1264_v28 = vpop.xlane.xlu0 %1263  ;;  %v1102_v40 = vadd.f32 %v1101_v37, %v1100_v30  ;;  %v1126_v48 = vadd.f32 %v1125_v25, %v1124_v22 }
 0x150   : > { %v1195_v54 = vrot.slane %v1194_v24, 2  ;;  %v1219_v44 = vrot.slane %v1218_v35, 2  ;;  %v1241_v46 = vrot.slane %v1240_v5, 4  ;;  %v1265_v47 = vrot.slane %v1264_v28, 4 }
 0x151   : > { %2633 = vpush %v1102_v40  ;;  %v1149_v58 = vrot.slane %v1148_v33, 1  ;;  %v1173_v49 = vrot.slane %v1172_v41, 1 }
 0x152   : > { %v1242_v21 = vadd.f32 %v1241_v46, %v1240_v5  ;;  %v1266_v2 = vadd.f32 %v1265_v47, %v1264_v28  ;;  %2635 = vpush %v1126_v48  ;;  %v1196_v63 = vadd.f32 %v1195_v54, %v1194_v24  ;;  %v1220_v1 = vadd.f32 %v1219_v44, %v1218_v35 }
 0x153   : > { %v1288_v11 = vpop.xlane.xlu1 %1287  ;;  %v1312_v4 = vpop.xlane.xlu0 %1311  ;;  %v1150_v43 = vadd.f32 %v1149_v58, %v1148_v33  ;;  %v1174_v29 = vadd.f32 %v1173_v49, %v1172_v41  ;;  %v4082_v24 = vsel %vm1320_vm3, 1.0, %v3014_v12  ;;  %v4088_v48 = vsel %vm1344_vm1, 1.0, %v3014_v12 }
 0x154   : > { %v1243_v0 = vrot.slane %v1242_v21, 2  ;;  %v1267_v14 = vrot.slane %v1266_v2, 2  ;;  %v1289_v30 = vrot.slane %v1288_v11, 4  ;;  %v1313_v22 = vrot.slane %v1312_v4, 4 }
 0x155   : > { %2637 = vpush %v1150_v43  ;;  %v1197_v55 = vrot.slane %v1196_v63, 1  ;;  %v1221_v45 = vrot.slane %v1220_v1, 1  ;;  %v4093_v54 = vsel %vm1368_vm2, 1.0, %v3014_v12 }
 0x156   : > { %v1290_v13 = vadd.f32 %v1289_v30, %v1288_v11  ;;  %v1314_v10 = vadd.f32 %v1313_v22, %v1312_v4  ;;  %2639 = vpush %v1174_v29  ;;  %v1244_v3 = vadd.f32 %v1243_v0, %v1242_v21  ;;  %v1268_v27 = vadd.f32 %v1267_v14, %v1266_v2 }
 0x157   : > { %v1336_v16 = vpop.xlane.xlu1 %1335  ;;  %v1360_v20 = vpop.xlane.xlu0 %1359  ;;  %v1198_v37 = vadd.f32 %v1197_v55, %v1196_v63  ;;  %v1222_v25 = vadd.f32 %v1221_v45, %v1220_v1  ;;  %v4098_v1 = vsel %vm1392_vm4, 1.0, %v3014_v12 }
 0x158   : > { %v1291_v35 = vrot.slane %v1290_v13, 2  ;;  %v1315_v33 = vrot.slane %v1314_v10, 2  ;;  %v1337_v41 = vrot.slane %v1336_v16, 4  ;;  %v1361_v5 = vrot.slane %v1360_v20, 4 }
 0x159   : > { %2641 = vpush %v1198_v37  ;;  %v1245_v28 = vrot.slane %v1244_v3, 1  ;;  %v1269_v40 = vrot.slane %v1268_v27, 1 }
 0x15a   : > { %v1338_v44 = vadd.f32 %v1337_v41, %v1336_v16  ;;  %v1362_v46 = vadd.f32 %v1361_v5, %v1360_v20  ;;  %2643 = vpush %v1222_v25  ;;  %v1292_v47 = vadd.f32 %v1291_v35, %v1290_v13  ;;  %v1316_v58 = vadd.f32 %v1315_v33, %v1314_v10 }
 0x15b   : > { %v1384_v49 = vpop.xlane.xlu1 %1383  ;;  %v1408_v21 = vpop.xlane.xlu0 %1407  ;;  %v1246_v2 = vadd.f32 %v1245_v28, %v1244_v3  ;;  %v1270_v63 = vadd.f32 %v1269_v40, %v1268_v27  ;;  %v700_v13 = vstv %s4101_s1  ;;  %v4109_v20 = vsel %vm1416_vm5, 1.0, %v3014_v12 }
 0x15c   : > { %v1339_v11 = vrot.slane %v1338_v44, 2  ;;  %v1363_v4 = vrot.slane %v1362_v46, 2  ;;  %v1385_v43 = vrot.slane %v1384_v49, 4  ;;  %v1409_v29 = vrot.slane %v1408_v21, 4 }
 0x15d   : > { %2645 = vpush %v1246_v2  ;;  %v1293_v0 = vrot.slane %v1292_v47, 1  ;;  %v1317_v14 = vrot.slane %v1316_v58, 1  ;;  %v4114_v28 = vsel %vm1440_vm6, 1.0, %v3014_v12  ;;  %v4119_v40 = vsel %vm1464_vm7, 1.0, %v3014_v12 }
 0x15e   : > { %v1386_v30 = vadd.f32 %v1385_v43, %v1384_v49  ;;  %v1410_v22 = vadd.f32 %v1409_v29, %v1408_v21  ;;  %2647 = vpush %v1270_v63  ;;  %v1340_v55 = vadd.f32 %v1339_v11, %v1338_v44  ;;  %v1364_v45 = vadd.f32 %v1363_v4, %v1362_v46 }
 0x15f   : > { %v1432_v10 = vpop.xlane.xlu1 %1431  ;;  %v1456_v3 = vpop.xlane.xlu0 %1455  ;;  %v1294_v27 = vadd.f32 %v1293_v0, %v1292_v47  ;;  %v1318_v16 = vadd.f32 %v1317_v14, %v1316_v58  ;;  %v4122_v49 = vmul.f32 %v3912_v26, %v700_v13 }
 0x160   : > { %v1387_v37 = vrot.slane %v1386_v30, 2  ;;  %v1411_v25 = vrot.slane %v1410_v22, 2  ;;  %v1433_v35 = vrot.slane %v1432_v10, 4  ;;  %v1457_v33 = vrot.slane %v1456_v3, 4 }
 0x161   : > { %2649 = vpush %v1294_v27  ;;  %v1341_v41 = vrot.slane %v1340_v55, 1  ;;  %v1365_v5 = vrot.slane %v1364_v45, 1 }
 0x162   : > { %v1434_v44 = vadd.f32 %v1433_v35, %v1432_v10  ;;  %v1458_v46 = vadd.f32 %v1457_v33, %v1456_v3  ;;  %2651 = vpush %v1318_v16  ;;  %s2602_s27 = spop %2601  ;;  %v1388_v47 = vadd.f32 %v1387_v37, %v1386_v30  ;;  %v1412_v58 = vadd.f32 %v1411_v25, %v1410_v22 }
 0x163   : > { %v723_v21 = vstv %s2602_s27  ;;  %s2604_s14 = spop %2603  ;;  %v1481_v2 = vpop.xlane.xlu1 %1480  ;;  %v1502_v63 = vpop.xlane.xlu0 %1501  ;;  %v1342_v11 = vadd.f32 %v1341_v41, %v1340_v55  ;;  %v1366_v4 = vadd.f32 %v1365_v5, %v1364_v45 }
 0x164   : > { %v1435_v43 = vrot.slane %v1434_v44, 2  ;;  %v1459_v29 = vrot.slane %v1458_v46, 2  ;;  %v724_v12 = vmul.f32 %v3915_v36, %v723_v21  ;;  %v747_v38 = vstv %s2604_s14 }
 0x165   : > { %v748_v0 = vmul.f32 %v3922_v57, %v747_v38  ;;  %v1482_v14 = vrot.slane %v1481_v2, 4  ;;  %v1503_v10 = vrot.slane %v1502_v63, 4  ;;  %2653 = vpush %v1342_v11  ;;  %v1389_v30 = vrot.slane %v1388_v47, 1 }
 0x166   : > { %v725_v26 = vadd.f32 %v724_v12, %v4122_v49  ;;  %2655 = vpush %v1366_v4  ;;  %s2606_s24 = spop %2605  ;;  %v1413_v22 = vrot.slane %v1412_v58, 1  ;;  %v1436_v13 = vadd.f32 %v1435_v43, %v1434_v44  ;;  %v1460_v3 = vadd.f32 %v1459_v29, %v1458_v46 }
 0x167   : > { %v1483_v55 = vadd.f32 %v1482_v14, %v1481_v2  ;;  %v1504_v45 = vadd.f32 %v1503_v10, %v1502_v63  ;;  %v771_v27 = vstv %s2606_s24  ;;  %s2608_s16 = spop %2607  ;;  %v1523_v16 = vpop.xlane.xlu1 %1522  ;;  %v1544_v37 = vpop.xlane.xlu0 %1543  ;;  %v1390_v25 = vadd.f32 %v1389_v30, %v1388_v47 }
 0x168   : > { %v749_v35 = vadd.f32 %v748_v0, %v725_v26  ;;  %v772_v33 = vmul.f32 %v3927_v56, %v771_v27  ;;  %v795_v41 = vstv %s2608_s16  ;;  %v1524_v5 = vrot.slane %v1523_v16, 4 }
 0x169   : > { %v1484_v21 = vrot.slane %v1483_v55, 2  ;;  %v1505_v11 = vrot.slane %v1504_v45, 2  ;;  %v796_v4 = vmul.f32 %v3932_v51, %v795_v41  ;;  %v1545_v12 = vrot.slane %v1544_v37, 4  ;;  %2657 = vpush %v1390_v25 }
 0x16a   : > { %v773_v44 = vadd.f32 %v772_v33, %v749_v35  ;;  %v1525_v46 = vadd.f32 %v1524_v5, %v1523_v16  ;;  %v1414_v2 = vadd.f32 %v1413_v22, %v1412_v58  ;;  %s2610_s18 = spop %2609  ;;  %v1437_v63 = vrot.slane %v1436_v13, 1 }
 0x16b   : > { %v1546_v43 = vadd.f32 %v1545_v12, %v1544_v37  ;;  %v819_v29 = vstv %s2610_s18  ;;  %s2612_s26 = spop %2611  ;;  %v1565_v47 = vpop.xlane.xlu1 %1564  ;;  %v1586_v38 = vpop.xlane.xlu0 %1585  ;;  %v1461_v0 = vrot.slane %v1460_v3, 1  ;;  %v1485_v14 = vadd.f32 %v1484_v21, %v1483_v55 }
 0x16c   : > { %v797_v10 = vadd.f32 %v796_v4, %v773_v44  ;;  %v1526_v30 = vrot.slane %v1525_v46, 2  ;;  %2659 = vpush %v1414_v2  ;;  %v820_v26 = vmul.f32 %v3937_v59, %v819_v29  ;;  %v843_v27 = vstv %s2612_s26 }
 0x16d   : > { %v1547_v41 = vrot.slane %v1546_v43, 2  ;;  %v844_v25 = vmul.f32 %v3945_v53, %v843_v27  ;;  %v1566_v16 = vrot.slane %v1565_v47, 4  ;;  %v1587_v58 = vrot.slane %v1586_v38, 4 }
 0x16e   : > { %v821_v22 = vadd.f32 %v820_v26, %v797_v10  ;;  %v1438_v35 = vadd.f32 %v1437_v63, %v1436_v13  ;;  %v1462_v37 = vadd.f32 %v1461_v0, %v1460_v3  ;;  %s2614_s0 = spop %2613  ;;  %v1486_v33 = vrot.slane %v1485_v14, 1 }
 0x16f   : > { %v1567_v5 = vadd.f32 %v1566_v16, %v1565_v47  ;;  %v4131_v12 = vadd.f32 %v1587_v58, %v1586_v38  ;;  %v867_v55 = vstv %s2614_s0  ;;  %s2616_s8 = spop %2615  ;;  %v1607_v21 = vpop.xlane.xlu1 %1606  ;;  %v1628_v4 = vpop.xlane.xlu0 %1627  ;;  %v1506_v44 = vadd.f32 %v1505_v11, %v1504_v45 }
 0x170   : > { %v845_v2 = vadd.f32 %v844_v25, %v821_v22  ;;  %2661 = vpush %v1438_v35  ;;  %v868_v29 = vmul.f32 %v3968_v17, %v867_v55  ;;  %v891_v27 = vstv %s2616_s8  ;;  %v1608_v53 = vrot.slane %v1607_v21, 4 }
 0x171   : > { %v1568_v59 = vrot.slane %v1567_v5, 2  ;;  %v1589_v13 = vrot.slane %v4131_v12, 2  ;;  %2663 = vpush %v1462_v37  ;;  %v892_v3 = vmul.f32 %v3974_v31, %v891_v27  ;;  %v1629_v63 = vrot.slane %v1628_v4, 4 }
 0x172   : > { %v869_v47 = vadd.f32 %v868_v29, %v845_v2  ;;  %v1609_v38 = vadd.f32 %v1608_v53, %v1607_v21  ;;  %v1487_v0 = vadd.f32 %v1486_v33, %v1485_v14  ;;  %v1507_v10 = vrot.slane %v1506_v44, 1  ;;  %s2618_s15 = spop %2617 }
 0x173   : > { %v4136_v26 = vadd.f32 %v1629_v63, %v1628_v4  ;;  %v915_v45 = vstv %s2618_s15  ;;  %s2620_s9 = spop %2619  ;;  %v1649_v11 = vpop.xlane.xlu1 %1648  ;;  %v1670_v25 = vpop.xlane.xlu0 %1669  ;;  %v1527_v16 = vadd.f32 %v1526_v30, %v1525_v46  ;;  %v1548_v58 = vadd.f32 %v1547_v41, %v1546_v43 }
 0x174   : > { %v893_v22 = vadd.f32 %v892_v3, %v869_v47  ;;  %v1610_v35 = vrot.slane %v1609_v38, 2  ;;  %2665 = vpush %v1487_v0  ;;  %v1508_v37 = vadd.f32 %v1507_v10, %v1506_v44  ;;  %v916_v55 = vmul.f32 %v3979_v19, %v915_v45 }
 0x175   : > { %v1631_v2 = vrot.slane %v4136_v26, 2  ;;  %v939_v53 = vstv %s2620_s9  ;;  %v1650_v14 = vrot.slane %v1649_v11, 4  ;;  %v1671_v33 = vrot.slane %v1670_v25, 4 }
 0x176   : > { %2667 = vpush %v1508_v37  ;;  %v917_v21 = vadd.f32 %v916_v55, %v893_v22  ;;  %v940_v4 = vmul.f32 %v3986_v32, %v939_v53  ;;  %v1528_v29 = vrot.slane %v1527_v16, 1  ;;  %v1549_v27 = vrot.slane %v1548_v58, 1  ;;  %s2622_s10 = spop %2621 }
 0x177   : > { %v4141_v46 = vadd.f32 %v1650_v14, %v1649_v11  ;;  %v4143_v43 = vadd.f32 %v1671_v33, %v1670_v25  ;;  %v963_v30 = vstv %s2622_s10  ;;  %s2624_s6 = spop %2623  ;;  %v1691_v41 = vpop.xlane.xlu1 %1690  ;;  %v1712_v44 = vpop.xlane.xlu0 %1711  ;;  %v1569_v3 = vadd.f32 %v1568_v59, %v1567_v5 }
 0x178   : > { %v941_v63 = vadd.f32 %v940_v4, %v917_v21  ;;  %v1529_v47 = vadd.f32 %v1528_v29, %v1527_v16  ;;  %v1550_v0 = vadd.f32 %v1549_v27, %v1548_v58  ;;  %v964_v10 = vmul.f32 %v3992_v34, %v963_v30 }
 0x179   : > { %v1652_v45 = vrot.slane %v4141_v46, 2  ;;  %v1673_v22 = vrot.slane %v4143_v43, 2  ;;  %v987_v37 = vstv %s2624_s6  ;;  %v1692_v55 = vrot.slane %v1691_v41, 4 }
 0x17a   : > { %2669 = vpush %v1529_v47  ;;  %v965_v11 = vadd.f32 %v964_v10, %v941_v63  ;;  %v988_v25 = vmul.f32 %v3997_v52, %v987_v37  ;;  %v1713_v53 = vrot.slane %v1712_v44, 4  ;;  %v1570_v14 = vrot.slane %v1569_v3, 1  ;;  %s2626_s28 = spop %2625 }
 0x17b   : > { %2671 = vpush %v1550_v0  ;;  %v4149_v59 = vadd.f32 %v1692_v55, %v1691_v41  ;;  %v1590_v5 = vadd.f32 %v1589_v13, %v4131_v12  ;;  %v1011_v16 = vstv %s2626_s28  ;;  %s2628_s30 = spop %2627  ;;  %v1733_v58 = vpop.xlane.xlu1 %1732  ;;  %v1754_v33 = vpop.xlane.xlu0 %1753  ;;  %v1611_v21 = vadd.f32 %v1610_v35, %v1609_v38  ;;  %s2400_s28 = sshll.u32 %s4344_s21, 1 }
 0x17c   : > { %v989_v4 = vadd.f32 %v988_v25, %v965_v11  ;;  %v4152_v29 = vadd.f32 %v1713_v53, %v1712_v44  ;;  %v1571_v27 = vadd.f32 %v1570_v14, %v1569_v3  ;;  %v1012_v30 = vmul.f32 %v4002_v6, %v1011_v16 }
 0x17d   : > { %v1694_v63 = vrot.slane %v4149_v59, 2  ;;  %v1591_v47 = vrot.slane %v1590_v5, 1  ;;  %v1035_v10 = vstv %s2628_s30  ;;  %v1734_v0 = vrot.slane %v1733_v58, 4 }
 0x17e   : > { %v1715_v41 = vrot.slane %v4152_v29, 2  ;;  %2673 = vpush %v1571_v27  ;;  %v1013_v12 = vadd.f32 %v1012_v30, %v989_v4  ;;  %v1036_v13 = vmul.f32 %v4010_v60, %v1035_v10  ;;  %v1755_v37 = vrot.slane %v1754_v33, 4  ;;  %s2630_s7 = spop %2629 }
 0x17f   : > { %v1592_v38 = vadd.f32 %v1591_v47, %v1590_v5  ;;  %v4158_v35 = vadd.f32 %v1734_v0, %v1733_v58  ;;  %v1612_v44 = vrot.slane %v1611_v21, 1  ;;  %v1632_v3 = vadd.f32 %v1631_v2, %v4136_v26  ;;  %s2632_s11 = spop %2631  ;;  %v1775_v55 = vpop.xlane.xlu1 %1774  ;;  %v1796_v11 = vpop.xlane.xlu0 %1795 }
 0x180   : > { %v1037_v25 = vadd.f32 %v1036_v13, %v1013_v12  ;;  %v4161_v53 = vadd.f32 %v1755_v37, %v1754_v33  ;;  %v1059_v14 = vstv %s2630_s7  ;;  %v1083_v16 = vstv %s2632_s11 }
 0x181   : > { %2675 = vpush %v1592_v38  ;;  %v1736_v4 = vrot.slane %v4158_v35, 2  ;;  %v1613_v27 = vadd.f32 %v1612_v44, %v1611_v21  ;;  %v1633_v30 = vrot.slane %v1632_v3, 1  ;;  %v1060_v5 = vmul.f32 %v4016_v18, %v1059_v14 }
 0x182   : > { %v1757_v58 = vrot.slane %v4161_v53, 2  ;;  %v1084_v47 = vmul.f32 %v4021_v15, %v1083_v16  ;;  %v1776_v26 = vrot.slane %v1775_v55, 4  ;;  %v1797_v2 = vrot.slane %v1796_v11, 4  ;;  %s2634_s13 = spop %2633 }
 0x183   : > { %2677 = vpush %v1613_v27  ;;  %v1634_v10 = vadd.f32 %v1633_v30, %v1632_v3  ;;  %v1061_v33 = vadd.f32 %v1060_v5, %v1037_v25  ;;  %v1653_v0 = vadd.f32 %v1652_v45, %v4141_v46  ;;  %v1674_v12 = vadd.f32 %v1673_v22, %v4143_v43  ;;  %s2636_s17 = spop %2635  ;;  %v1817_v13 = vpop.xlane.xlu1 %1816  ;;  %v1838_v21 = vpop.xlane.xlu0 %1837 }
 0x184   : > { %v4169_v37 = vadd.f32 %v1776_v26, %v1775_v55  ;;  %v4171_v38 = vadd.f32 %v1797_v2, %v1796_v11  ;;  %v1107_v44 = vstv %s2634_s13  ;;  %v1131_v14 = vstv %s2636_s17  ;;  %s4242_s13 = scalar_lea.vmem %s4305_s5, %s2400_s28 }
 0x185   : > { %2679 = vpush %v1634_v10  ;;  %v1085_v16 = vadd.f32 %v1084_v47, %v1061_v33  ;;  %v1654_v15 = vrot.slane %v1653_v0, 1  ;;  %v1675_v18 = vrot.slane %v1674_v12, 1  ;;  %v1108_v3 = vmul.f32 %v4026_v42, %v1107_v44 }
 0x186   : > { %v1778_v25 = vrot.slane %v4169_v37, 2  ;;  %v1799_v46 = vrot.slane %v4171_v38, 2  ;;  %v1132_v43 = vmul.f32 %v4034_v23, %v1131_v14  ;;  %v1818_v45 = vrot.slane %v1817_v13, 4  ;;  %s2638_s12 = spop %2637 }
 0x187   : > { %v1655_v22 = vadd.f32 %v1654_v15, %v1653_v0  ;;  %v1676_v55 = vadd.f32 %v1675_v18, %v1674_v12  ;;  %v1109_v11 = vadd.f32 %v1108_v3, %v1085_v16  ;;  %v1839_v27 = vrot.slane %v1838_v21, 4  ;;  %s2640_s1 = spop %2639  ;;  %v1859_v30 = vpop.xlane.xlu1 %1858  ;;  %v1880_v5 = vpop.xlane.xlu0 %1879 }
 0x188   : > { %v4177_v47 = vadd.f32 %v1818_v45, %v1817_v13  ;;  %v1695_v26 = vadd.f32 %v1694_v63, %v4149_v59  ;;  %v1716_v2 = vadd.f32 %v1715_v41, %v4152_v29  ;;  %v1155_v10 = vstv %s2638_s12 }
 0x189   : > { %2681 = vpush %v1655_v22  ;;  %v1133_v33 = vadd.f32 %v1132_v43, %v1109_v11  ;;  %v4181_v44 = vadd.f32 %v1839_v27, %v1838_v21  ;;  %v1156_v14 = vmul.f32 %v4040_v7, %v1155_v10  ;;  %v1179_v15 = vstv %s2640_s1 }
 0x18a   : > { %2683 = vpush %v1676_v55  ;;  %v1820_v18 = vrot.slane %v4177_v47, 2  ;;  %v1696_v0 = vrot.slane %v1695_v26, 1  ;;  %v1717_v12 = vrot.slane %v1716_v2, 1  ;;  %v1180_v13 = vmul.f32 %v4045_v9, %v1179_v15  ;;  %s2642_s27 = spop %2641 }
 0x18b   : > { %v1841_v59 = vrot.slane %v4181_v44, 2  ;;  %v1157_v63 = vadd.f32 %v1156_v14, %v1133_v33  ;;  %v1860_v29 = vrot.slane %v1859_v30, 4  ;;  %v1881_v41 = vrot.slane %v1880_v5, 4  ;;  %s2644_s14 = spop %2643  ;;  %v1901_v16 = vpop.xlane.xlu1 %1900  ;;  %v1922_v21 = vpop.xlane.xlu0 %1921 }
 0x18c   : > { %v1697_v3 = vadd.f32 %v1696_v0, %v1695_v26  ;;  %v1718_v43 = vadd.f32 %v1717_v12, %v1716_v2  ;;  %v1737_v45 = vadd.f32 %v1736_v4, %v4158_v35  ;;  %v1758_v22 = vadd.f32 %v1757_v58, %v4161_v53 }
 0x18d   : > { %v1181_v55 = vadd.f32 %v1180_v13, %v1157_v63  ;;  %v4189_v11 = vadd.f32 %v1860_v29, %v1859_v30  ;;  %v4191_v27 = vadd.f32 %v1881_v41, %v1880_v5  ;;  %v1203_v10 = vstv %s2642_s27 }
 0x18e   : > { %2685 = vpush %v1697_v3  ;;  %v1738_v15 = vrot.slane %v1737_v45, 1  ;;  %v1759_v33 = vrot.slane %v1758_v22, 1  ;;  %v1204_v14 = vmul.f32 %v4050_v39, %v1203_v10  ;;  %v1227_v9 = vstv %s2644_s14  ;;  %s2646_s24 = spop %2645 }
 0x18f   : > { %2687 = vpush %v1718_v43  ;;  %v1862_v26 = vrot.slane %v4189_v11, 2  ;;  %v1883_v35 = vrot.slane %v4191_v27, 2  ;;  %v1228_v53 = vmul.f32 %v4058_v50, %v1227_v9  ;;  %v1902_v4 = vrot.slane %v1901_v16, 4  ;;  %s2648_s16 = spop %2647  ;;  %v1943_v58 = vpop.xlane.xlu1 %1942  ;;  %v1964_v30 = vpop.xlane.xlu0 %1963 }
 0x190   : > { %v1739_v5 = vadd.f32 %v1738_v15, %v1737_v45  ;;  %v1760_v2 = vadd.f32 %v1759_v33, %v1758_v22  ;;  %v1205_v0 = vadd.f32 %v1204_v14, %v1181_v55  ;;  %v1923_v12 = vrot.slane %v1922_v21, 4 }
 0x191   : > { %v4197_v13 = vadd.f32 %v1902_v4, %v1901_v16  ;;  %v1779_v63 = vadd.f32 %v1778_v25, %v4169_v37  ;;  %v1800_v29 = vadd.f32 %v1799_v46, %v4171_v38  ;;  %v1251_v41 = vstv %s2646_s24 }
 0x192   : > { %2689 = vpush %v1739_v5  ;;  %v1229_v3 = vadd.f32 %v1228_v53, %v1205_v0  ;;  %v4201_v43 = vadd.f32 %v1923_v12, %v1922_v21  ;;  %v1252_v9 = vmul.f32 %v4064_v62, %v1251_v41  ;;  %v1275_v10 = vstv %s2648_s16  ;;  %s2650_s18 = spop %2649 }
 0x193   : > { %2691 = vpush %v1760_v2  ;;  %v1904_v45 = vrot.slane %v4197_v13, 2  ;;  %v1780_v22 = vrot.slane %v1779_v63, 1  ;;  %v1801_v55 = vrot.slane %v1800_v29, 1  ;;  %v1276_v16 = vmul.f32 %v4069_v61, %v1275_v10  ;;  %v1985_v15 = vpop.xlane.xlu1 %1984  ;;  %v2006_v37 = vpop.xlane.xlu0 %2005  ;;  %s2652_s26 = spop %2651 }
 0x194   : > { %v1925_v38 = vrot.slane %v4201_v43, 2  ;;  %v1253_v25 = vadd.f32 %v1252_v9, %v1229_v3  ;;  %v1944_v46 = vrot.slane %v1943_v58, 4  ;;  %v1965_v33 = vrot.slane %v1964_v30, 4 }
 0x195   : > { %v1781_v21 = vadd.f32 %v1780_v22, %v1779_v63  ;;  %v1802_v14 = vadd.f32 %v1801_v55, %v1800_v29  ;;  %v1821_v53 = vadd.f32 %v1820_v18, %v4177_v47  ;;  %v1842_v4 = vadd.f32 %v1841_v59, %v4181_v44 }
 0x196   : > { %v1277_v5 = vadd.f32 %v1276_v16, %v1253_v25  ;;  %v4209_v2 = vadd.f32 %v1944_v46, %v1943_v58  ;;  %v4211_v0 = vadd.f32 %v1965_v33, %v1964_v30  ;;  %v1299_v12 = vstv %s2650_s18  ;;  %s2654_s0 = spop %2653 }
 0x197   : > { %2693 = vpush %v1781_v21  ;;  %v1822_v41 = vrot.slane %v1821_v53, 1  ;;  %v1843_v10 = vrot.slane %v1842_v4, 1  ;;  %v1300_v3 = vmul.f32 %v4074_v8, %v1299_v12  ;;  %v1323_v9 = vstv %s2652_s26  ;;  %v2027_v61 = vpop.xlane.xlu1 %2026  ;;  %v2048_v63 = vpop.xlane.xlu0 %2047  ;;  %s2656_s8 = spop %2655 }
 0x198   : > { %2695 = vpush %v1802_v14  ;;  %v1946_v47 = vrot.slane %v4209_v2, 2  ;;  %v1967_v44 = vrot.slane %v4211_v0, 2  ;;  %v1324_v18 = vmul.f32 %v4082_v24, %v1323_v9  ;;  %v1986_v59 = vrot.slane %v1985_v15, 4 }
 0x199   : > { %v1823_v58 = vadd.f32 %v1822_v41, %v1821_v53  ;;  %v1844_v30 = vadd.f32 %v1843_v10, %v1842_v4  ;;  %v1301_v29 = vadd.f32 %v1300_v3, %v1277_v5  ;;  %v2007_v22 = vrot.slane %v2006_v37, 4 }
 0x19a   : > { %v4217_v55 = vadd.f32 %v1986_v59, %v1985_v15  ;;  %v1863_v16 = vadd.f32 %v1862_v26, %v4189_v11  ;;  %v1884_v25 = vadd.f32 %v1883_v35, %v4191_v27  ;;  %v1347_v46 = vstv %s2654_s0  ;;  %s2658_s15 = spop %2657 }
 0x19b   : > { %2697 = vpush %v1823_v58  ;;  %v1325_v33 = vadd.f32 %v1324_v18, %v1301_v29  ;;  %v4221_v21 = vadd.f32 %v2007_v22, %v2006_v37  ;;  %v1348_v14 = vmul.f32 %v4088_v48, %v1347_v46  ;;  %v1371_v12 = vstv %s2656_s8  ;;  %v2069_v41 = vpop.xlane.xlu1 %2068  ;;  %v2090_v37 = vpop.xlane.xlu0 %2089 }
 0x19c   : > { %2699 = vpush %v1844_v30  ;;  %v1988_v53 = vrot.slane %v4217_v55, 2  ;;  %v1864_v4 = vrot.slane %v1863_v16, 1  ;;  %v1885_v5 = vrot.slane %v1884_v25, 1  ;;  %v1372_v15 = vmul.f32 %v4093_v54, %v1371_v12 }
 0x19d   : > { %v2009_v11 = vrot.slane %v4221_v21, 2  ;;  %v1349_v26 = vadd.f32 %v1348_v14, %v1325_v33  ;;  %v2028_v27 = vrot.slane %v2027_v61, 4  ;;  %v2049_v35 = vrot.slane %v2048_v63, 4  ;;  %s2660_s9 = spop %2659 }
 0x19e   : > { %v1865_v10 = vadd.f32 %v1864_v4, %v1863_v16  ;;  %v1886_v3 = vadd.f32 %v1885_v5, %v1884_v25  ;;  %v1905_v9 = vadd.f32 %v1904_v45, %v4197_v13  ;;  %v1926_v18 = vadd.f32 %v1925_v38, %v4201_v43 }
 0x19f   : > { %v1373_v59 = vadd.f32 %v1372_v15, %v1349_v26  ;;  %v2029_v58 = vadd.f32 %v2028_v27, %v2027_v61  ;;  %v4229_v30 = vadd.f32 %v2049_v35, %v2048_v63  ;;  %v1395_v29 = vstv %s2658_s15  ;;  %v2111_v26 = vpop.xlane.xlu1 %2110  ;;  %v2132_v27 = vpop.xlane.xlu0 %2131 }
 0x1a0   : > { %2701 = vpush %v1865_v10  ;;  %v1906_v22 = vrot.slane %v1905_v9, 1  ;;  %v1927_v46 = vrot.slane %v1926_v18, 1  ;;  %v1396_v33 = vmul.f32 %v4098_v1, %v1395_v29  ;;  %v1419_v14 = vstv %s2660_s9 }
 0x1a1   : > { %2703 = vpush %v1886_v3  ;;  %v2030_v12 = vrot.slane %v2029_v58, 2  ;;  %v2051_v16 = vrot.slane %v4229_v30, 2  ;;  %v1420_v25 = vmul.f32 %v4109_v20, %v1419_v14  ;;  %v2070_v13 = vrot.slane %v2069_v41, 4  ;;  %s2662_s10 = spop %2661 }
 0x1a2   : > { %v1907_v43 = vadd.f32 %v1906_v22, %v1905_v9  ;;  %v1928_v61 = vadd.f32 %v1927_v46, %v1926_v18  ;;  %v1397_v45 = vadd.f32 %v1396_v33, %v1373_v59  ;;  %v2091_v38 = vrot.slane %v2090_v37, 4  ;;  %s2664_s6 = spop %2663 }
 0x1a3   : > { %v2071_v63 = vadd.f32 %v2070_v13, %v2069_v41  ;;  %v1947_v4 = vadd.f32 %v1946_v47, %v4209_v2  ;;  %v1968_v5 = vadd.f32 %v1967_v44, %v4211_v0  ;;  %v1443_v15 = vstv %s2662_s10 }
 0x1a4   : > { %2705 = vpush %v1907_v43  ;;  %v1421_v35 = vadd.f32 %v1420_v25, %v1397_v45  ;;  %v2092_v10 = vadd.f32 %v2091_v38, %v2090_v37  ;;  %v1444_v3 = vmul.f32 %v4114_v28, %v1443_v15  ;;  %v1467_v29 = vstv %s2664_s6 }
 0x1a5   : > { %2707 = vpush %v1928_v61  ;;  %v2072_v9 = vrot.slane %v2071_v63, 2  ;;  %v1948_v18 = vrot.slane %v1947_v4, 1  ;;  %v1969_v59 = vrot.slane %v1968_v5, 1  ;;  %v1468_v41 = vmul.f32 %v4119_v40, %v1467_v29  ;;  %s2666_s30 = spop %2665 }
 0x1a6   : > { %v2093_v2 = vrot.slane %v2092_v10, 2  ;;  %v1445_v47 = vadd.f32 %v1444_v3, %v1421_v35  ;;  %v2112_v0 = vrot.slane %v2111_v26, 4  ;;  %v2133_v44 = vrot.slane %v2132_v27, 4 }
 0x1a7   : > { %v1949_v22 = vadd.f32 %v1948_v18, %v1947_v4  ;;  %v1970_v46 = vadd.f32 %v1969_v59, %v1968_v5  ;;  %v1989_v37 = vadd.f32 %v1988_v53, %v4217_v55  ;;  %v2010_v33 = vadd.f32 %v2009_v11, %v4221_v21  ;;  %s2668_s21 = spop %2667 }
 0x1a8   : > { %v1469_v14 = vadd.f32 %v1468_v41, %v1445_v47  ;;  %v2113_v25 = vadd.f32 %v2112_v0, %v2111_v26  ;;  %v2134_v13 = vadd.f32 %v2133_v44, %v2132_v27  ;;  %v1489_v43 = vstv %s2666_s30 }
 0x1a9   : > { %2709 = vpush %v1949_v22  ;;  %v1990_v61 = vrot.slane %v1989_v37, 1  ;;  %v2011_v45 = vrot.slane %v2010_v33, 1  ;;  %v1490_v38 = vmul.f32 %v3915_v36, %v1489_v43  ;;  %v1510_v4 = vstv %s2668_s21 }
 0x1aa   : > { %2711 = vpush %v1970_v46  ;;  %1470 = vst [vmem:[%s4242_s13] sm:$0x1] %v1469_v14  ;;  %v2114_v5 = vrot.slane %v2113_v25, 2  ;;  %v2135_v15 = vrot.slane %v2134_v13, 2  ;;  %v1511_v35 = vmul.f32 %v3922_v57, %v1510_v4  ;;  %v2031_v55 = vadd.f32 %v2030_v12, %v2029_v58  ;;  %v4330_v14 = vld [vmem:[#allocation9_spill] sm:$0xff] }
 0x1ab   : > { %v1991_v53 = vadd.f32 %v1990_v61, %v1989_v37  ;;  %v2012_v21 = vadd.f32 %v2011_v45, %v2010_v33  ;;  %v1491_v11 = vadd.f32 %v1490_v38, %v4122_v49  ;;  %v2052_v26 = vadd.f32 %v2051_v16, %v4229_v30  ;;  %s2670_s17 = spop %2669 }
 0x1ac   : > { %v2115_v27 = vadd.f32 %v2114_v5, %v2113_v25  ;;  %v2136_v3 = vadd.f32 %v2135_v15, %v2134_v13  ;;  %v2032_v29 = vrot.slane %v2031_v55, 1  ;;  %v1531_v18 = vstv %s2670_s17  ;;  %s2672_s12 = spop %2671 }
 0x1ad   : > { %2713 = vpush %v1991_v53  ;;  %v1512_v36 = vadd.f32 %v1511_v35, %v1491_v11  ;;  %v2053_v59 = vrot.slane %v2052_v26, 1  ;;  %v1532_v41 = vmul.f32 %v3927_v56, %v1531_v18  ;;  %v1552_v47 = vstv %s2672_s12 }
 0x1ae   : > { %2715 = vpush %v2012_v21  ;;  %v2033_v57 = vadd.f32 %v2032_v29, %v2031_v55  ;;  %v1553_v58 = vmul.f32 %v3932_v51, %v1552_v47  ;;  %v2073_v12 = vadd.f32 %v2072_v9, %v2071_v63  ;;  %v2094_v49 = vadd.f32 %v2093_v2, %v2092_v10  ;;  %v4331_v9 = vld [vmem:[#allocation10_spill] sm:$0xff] }
 0x1af   : > { %v2054_v0 = vadd.f32 %v2053_v59, %v2052_v26  ;;  %v1533_v30 = vadd.f32 %v1532_v41, %v1512_v36  ;;  %s2674_s1 = spop %2673  ;;  %v2116_v16 = vrot.slane %v2115_v27, 1  ;;  %v2137_v44 = vrot.slane %v2136_v3, 1 }
 0x1b0   : > { %2717 = vpush %v2033_v57  ;;  %v2074_v22 = vrot.slane %v2073_v12, 1  ;;  %v2095_v46 = vrot.slane %v2094_v49, 1  ;;  %v1573_v37 = vstv %s2674_s1 }
 0x1b1   : > { %2719 = vpush %v2054_v0  ;;  %v1554_v33 = vadd.f32 %v1553_v58, %v1533_v30  ;;  %v1574_v56 = vmul.f32 %v4330_v14, %v1573_v37  ;;  %v2117_v43 = vadd.f32 %v2116_v16, %v2115_v27  ;;  %v2138_v10 = vadd.f32 %v2137_v44, %v2136_v3  ;;  %v4333_v30 = vld [vmem:[#allocation12_spill] sm:$0xff] }
 0x1b2   : > { %v2075_v25 = vadd.f32 %v2074_v22, %v2073_v12  ;;  %v2096_v13 = vadd.f32 %v2095_v46, %v2094_v49  ;;  %s2676_s27 = spop %2675  ;;  %v4332_v12 = vld [vmem:[#allocation11_spill] sm:$0xff] }
 0x1b3   : > { %v1575_v51 = vadd.f32 %v1574_v56, %v1554_v33  ;;  %v1594_v63 = vstv %s2676_s27 }
 0x1b4   : > { %2721 = vpush %v2075_v25  ;;  %v1595_v2 = vmul.f32 %v4331_v9, %v1594_v63  ;;  %s2678_s14 = spop %2677 }
 0x1b5   : > { %2723 = vpush %v2096_v13  ;;  %v1615_v61 = vstv %s2678_s14  ;;  %v4334_v13 = vld [vmem:[#allocation13_spill] sm:$0xff] }
 0x1b6   : > { %v1596_v45 = vadd.f32 %v1595_v2, %v1575_v51  ;;  %2725 = vpush %v2117_v43  ;;  %v1616_v38 = vmul.f32 %v3968_v17, %v1615_v61  ;;  %s2680_s24 = spop %2679 }
 0x1b7   : > { %2727 = vpush %v2138_v10  ;;  %v1636_v4 = vstv %s2680_s24 }
 0x1b8   : > { %v1617_v5 = vadd.f32 %v1616_v38, %v1596_v45  ;;  %v1637_v15 = vmul.f32 %v3974_v31, %v1636_v4  ;;  %v4335_v4 = vld [vmem:[#allocation14_spill] sm:$0xff] }
 0x1ba   : > { %v1638_v35 = vadd.f32 %v1637_v15, %v1617_v5  ;;  %s2682_s16 = spop %2681 }
 0x1bb   : > { %v1657_v55 = vstv %s2682_s16  ;;  %s2684_s18 = spop %2683 }
 0x1bc   : > { %v1658_v53 = vmul.f32 %v3979_v19, %v1657_v55  ;;  %v1678_v21 = vstv %s2684_s18 }
 0x1bd   : > { %v1679_v26 = vmul.f32 %v3986_v32, %v1678_v21 }
 0x1be   : > { %v1659_v11 = vadd.f32 %v1658_v53, %v1638_v35 }
 0x1bf   : > { %s2686_s26 = spop %2685 }
 0x1c0   : > { %v1680_v27 = vadd.f32 %v1679_v26, %v1659_v11  ;;  %v1699_v3 = vstv %s2686_s26  ;;  %s2688_s0 = spop %2687 }
 0x1c1   : > { %v1700_v17 = vmul.f32 %v3992_v34, %v1699_v3  ;;  %v1720_v29 = vstv %s2688_s0 }
 0x1c2   : > { %v1721_v31 = vmul.f32 %v3997_v52, %v1720_v29 }
 0x1c3   : > { %v1701_v18 = vadd.f32 %v1700_v17, %v1680_v27  ;;  %s2690_s8 = spop %2689 }
 0x1c4   : > { %v1741_v36 = vstv %s2690_s8  ;;  %s2692_s15 = spop %2691 }
 0x1c5   : > { %v1722_v59 = vadd.f32 %v1721_v31, %v1701_v18  ;;  %v1742_v19 = vmul.f32 %v4002_v6, %v1741_v36  ;;  %v1762_v41 = vstv %s2692_s15 }
 0x1c6   : > { %v1763_v32 = vmul.f32 %v4010_v60, %v1762_v41 }
 0x1c7   : > { %v1743_v47 = vadd.f32 %v1742_v19, %v1722_v59 }
 0x1c8   : > { %s2694_s9 = spop %2693 }
 0x1c9   : > { %v1764_v57 = vadd.f32 %v1763_v32, %v1743_v47  ;;  %v1783_v58 = vstv %s2694_s9  ;;  %s2696_s10 = spop %2695 }
 0x1ca   : > { %v1784_v34 = vmul.f32 %v4332_v12, %v1783_v58  ;;  %v1804_v49 = vstv %s2696_s10 }
 0x1cb   : > { %v1805_v52 = vmul.f32 %v4333_v30, %v1804_v49 }
 0x1cc   : > { %v1785_v0 = vadd.f32 %v1784_v34, %v1764_v57  ;;  %s2698_s6 = spop %2697 }
 0x1cd   : > { %v1825_v16 = vstv %s2698_s6  ;;  %s2700_s28 = spop %2699 }
 0x1ce   : > { %v1806_v44 = vadd.f32 %v1805_v52, %v1785_v0  ;;  %v1826_v6 = vmul.f32 %v4026_v42, %v1825_v16  ;;  %v1846_v22 = vstv %s2700_s28 }
 0x1cf   : > { %v1847_v60 = vmul.f32 %v4034_v23, %v1846_v22 }
 0x1d0   : > { %v1827_v46 = vadd.f32 %v1826_v6, %v1806_v44 }
 0x1d1   : > { %s2702_s30 = spop %2701 }
 0x1d2   : > { %v1848_v37 = vadd.f32 %v1847_v60, %v1827_v46  ;;  %v1867_v33 = vstv %s2702_s30  ;;  %s2704_s7 = spop %2703 }
 0x1d3   : > { %v1868_v14 = vmul.f32 %v4040_v7, %v1867_v33  ;;  %v1888_v56 = vstv %s2704_s7 }
 0x1d4   : > { %v1889_v43 = vmul.f32 %v4334_v13, %v1888_v56 }
 0x1d5   : > { %v1869_v25 = vadd.f32 %v1868_v14, %v1848_v37  ;;  %s2706_s11 = spop %2705 }
 0x1d6   : > { %v1909_v51 = vstv %s2706_s11  ;;  %s2708_s21 = spop %2707 }
 0x1d7   : > { %v1890_v63 = vadd.f32 %v1889_v43, %v1869_v25  ;;  %v1910_v42 = vmul.f32 %v4050_v39, %v1909_v51  ;;  %v1930_v10 = vstv %s2708_s21 }
 0x1d8   : > { %v1931_v23 = vmul.f32 %v4058_v50, %v1930_v10 }
 0x1d9   : > { %v1911_v9 = vadd.f32 %v1910_v42, %v1890_v63 }
 0x1da   : > { %s2710_s17 = spop %2709 }
 0x1db   : > { %v1932_v2 = vadd.f32 %v1931_v23, %v1911_v9  ;;  %v1951_v61 = vstv %s2710_s17  ;;  %s2712_s12 = spop %2711 }
 0x1dc   : > { %v1952_v7 = vmul.f32 %v4064_v62, %v1951_v61  ;;  %v1972_v45 = vstv %s2712_s12 }
 0x1dd   : > { %v1973_v5 = vmul.f32 %v4335_v4, %v1972_v45 }
 0x1de   : > { %v1953_v38 = vadd.f32 %v1952_v7, %v1932_v2  ;;  %s2714_s1 = spop %2713 }
 0x1df   : > { %v1993_v15 = vstv %s2714_s1  ;;  %s2716_s27 = spop %2715 }
 0x1e0   : > { %v1974_v35 = vadd.f32 %v1973_v5, %v1953_v38  ;;  %v1994_v39 = vmul.f32 %v4074_v8, %v1993_v15  ;;  %v2014_v55 = vstv %s2716_s27 }
 0x1e1   : > { %s2718_s14 = spop %2717  ;;  %v2015_v50 = vmul.f32 %v4082_v24, %v2014_v55 }
 0x1e2   : > { %v1995_v53 = vadd.f32 %v1994_v39, %v1974_v35  ;;  %v2035_v21 = vstv %s2718_s14  ;;  %s2720_s24 = spop %2719 }
 0x1e3   : > { %v2036_v11 = vmul.f32 %v4088_v48, %v2035_v21  ;;  %v2056_v62 = vstv %s2720_s24 }
 0x1e4   : > { %v2016_v26 = vadd.f32 %v2015_v50, %v1995_v53  ;;  %v2057_v3 = vmul.f32 %v4093_v54, %v2056_v62 }
 0x1e5   : > { %s2722_s16 = spop %2721 }
 0x1e6   : > { %v2037_v27 = vadd.f32 %v2036_v11, %v2016_v26  ;;  %v2077_v17 = vstv %s2722_s16  ;;  %s2724_s18 = spop %2723 }
 0x1e7   : > { %v2078_v8 = vmul.f32 %v4098_v1, %v2077_v17  ;;  %v2098_v29 = vstv %s2724_s18  ;;  %s2726_s26 = spop %2725 }
 0x1e8   : > { %v2058_v18 = vadd.f32 %v2057_v3, %v2037_v27  ;;  %v2119_v31 = vstv %s2726_s26  ;;  %s2728_s0 = spop %2727  ;;  %v2099_v36 = vmul.f32 %v4109_v20, %v2098_v29 }
 0x1e9   : > { %v2120_v48 = vmul.f32 %v4114_v28, %v2119_v31  ;;  %v2140_v59 = vstv %s2728_s0 }
 0x1ea   : > { %v2079_v24 = vadd.f32 %v2078_v8, %v2058_v18  ;;  %v2141_v54 = vmul.f32 %v4119_v40, %v2140_v59 }
 0x1ec   : > { %v2100_v19 = vadd.f32 %v2099_v36, %v2079_v24 }
 0x1ee   : > { %v2121_v41 = vadd.f32 %v2120_v48, %v2100_v19 }
 0x1f0   : > { %v2142_v47 = vadd.f32 %v2141_v54, %v2121_v41 }
 0x1f2   : > { %2143 = vst [vmem:[%s4242_s13 + $0x1] sm:$0x1] %v2142_v47 }
 0x1f3 PF: > { %s22_s23 = sadd.s32 1, %s3007_s23   ;;  %s4336_s18 = smov %s2991_s19 }
 0x1f4   : > { %p19_p9 = scmp.ge.s32.totalorder %s22_s23, 4   ;;  %s4337_s19 = smov %s2995_s20 }
 0x1f5   : > { %s4338_s20 = smov %s3092_s29  ;;  %s4339_s21 = smov %s3003_s22 }
 0x1f6   : > { %s4340_s22 = smov %s4342_s25  ;;  %21 = sbr.rel (!%p19_p9) target bundleno = 9 (0x9), region = 134 }
 0x1fb   :  { %2219 = vsyncpa [#allocation3], 1 }
 0x1fc   :  { %2221 = vsyncpa [#allocation3 + $0x1], 1 }
 0x1fd   :  { %2222 = vsyncpa [#allocation5], 1 }
 0x1fe   :  { %2224 = vsyncpa [#allocation5 + $0x1], 1 }

</bundles_post_ra>
